<compile_context>
chip_gen: v5e
topology: v5e:2x2
jax: 0.10.0
libtpu: 0.0.40
codegen_flags: <defaults>
</compile_context>

<pallas_src>
import functools

import numpy as np
import jax
import jax.numpy as jnp
from jax import lax
from jax.experimental import pallas as pl
from jax.experimental.pallas import tpu as pltpu

_NEG_INF = -1e30
_EPS_OUT = 5e-8


def _leaky_relu(x, slope=0.2):
    return jnp.where(x > 0, x, slope * x)


def _gat_dense(x, adj, w, a_dst, a_src, bias):
    """PyG-style single-head GATConv on a dense adjacency.
    adj[i, j] = 1 iff edge j -> i exists (self-loops included).  Works on a
    block-diagonal adjacency so a batch of independent per-date graphs is
    processed in one shot."""
    h = jnp.dot(x, w, preferred_element_type=jnp.float32)            # (N, F)
    s_dst = jnp.sum(h * a_dst, axis=-1, keepdims=True)               # (N, 1)
    s_src = jnp.sum(h * a_src, axis=-1, keepdims=True)               # (N, 1)
    e = _leaky_relu(s_dst + jnp.transpose(s_src))                    # (N, N)
    e = jnp.where(adj > 0, e, _NEG_INF)
    e = e - jnp.max(e, axis=-1, keepdims=True)
    p = jnp.exp(e)
    alpha = p / jnp.sum(p, axis=-1, keepdims=True)                   # exact
    return jnp.dot(alpha, h, preferred_element_type=jnp.float32) + bias


def cga_kernel(x_ref, p_ref, out_ref, gi_ref, *, offs, dims):
    W, Bt, Cp, D = dims["W"], dims["Bt"], dims["Cp"], dims["D"]
    H, O, C = dims["H"], dims["O"], dims["C"]
    R = Bt * Cp                      # stacked rows: dates x padded companies
    H2 = 2 * H

    def ld(name):
        r0, nr, nc = offs[name]
        return p_ref[r0:r0 + nr, 0:nc]          # static, 8-row-aligned view

    # ---- BatchNorm1d (train-mode batch stats over the REAL companies) --------
    x = x_ref[...]                              # (W, Bt, Cp, D); pad rows zero
    gamma = ld("bn_gamma").reshape(W, 1, 1, D)
    beta = ld("bn_beta").reshape(W, 1, 1, D)
    inv_c = 1.0 / C
    mean = jnp.sum(x, axis=2, keepdims=True) * inv_c
    ex2 = jnp.sum(x * x, axis=2, keepdims=True) * inv_c
    var = ex2 - mean * mean                     # biased var over real rows
    x_n = (x - mean) * lax.rsqrt(var + 1e-5) * gamma + beta

    # ---- GRU input projection: ONE matmul, result kept in VMEM scratch -------
    w_ih = ld("gru_w_ih")                       # (D, 3H), gate order r|z|n
    b_i = ld("gru_b_i")                         # (1, 3H); b_hh_{r,z} folded in
    gi_ref[...] = (jnp.dot(x_n.reshape(W * R, D), w_ih,
                           preferred_element_type=jnp.float32) + b_i)

    # ---- GRU recurrence on the stacked (Bt*Cp, H) rows ------------------------
    w_hh = ld("gru_w_hh")                       # (H, 3H): one MXU pass / step
    b_hn = ld("gru_b_hn")                       # (1, H)
    h = jnp.zeros((R, H), dtype=jnp.float32)
    for t in range(W):                          # static unroll over the window
        gi_t = gi_ref[t * R:(t + 1) * R, :]     # aligned 32-row VMEM slice
        gh = jnp.dot(h, w_hh, preferred_element_type=jnp.float32)
        rz = jax.nn.sigmoid(gi_t[:, :H2] + gh[:, :H2])
        r = rz[:, :H]
        z = rz[:, H:H2]
        n = jnp.tanh(gi_t[:, H2:] + r * (gh[:, H2:] + b_hn))
        h = (1.0 - z) * n + z * h
    seq_emb = h                                 # (R, H)

    # ---- intra-sector GAT (block-diagonal across the Bt dates) ----------------
    intra = _gat_dense(seq_emb, ld("inner_adj"), ld("intra_w"),
                       ld("intra_a_dst"), ld("intra_a_src"), ld("intra_b"))

    # ---- per (date, sector) max pooling ---------------------------------------
    member_sc = ld("member_sc")                 # (Bt*S, Bt*Cp), block-diagonal
    masked = jnp.where(member_sc[:, :, None] > 0, intra[None, :, :], _NEG_INF)
    sect = jnp.max(masked, axis=1)              # (Bt*S, G1)

    # ---- inter-sector (categorical) GAT + scatter back to companies -----------
    sect = _gat_dense(sect, ld("outer_adj"), ld("cat_w"),
                      ld("cat_a_dst"), ld("cat_a_src"), ld("cat_b"))
    sect_rep = jnp.dot(ld("member_cs"), sect, preferred_element_type=jnp.float32)

    # ---- fusion: one matmul on the lane-concatenated (seq|sector|intra) -------
    fus_in = jnp.concatenate([seq_emb, sect_rep, intra], axis=-1)    # (R, H+G2+G1)
    fused = jnp.dot(fus_in, ld("fus_w"), preferred_element_type=jnp.float32) + ld("fus_b")
    fused = jnp.maximum(fused, 0.0)

    # ---- logits -> softmax(dim=1) -> cumsum(dim=1) -> clamp --------------------
    logits = jnp.dot(fused, ld("logit_w"), preferred_element_type=jnp.float32) + ld("logit_b")
    logits = logits - jnp.max(logits, axis=-1, keepdims=True)
    ex = jnp.exp(logits)
    prob = ex / jnp.sum(ex, axis=-1, keepdims=True)                  # exact softmax
    cols = [prob[:, 0:1]]
    for j in range(1, O):                       # tiny static cumsum: unrolled adds
        cols.append(cols[-1] + prob[:, j:j + 1])
    cum = jnp.concatenate(cols, axis=-1)
    out_ref[...] = jnp.clip(cum, _EPS_OUT, 1.0 - _EPS_OUT).reshape(Bt, Cp, O)


def categorical_graph_att_forward(x, pbuf, offs, dims):
    """x: (B, W, C, D) batch of date windows; returns (B, C, O)."""
    B, W, C, D = x.shape
    Cp, O, H, Bt = dims["Cp"], dims["O"], dims["H"], dims["Bt"]
    assert B % Bt == 0, "batch must be divisible by dates-per-step"
    assert Bt * Cp <= 128, "stacked company rows must fit 128 lanes"

    # Host-side layout plumbing: (B,W,C,D) -> (W,B,Cp,D), zero-padded companies.
    xp = jnp.transpose(x, (1, 0, 2, 3))
    if Cp > C:
        xp = jnp.pad(xp, ((0, 0), (0, 0), (0, Cp - C), (0, 0)))

    kernel = functools.partial(cga_kernel, offs=offs, dims=dims)
    out = pl.pallas_call(
        kernel,
        out_shape=jax.ShapeDtypeStruct((B, Cp, O), jnp.float32),
        grid=(B // Bt,),
        in_specs=[
            pl.BlockSpec((W, Bt, Cp, D), lambda b: (0, b, 0, 0)),
            pl.BlockSpec(pbuf.shape, lambda b: (0, 0)),              # resident
        ],
        out_specs=pl.BlockSpec((Bt, Cp, O), lambda b: (b, 0, 0)),
        scratch_shapes=[pltpu.VMEM((W * Bt * Cp, 3 * H), jnp.float32)],
        compiler_params=pltpu.CompilerParams(
            dimension_semantics=("parallel",)),
    )(xp, pbuf)
    return out[:, :C, :]


class _Packer:
    """Packs small 1D/2D f32 params into one (R, 128) buffer.
    Each param gets its own 8-row-aligned block at lane offset 0, so every
    in-kernel slice is a cheap, aligned static view (pad lanes/rows are zero)."""

    def __init__(self, lanes=128):
        self.lanes = lanes
        self.row = 0
        self.offsets = {}
        self.chunks = []

    def add(self, name, arr):
        arr = np.asarray(arr, np.float32)
        if arr.ndim == 1:
            arr = arr[None, :]
        assert arr.ndim == 2 and arr.shape[1] <= self.lanes
        self.offsets[name] = (self.row, arr.shape[0], arr.shape[1])
        self.chunks.append((self.row, arr))
        self.row += ((arr.shape[0] + 7) // 8) * 8

    def finish(self):
        rows = max(8, ((self.row + 7) // 8) * 8)
        buf = np.zeros((rows, self.lanes), np.float32)
        for r0, arr in self.chunks:
            buf[r0:r0 + arr.shape[0], :arr.shape[1]] = arr
        return jnp.asarray(buf), self.offsets


def reference_forward(x_b, lp):
    """Pure-JAX mirror of the module math (vmapped over the date batch)."""
    H = lp["w_hh_t"].shape[0]

    def gat(xin, adj, w_t, a_src, a_dst, b):
        hh = xin @ w_t
        e = _leaky_relu(jnp.sum(hh * a_dst, -1, keepdims=True)
                        + jnp.sum(hh * a_src, -1)[None, :])
        e = jnp.where(adj > 0, e, _NEG_INF)
        alpha = jax.nn.softmax(e, axis=-1)
        return alpha @ hh + b

    def single(x):                                   # x: (W, C, D)
        W, C, _ = x.shape
        mean = jnp.mean(x, axis=1, keepdims=True)
        var = jnp.mean((x - mean) ** 2, axis=1, keepdims=True)
        x_n = ((x - mean) * lax.rsqrt(var + 1e-5)
               * lp["bn_gamma"][:, None, :] + lp["bn_beta"][:, None, :])
        h = jnp.zeros((C, H), jnp.float32)
        for t in range(W):
            gi = x_n[t] @ lp["w_ih_t"] + lp["b_ih"]
            gh = h @ lp["w_hh_t"] + lp["b_hh"]
            r = jax.nn.sigmoid(gi[:, :H] + gh[:, :H])
            z = jax.nn.sigmoid(gi[:, H:2 * H] + gh[:, H:2 * H])
            n = jnp.tanh(gi[:, 2 * H:] + r * gh[:, 2 * H:])
            h = (1.0 - z) * n + z * h
        seq = h
        intra = gat(seq, lp["inner_adj"], lp["intra_w_t"],
                    lp["intra_a_src"], lp["intra_a_dst"], lp["intra_b"])
        masked = jnp.where(lp["member_sc"][:, :, None] > 0, intra[None], _NEG_INF)
        sect = jnp.max(masked, axis=1)
        sect = gat(sect, lp["outer_adj"], lp["cat_w_t"],
                   lp["cat_a_src"], lp["cat_a_dst"], lp["cat_b"])
        sect_rep = lp["member_cs"] @ sect
        fus_in = jnp.concatenate([seq, sect_rep, intra], axis=-1)
        fused = jax.nn.relu(fus_in @ lp["fus_w_t"] + lp["fus_b"])
        logits = fused @ lp["logit_w_t"] + lp["logit_b"]
        p = jax.nn.softmax(logits, axis=1)
        cum = jnp.cumsum(p, axis=1)
        return jnp.clip(cum, _EPS_OUT, 1.0 - _EPS_OUT)

    return jax.vmap(single)(x_b)


if __name__ == "__main__":
    # Small shapes consistent with the module.
    W, D = 8, 4                        # window_size, input_dim
    H, G1, G2, O = 16, 16, 16, 4       # lstm_hidn, intra_gat, inter_gat, output
    company_to_sector = [0] * 5 + [1] * 4 + [2] * 3   # 12 companies, 3 sectors
    C = len(company_to_sector)
    S = len(set(company_to_sector))
    Cp = 16                            # company axis padded to a multiple of 8
    B = 4                              # batch of dates/windows
    Bt = 2                             # dates per grid step (2 steps -> v7x both
                                       # TCs; set Bt=B on v5e/v6e for one step)

    key = jax.random.PRNGKey(0)
    ks = jax.random.split(key, 32)

    def rnd(k, shape, scale=0.1):
        return scale * jax.random.normal(k, shape, dtype=jnp.float32)

    sector = np.asarray(company_to_sector, np.int32)
    member_sc_np = (np.arange(S)[:, None] == sector[None, :]).astype(np.float32)  # (S, C)
    inner_adj_np = (sector[:, None] == sector[None, :]).astype(np.float32)        # intra + self
    outer_adj_np = np.ones((S, S), np.float32)                                    # fully connected

    # ---- "logical" parameters (same parameterization as the PyTorch module) ----
    lp = {
        "bn_gamma": 1.0 + rnd(ks[0], (W, D)),
        "bn_beta": rnd(ks[1], (W, D)),
        # GRUCell (pre-transposed: x @ W_ih^T == x @ w_ih_t), gate order r|z|n
        "w_ih_t": rnd(ks[2], (D, 3 * H)),
        "w_hh_t": rnd(ks[3], (H, 3 * H)),
        "b_ih": rnd(ks[4], (3 * H,)),
        "b_hh": rnd(ks[5], (3 * H,)),
        # intra-sector GATConv
        "intra_w_t": rnd(ks[6], (H, G1)),
        "intra_a_src": rnd(ks[7], (G1,)),
        "intra_a_dst": rnd(ks[8], (G1,)),
        "intra_b": rnd(ks[9], (G1,)),
        # inter-sector GATConv
        "cat_w_t": rnd(ks[10], (G1, G2)),
        "cat_a_src": rnd(ks[11], (G2,)),
        "cat_a_dst": rnd(ks[12], (G2,)),
        "cat_b": rnd(ks[13], (G2,)),
        # fusion linear on cat([seq | sector | intra])
        "fus_w_t": rnd(ks[14], (H + G2 + G1, H)),
        "fus_b": rnd(ks[15], (H,)),
        # output head
        "logit_w_t": rnd(ks[16], (H, O)),
        "logit_b": rnd(ks[17], (O,)),
        # graph / sector bookkeeping (unpadded, per-date — for the reference)
        "inner_adj": jnp.asarray(inner_adj_np), "outer_adj": jnp.asarray(outer_adj_np),
        "member_sc": jnp.asarray(member_sc_np), "member_cs": jnp.asarray(member_sc_np.T),
    }

    # ---- block-diagonal, company-padded graph structures for the kernel -------
    inner_pad = np.zeros((Cp, Cp), np.float32)
    inner_pad[:C, :C] = inner_adj_np
    for i in range(C, Cp):
        inner_pad[i, i] = 1.0                       # inert self-loop for pad rows
    member_pad = np.zeros((S, Cp), np.float32)
    member_pad[:, :C] = member_sc_np                # pad companies: no membership
    eye_bt = np.eye(Bt, dtype=np.float32)
    inner_bd = np.kron(eye_bt, inner_pad)           # (Bt*Cp, Bt*Cp)
    member_sc_bd = np.kron(eye_bt, member_pad)      # (Bt*S,  Bt*Cp)
    member_cs_bd = member_sc_bd.T                   # (Bt*Cp, Bt*S)
    outer_bd = np.kron(eye_bt, outer_adj_np)        # (Bt*S,  Bt*S)

    # ---- kernel-side packing: everything in ONE resident (R, 128) buffer ------
    b_i_fold = (np.asarray(lp["b_ih"], np.float32)
                + np.concatenate([np.asarray(lp["b_hh"][:2 * H], np.float32),
                                  np.zeros(H, np.float32)]))
    pk = _Packer(128)
    pk.add("bn_gamma", lp["bn_gamma"])
    pk.add("bn_beta", lp["bn_beta"])
    pk.add("gru_w_ih", lp["w_ih_t"])
    pk.add("gru_b_i", b_i_fold)
    pk.add("gru_w_hh", lp["w_hh_t"])
    pk.add("gru_b_hn", lp["b_hh"][2 * H:3 * H])
    pk.add("intra_w", lp["intra_w_t"])
    pk.add("intra_a_dst", lp["intra_a_dst"])
    pk.add("intra_a_src", lp["intra_a_src"])
    pk.add("intra_b", lp["intra_b"])
    pk.add("inner_adj", inner_bd)
    pk.add("member_sc", member_sc_bd)
    pk.add("member_cs", member_cs_bd)
    pk.add("cat_w", lp["cat_w_t"])
    pk.add("cat_a_dst", lp["cat_a_dst"])
    pk.add("cat_a_src", lp["cat_a_src"])
    pk.add("cat_b", lp["cat_b"])
    pk.add("outer_adj", outer_bd)
    pk.add("fus_w", lp["fus_w_t"])
    pk.add("fus_b", lp["fus_b"])
    pk.add("logit_w", lp["logit_w_t"])
    pk.add("logit_b", lp["logit_b"])
    pbuf, offs = pk.finish()

    dims = dict(W=W, C=C, Cp=Cp, D=D, H=H, G1=G1, G2=G2, O=O, S=S, Bt=Bt)

    daily_data_batch = jax.random.normal(ks[30], (B, W, C, D), dtype=jnp.float32)

    out = categorical_graph_att_forward(daily_data_batch, pbuf, offs, dims)
    out = jax.block_until_ready(out)

    ref = jax.block_until_ready(reference_forward(daily_data_batch, lp))
    assert out.shape == (B, C, O)
    assert bool(jnp.all(jnp.isfinite(out)))
    err = float(jnp.max(jnp.abs(out - ref)))
    assert err < 5e-3, f"mismatch vs JAX reference: {err}"

    print("KERNEL_OK")
</pallas_src>

<mosaic_0001>
module attributes {stable_mosaic.version = 11 : i64} {
  func.func @cga_kernel(%arg0: i32, %arg1: memref<8x2x16x4xf32, #tpu.memory_space<vmem>>, %arg2: memref<296x128xf32, #tpu.memory_space<vmem>>, %arg3: memref<2x16x4xf32, #tpu.memory_space<vmem>>, %arg4: memref<256x48xf32, #tpu.memory_space<vmem>>) attributes {dimension_semantics = [#tpu.dimension_semantics<parallel>], iteration_bounds = array<i64: 2>, scalar_prefetch = 0 : i64, scratch_operands = 1 : i64, tpu.core_type = #tpu.core_type<tc>, window_params = [{transform_indices = @transform_0, window_bounds = array<i64: 8, 2, 16, 4>}, {pipeline_mode = #tpu.pipeline_mode<synchronous>, transform_indices = @transform_1, window_bounds = array<i64: 296, 128>}, {transform_indices = @transform_2, window_bounds = array<i64: 2, 16, 4>}]} {
    %c0 = arith.constant 0 : index
    %c0_0 = arith.constant 0 : index
    %c0_1 = arith.constant 0 : index
    %c0_2 = arith.constant 0 : index
    %0 = vector.load %arg1[%c0, %c0_0, %c0_1, %c0_2] : memref<8x2x16x4xf32, #tpu.memory_space<vmem>>, vector<8x2x16x4xf32>
    %c0_3 = arith.constant 0 : index
    %c0_4 = arith.constant 0 : index
    %1 = vector.load %arg2[%c0_3, %c0_4] : memref<296x128xf32, #tpu.memory_space<vmem>>, vector<8x4xf32>
    %2 = vector.shape_cast %1 : vector<8x4xf32> to vector<8x1x1x4xf32>
    %c8 = arith.constant 8 : index
    %c0_5 = arith.constant 0 : index
    %3 = vector.load %arg2[%c8, %c0_5] : memref<296x128xf32, #tpu.memory_space<vmem>>, vector<8x4xf32>
    %4 = vector.shape_cast %3 : vector<8x4xf32> to vector<8x1x1x4xf32>
    %cst = arith.constant dense<0.000000e+00> : vector<8x2x4xf32>
    %5 = vector.multi_reduction <add>, %0, %cst [2] : vector<8x2x16x4xf32> to vector<8x2x4xf32>
    %6 = vector.shape_cast %5 : vector<8x2x4xf32> to vector<8x2x1x4xf32>
    %cst_6 = arith.constant 0.0833333358 : f32
    %7 = vector.broadcast %cst_6 : f32 to vector<8x2x1x4xf32>
    %8 = arith.mulf %6, %7 : vector<8x2x1x4xf32>
    %9 = arith.mulf %0, %0 : vector<8x2x16x4xf32>
    %cst_7 = arith.constant dense<0.000000e+00> : vector<8x2x4xf32>
    %10 = vector.multi_reduction <add>, %9, %cst_7 [2] : vector<8x2x16x4xf32> to vector<8x2x4xf32>
    %11 = vector.shape_cast %10 : vector<8x2x4xf32> to vector<8x2x1x4xf32>
    %cst_8 = arith.constant 0.0833333358 : f32
    %12 = vector.broadcast %cst_8 : f32 to vector<8x2x1x4xf32>
    %13 = arith.mulf %11, %12 : vector<8x2x1x4xf32>
    %14 = arith.mulf %8, %8 : vector<8x2x1x4xf32>
    %15 = arith.subf %13, %14 : vector<8x2x1x4xf32>
    %16 = vector.broadcast %8 : vector<8x2x1x4xf32> to vector<8x2x16x4xf32>
    %17 = arith.subf %0, %16 : vector<8x2x16x4xf32>
    %cst_9 = arith.constant 9.99999974E-6 : f32
    %18 = vector.broadcast %cst_9 : f32 to vector<8x2x1x4xf32>
    %19 = arith.addf %15, %18 : vector<8x2x1x4xf32>
    %20 = math.rsqrt %19 : vector<8x2x1x4xf32>
    %21 = vector.broadcast %20 : vector<8x2x1x4xf32> to vector<8x2x16x4xf32>
    %22 = arith.mulf %17, %21 : vector<8x2x16x4xf32>
    %23 = vector.broadcast %2 : vector<8x1x1x4xf32> to vector<8x2x16x4xf32>
    %24 = arith.mulf %22, %23 : vector<8x2x16x4xf32>
    %25 = vector.broadcast %4 : vector<8x1x1x4xf32> to vector<8x2x16x4xf32>
    %26 = arith.addf %24, %25 : vector<8x2x16x4xf32>
    %c16 = arith.constant 16 : index
    %c0_10 = arith.constant 0 : index
    %27 = vector.load %arg2[%c16, %c0_10] : memref<296x128xf32, #tpu.memory_space<vmem>>, vector<4x48xf32>
    %c24 = arith.constant 24 : index
    %c0_11 = arith.constant 0 : index
    %28 = vector.load %arg2[%c24, %c0_11] : memref<296x128xf32, #tpu.memory_space<vmem>>, vector<1x48xf32>
    %29 = vector.shape_cast %26 : vector<8x2x16x4xf32> to vector<256x4xf32>
    %cst_12 = arith.constant dense<0.000000e+00> : vector<256x48xf32>
    %30 = tpu.matmul %29, %27, %cst_12 {dimension_numbers = #tpu.dot_dimension_numbers<[1], [0], [0], [1], [0, 0, 1, 1], [], []>} : vector<256x4xf32>, vector<4x48xf32>, vector<256x48xf32> -> vector<256x48xf32>
    %31 = vector.broadcast %28 : vector<1x48xf32> to vector<256x48xf32>
    %32 = arith.addf %30, %31 : vector<256x48xf32>
    %c0_13 = arith.constant 0 : index
    %c0_14 = arith.constant 0 : index
    %33 = vector.load %arg4[%c0_13, %c0_14] : memref<256x48xf32, #tpu.memory_space<vmem>>, vector<256x48xf32>
    tpu.vector_store %arg4[%c0_13, %c0_14], %32 {strides = array<i32>} : memref<256x48xf32, #tpu.memory_space<vmem>>, vector<256x48xf32>,
    %c32 = arith.constant 32 : index
    %c0_15 = arith.constant 0 : index
    %34 = vector.load %arg2[%c32, %c0_15] : memref<296x128xf32, #tpu.memory_space<vmem>>, vector<16x48xf32>
    %c48 = arith.constant 48 : index
    %c0_16 = arith.constant 0 : index
    %35 = vector.load %arg2[%c48, %c0_16] : memref<296x128xf32, #tpu.memory_space<vmem>>, vector<1x16xf32>
    %cst_17 = arith.constant 0.000000e+00 : f32
    %36 = vector.broadcast %cst_17 : f32 to vector<32x16xf32>
    %c0_18 = arith.constant 0 : index
    %c0_19 = arith.constant 0 : index
    %37 = vector.load %arg4[%c0_18, %c0_19] : memref<256x48xf32, #tpu.memory_space<vmem>>, vector<32x48xf32>
    %cst_20 = arith.constant dense<0.000000e+00> : vector<32x48xf32>
    %38 = tpu.matmul %36, %34, %cst_20 {dimension_numbers = #tpu.dot_dimension_numbers<[1], [0], [0], [1], [0, 0, 1, 1], [], []>} : vector<32x16xf32>, vector<16x48xf32>, vector<32x48xf32> -> vector<32x48xf32>
    %39 = vector.extract_strided_slice %37 {offsets = [0, 0], sizes = [32, 32], strides = [1, 1]} : vector<32x48xf32> to vector<32x32xf32>
    %40 = vector.extract_strided_slice %38 {offsets = [0, 0], sizes = [32, 32], strides = [1, 1]} : vector<32x48xf32> to vector<32x32xf32>
    %41 = arith.addf %39, %40 : vector<32x32xf32>
    %42 = arith.negf %41 : vector<32x32xf32>
    %43 = math.exp %42 : vector<32x32xf32>
    %cst_21 = arith.constant 1.000000e+00 : f32
    %44 = vector.broadcast %cst_21 : f32 to vector<32x32xf32>
    %45 = arith.addf %44, %43 : vector<32x32xf32>
    %46 = arith.divf %44, %45 : vector<32x32xf32>
    %47 = vector.extract_strided_slice %46 {offsets = [0, 0], sizes = [32, 16], strides = [1, 1]} : vector<32x32xf32> to vector<32x16xf32>
    %48 = vector.extract_strided_slice %46 {offsets = [0, 16], sizes = [32, 16], strides = [1, 1]} : vector<32x32xf32> to vector<32x16xf32>
    %49 = vector.extract_strided_slice %37 {offsets = [0, 32], sizes = [32, 16], strides = [1, 1]} : vector<32x48xf32> to vector<32x16xf32>
    %50 = vector.extract_strided_slice %38 {offsets = [0, 32], sizes = [32, 16], strides = [1, 1]} : vector<32x48xf32> to vector<32x16xf32>
    %51 = vector.broadcast %35 : vector<1x16xf32> to vector<32x16xf32>
    %52 = arith.addf %50, %51 : vector<32x16xf32>
    %53 = arith.mulf %47, %52 : vector<32x16xf32>
    %54 = arith.addf %49, %53 : vector<32x16xf32>
    %55 = math.tanh %54 : vector<32x16xf32>
    %cst_22 = arith.constant 1.000000e+00 : f32
    %56 = vector.broadcast %cst_22 : f32 to vector<32x16xf32>
    %57 = arith.subf %56, %48 : vector<32x16xf32>
    %58 = arith.mulf %57, %55 : vector<32x16xf32>
    %59 = arith.mulf %48, %36 : vector<32x16xf32>
    %60 = arith.addf %58, %59 : vector<32x16xf32>
    %c32_23 = arith.constant 32 : index
    %c0_24 = arith.constant 0 : index
    %61 = vector.load %arg4[%c32_23, %c0_24] : memref<256x48xf32, #tpu.memory_space<vmem>>, vector<32x48xf32>
    %cst_25 = arith.constant dense<0.000000e+00> : vector<32x48xf32>
    %62 = tpu.matmul %60, %34, %cst_25 {dimension_numbers = #tpu.dot_dimension_numbers<[1], [0], [0], [1], [0, 0, 1, 1], [], []>} : vector<32x16xf32>, vector<16x48xf32>, vector<32x48xf32> -> vector<32x48xf32>
    %63 = vector.extract_strided_slice %61 {offsets = [0, 0], sizes = [32, 32], strides = [1, 1]} : vector<32x48xf32> to vector<32x32xf32>
    %64 = vector.extract_strided_slice %62 {offsets = [0, 0], sizes = [32, 32], strides = [1, 1]} : vector<32x48xf32> to vector<32x32xf32>
    %65 = arith.addf %63, %64 : vector<32x32xf32>
    %66 = arith.negf %65 : vector<32x32xf32>
    %67 = math.exp %66 : vector<32x32xf32>
    %cst_26 = arith.constant 1.000000e+00 : f32
    %68 = vector.broadcast %cst_26 : f32 to vector<32x32xf32>
    %69 = arith.addf %68, %67 : vector<32x32xf32>
    %70 = arith.divf %68, %69 : vector<32x32xf32>
    %71 = vector.extract_strided_slice %70 {offsets = [0, 0], sizes = [32, 16], strides = [1, 1]} : vector<32x32xf32> to vector<32x16xf32>
    %72 = vector.extract_strided_slice %70 {offsets = [0, 16], sizes = [32, 16], strides = [1, 1]} : vector<32x32xf32> to vector<32x16xf32>
    %73 = vector.extract_strided_slice %61 {offsets = [0, 32], sizes = [32, 16], strides = [1, 1]} : vector<32x48xf32> to vector<32x16xf32>
    %74 = vector.extract_strided_slice %62 {offsets = [0, 32], sizes = [32, 16], strides = [1, 1]} : vector<32x48xf32> to vector<32x16xf32>
    %75 = vector.broadcast %35 : vector<1x16xf32> to vector<32x16xf32>
    %76 = arith.addf %74, %75 : vector<32x16xf32>
    %77 = arith.mulf %71, %76 : vector<32x16xf32>
    %78 = arith.addf %73, %77 : vector<32x16xf32>
    %79 = math.tanh %78 : vector<32x16xf32>
    %cst_27 = arith.constant 1.000000e+00 : f32
    %80 = vector.broadcast %cst_27 : f32 to vector<32x16xf32>
    %81 = arith.subf %80, %72 : vector<32x16xf32>
    %82 = arith.mulf %81, %79 : vector<32x16xf32>
    %83 = arith.mulf %72, %60 : vector<32x16xf32>
    %84 = arith.addf %82, %83 : vector<32x16xf32>
    %c64 = arith.constant 64 : index
    %c0_28 = arith.constant 0 : index
    %85 = vector.load %arg4[%c64, %c0_28] : memref<256x48xf32, #tpu.memory_space<vmem>>, vector<32x48xf32>
    %cst_29 = arith.constant dense<0.000000e+00> : vector<32x48xf32>
    %86 = tpu.matmul %84, %34, %cst_29 {dimension_numbers = #tpu.dot_dimension_numbers<[1], [0], [0], [1], [0, 0, 1, 1], [], []>} : vector<32x16xf32>, vector<16x48xf32>, vector<32x48xf32> -> vector<32x48xf32>
    %87 = vector.extract_strided_slice %85 {offsets = [0, 0], sizes = [32, 32], strides = [1, 1]} : vector<32x48xf32> to vector<32x32xf32>
    %88 = vector.extract_strided_slice %86 {offsets = [0, 0], sizes = [32, 32], strides = [1, 1]} : vector<32x48xf32> to vector<32x32xf32>
    %89 = arith.addf %87, %88 : vector<32x32xf32>
    %90 = arith.negf %89 : vector<32x32xf32>
    %91 = math.exp %90 : vector<32x32xf32>
    %cst_30 = arith.constant 1.000000e+00 : f32
    %92 = vector.broadcast %cst_30 : f32 to vector<32x32xf32>
    %93 = arith.addf %92, %91 : vector<32x32xf32>
    %94 = arith.divf %92, %93 : vector<32x32xf32>
    %95 = vector.extract_strided_slice %94 {offsets = [0, 0], sizes = [32, 16], strides = [1, 1]} : vector<32x32xf32> to vector<32x16xf32>
    %96 = vector.extract_strided_slice %94 {offsets = [0, 16], sizes = [32, 16], strides = [1, 1]} : vector<32x32xf32> to vector<32x16xf32>
    %97 = vector.extract_strided_slice %85 {offsets = [0, 32], sizes = [32, 16], strides = [1, 1]} : vector<32x48xf32> to vector<32x16xf32>
    %98 = vector.extract_strided_slice %86 {offsets = [0, 32], sizes = [32, 16], strides = [1, 1]} : vector<32x48xf32> to vector<32x16xf32>
    %99 = vector.broadcast %35 : vector<1x16xf32> to vector<32x16xf32>
    %100 = arith.addf %98, %99 : vector<32x16xf32>
    %101 = arith.mulf %95, %100 : vector<32x16xf32>
    %102 = arith.addf %97, %101 : vector<32x16xf32>
    %103 = math.tanh %102 : vector<32x16xf32>
    %cst_31 = arith.constant 1.000000e+00 : f32
    %104 = vector.broadcast %cst_31 : f32 to vector<32x16xf32>
    %105 = arith.subf %104, %96 : vector<32x16xf32>
    %106 = arith.mulf %105, %103 : vector<32x16xf32>
    %107 = arith.mulf %96, %84 : vector<32x16xf32>
    %108 = arith.addf %106, %107 : vector<32x16xf32>
    %c96 = arith.constant 96 : index
    %c0_32 = arith.constant 0 : index
    %109 = vector.load %arg4[%c96, %c0_32] : memref<256x48xf32, #tpu.memory_space<vmem>>, vector<32x48xf32>
    %cst_33 = arith.constant dense<0.000000e+00> : vector<32x48xf32>
    %110 = tpu.matmul %108, %34, %cst_33 {dimension_numbers = #tpu.dot_dimension_numbers<[1], [0], [0], [1], [0, 0, 1, 1], [], []>} : vector<32x16xf32>, vector<16x48xf32>, vector<32x48xf32> -> vector<32x48xf32>
    %111 = vector.extract_strided_slice %109 {offsets = [0, 0], sizes = [32, 32], strides = [1, 1]} : vector<32x48xf32> to vector<32x32xf32>
    %112 = vector.extract_strided_slice %110 {offsets = [0, 0], sizes = [32, 32], strides = [1, 1]} : vector<32x48xf32> to vector<32x32xf32>
    %113 = arith.addf %111, %112 : vector<32x32xf32>
    %114 = arith.negf %113 : vector<32x32xf32>
    %115 = math.exp %114 : vector<32x32xf32>
    %cst_34 = arith.constant 1.000000e+00 : f32
    %116 = vector.broadcast %cst_34 : f32 to vector<32x32xf32>
    %117 = arith.addf %116, %115 : vector<32x32xf32>
    %118 = arith.divf %116, %117 : vector<32x32xf32>
    %119 = vector.extract_strided_slice %118 {offsets = [0, 0], sizes = [32, 16], strides = [1, 1]} : vector<32x32xf32> to vector<32x16xf32>
    %120 = vector.extract_strided_slice %118 {offsets = [0, 16], sizes = [32, 16], strides = [1, 1]} : vector<32x32xf32> to vector<32x16xf32>
    %121 = vector.extract_strided_slice %109 {offsets = [0, 32], sizes = [32, 16], strides = [1, 1]} : vector<32x48xf32> to vector<32x16xf32>
    %122 = vector.extract_strided_slice %110 {offsets = [0, 32], sizes = [32, 16], strides = [1, 1]} : vector<32x48xf32> to vector<32x16xf32>
    %123 = vector.broadcast %35 : vector<1x16xf32> to vector<32x16xf32>
    %124 = arith.addf %122, %123 : vector<32x16xf32>
    %125 = arith.mulf %119, %124 : vector<32x16xf32>
    %126 = arith.addf %121, %125 : vector<32x16xf32>
    %127 = math.tanh %126 : vector<32x16xf32>
    %cst_35 = arith.constant 1.000000e+00 : f32
    %128 = vector.broadcast %cst_35 : f32 to vector<32x16xf32>
    %129 = arith.subf %128, %120 : vector<32x16xf32>
    %130 = arith.mulf %129, %127 : vector<32x16xf32>
    %131 = arith.mulf %120, %108 : vector<32x16xf32>
    %132 = arith.addf %130, %131 : vector<32x16xf32>
    %c128 = arith.constant 128 : index
    %c0_36 = arith.constant 0 : index
    %133 = vector.load %arg4[%c128, %c0_36] : memref<256x48xf32, #tpu.memory_space<vmem>>, vector<32x48xf32>
    %cst_37 = arith.constant dense<0.000000e+00> : vector<32x48xf32>
    %134 = tpu.matmul %132, %34, %cst_37 {dimension_numbers = #tpu.dot_dimension_numbers<[1], [0], [0], [1], [0, 0, 1, 1], [], []>} : vector<32x16xf32>, vector<16x48xf32>, vector<32x48xf32> -> vector<32x48xf32>
    %135 = vector.extract_strided_slice %133 {offsets = [0, 0], sizes = [32, 32], strides = [1, 1]} : vector<32x48xf32> to vector<32x32xf32>
    %136 = vector.extract_strided_slice %134 {offsets = [0, 0], sizes = [32, 32], strides = [1, 1]} : vector<32x48xf32> to vector<32x32xf32>
    %137 = arith.addf %135, %136 : vector<32x32xf32>
    %138 = arith.negf %137 : vector<32x32xf32>
    %139 = math.exp %138 : vector<32x32xf32>
    %cst_38 = arith.constant 1.000000e+00 : f32
    %140 = vector.broadcast %cst_38 : f32 to vector<32x32xf32>
    %141 = arith.addf %140, %139 : vector<32x32xf32>
    %142 = arith.divf %140, %141 : vector<32x32xf32>
    %143 = vector.extract_strided_slice %142 {offsets = [0, 0], sizes = [32, 16], strides = [1, 1]} : vector<32x32xf32> to vector<32x16xf32>
    %144 = vector.extract_strided_slice %142 {offsets = [0, 16], sizes = [32, 16], strides = [1, 1]} : vector<32x32xf32> to vector<32x16xf32>
    %145 = vector.extract_strided_slice %133 {offsets = [0, 32], sizes = [32, 16], strides = [1, 1]} : vector<32x48xf32> to vector<32x16xf32>
    %146 = vector.extract_strided_slice %134 {offsets = [0, 32], sizes = [32, 16], strides = [1, 1]} : vector<32x48xf32> to vector<32x16xf32>
    %147 = vector.broadcast %35 : vector<1x16xf32> to vector<32x16xf32>
    %148 = arith.addf %146, %147 : vector<32x16xf32>
    %149 = arith.mulf %143, %148 : vector<32x16xf32>
    %150 = arith.addf %145, %149 : vector<32x16xf32>
    %151 = math.tanh %150 : vector<32x16xf32>
    %cst_39 = arith.constant 1.000000e+00 : f32
    %152 = vector.broadcast %cst_39 : f32 to vector<32x16xf32>
    %153 = arith.subf %152, %144 : vector<32x16xf32>
    %154 = arith.mulf %153, %151 : vector<32x16xf32>
    %155 = arith.mulf %144, %132 : vector<32x16xf32>
    %156 = arith.addf %154, %155 : vector<32x16xf32>
    %c160 = arith.constant 160 : index
    %c0_40 = arith.constant 0 : index
    %157 = vector.load %arg4[%c160, %c0_40] : memref<256x48xf32, #tpu.memory_space<vmem>>, vector<32x48xf32>
    %cst_41 = arith.constant dense<0.000000e+00> : vector<32x48xf32>
    %158 = tpu.matmul %156, %34, %cst_41 {dimension_numbers = #tpu.dot_dimension_numbers<[1], [0], [0], [1], [0, 0, 1, 1], [], []>} : vector<32x16xf32>, vector<16x48xf32>, vector<32x48xf32> -> vector<32x48xf32>
    %159 = vector.extract_strided_slice %157 {offsets = [0, 0], sizes = [32, 32], strides = [1, 1]} : vector<32x48xf32> to vector<32x32xf32>
    %160 = vector.extract_strided_slice %158 {offsets = [0, 0], sizes = [32, 32], strides = [1, 1]} : vector<32x48xf32> to vector<32x32xf32>
    %161 = arith.addf %159, %160 : vector<32x32xf32>
    %162 = arith.negf %161 : vector<32x32xf32>
    %163 = math.exp %162 : vector<32x32xf32>
    %cst_42 = arith.constant 1.000000e+00 : f32
    %164 = vector.broadcast %cst_42 : f32 to vector<32x32xf32>
    %165 = arith.addf %164, %163 : vector<32x32xf32>
    %166 = arith.divf %164, %165 : vector<32x32xf32>
    %167 = vector.extract_strided_slice %166 {offsets = [0, 0], sizes = [32, 16], strides = [1, 1]} : vector<32x32xf32> to vector<32x16xf32>
    %168 = vector.extract_strided_slice %166 {offsets = [0, 16], sizes = [32, 16], strides = [1, 1]} : vector<32x32xf32> to vector<32x16xf32>
    %169 = vector.extract_strided_slice %157 {offsets = [0, 32], sizes = [32, 16], strides = [1, 1]} : vector<32x48xf32> to vector<32x16xf32>
    %170 = vector.extract_strided_slice %158 {offsets = [0, 32], sizes = [32, 16], strides = [1, 1]} : vector<32x48xf32> to vector<32x16xf32>
    %171 = vector.broadcast %35 : vector<1x16xf32> to vector<32x16xf32>
    %172 = arith.addf %170, %171 : vector<32x16xf32>
    %173 = arith.mulf %167, %172 : vector<32x16xf32>
    %174 = arith.addf %169, %173 : vector<32x16xf32>
    %175 = math.tanh %174 : vector<32x16xf32>
    %cst_43 = arith.constant 1.000000e+00 : f32
    %176 = vector.broadcast %cst_43 : f32 to vector<32x16xf32>
    %177 = arith.subf %176, %168 : vector<32x16xf32>
    %178 = arith.mulf %177, %175 : vector<32x16xf32>
    %179 = arith.mulf %168, %156 : vector<32x16xf32>
    %180 = arith.addf %178, %179 : vector<32x16xf32>
    %c192 = arith.constant 192 : index
    %c0_44 = arith.constant 0 : index
    %181 = vector.load %arg4[%c192, %c0_44] : memref<256x48xf32, #tpu.memory_space<vmem>>, vector<32x48xf32>
    %cst_45 = arith.constant dense<0.000000e+00> : vector<32x48xf32>
    %182 = tpu.matmul %180, %34, %cst_45 {dimension_numbers = #tpu.dot_dimension_numbers<[1], [0], [0], [1], [0, 0, 1, 1], [], []>} : vector<32x16xf32>, vector<16x48xf32>, vector<32x48xf32> -> vector<32x48xf32>
    %183 = vector.extract_strided_slice %181 {offsets = [0, 0], sizes = [32, 32], strides = [1, 1]} : vector<32x48xf32> to vector<32x32xf32>
    %184 = vector.extract_strided_slice %182 {offsets = [0, 0], sizes = [32, 32], strides = [1, 1]} : vector<32x48xf32> to vector<32x32xf32>
    %185 = arith.addf %183, %184 : vector<32x32xf32>
    %186 = arith.negf %185 : vector<32x32xf32>
    %187 = math.exp %186 : vector<32x32xf32>
    %cst_46 = arith.constant 1.000000e+00 : f32
    %188 = vector.broadcast %cst_46 : f32 to vector<32x32xf32>
    %189 = arith.addf %188, %187 : vector<32x32xf32>
    %190 = arith.divf %188, %189 : vector<32x32xf32>
    %191 = vector.extract_strided_slice %190 {offsets = [0, 0], sizes = [32, 16], strides = [1, 1]} : vector<32x32xf32> to vector<32x16xf32>
    %192 = vector.extract_strided_slice %190 {offsets = [0, 16], sizes = [32, 16], strides = [1, 1]} : vector<32x32xf32> to vector<32x16xf32>
    %193 = vector.extract_strided_slice %181 {offsets = [0, 32], sizes = [32, 16], strides = [1, 1]} : vector<32x48xf32> to vector<32x16xf32>
    %194 = vector.extract_strided_slice %182 {offsets = [0, 32], sizes = [32, 16], strides = [1, 1]} : vector<32x48xf32> to vector<32x16xf32>
    %195 = vector.broadcast %35 : vector<1x16xf32> to vector<32x16xf32>
    %196 = arith.addf %194, %195 : vector<32x16xf32>
    %197 = arith.mulf %191, %196 : vector<32x16xf32>
    %198 = arith.addf %193, %197 : vector<32x16xf32>
    %199 = math.tanh %198 : vector<32x16xf32>
    %cst_47 = arith.constant 1.000000e+00 : f32
    %200 = vector.broadcast %cst_47 : f32 to vector<32x16xf32>
    %201 = arith.subf %200, %192 : vector<32x16xf32>
    %202 = arith.mulf %201, %199 : vector<32x16xf32>
    %203 = arith.mulf %192, %180 : vector<32x16xf32>
    %204 = arith.addf %202, %203 : vector<32x16xf32>
    %c224 = arith.constant 224 : index
    %c0_48 = arith.constant 0 : index
    %205 = vector.load %arg4[%c224, %c0_48] : memref<256x48xf32, #tpu.memory_space<vmem>>, vector<32x48xf32>
    %cst_49 = arith.constant dense<0.000000e+00> : vector<32x48xf32>
    %206 = tpu.matmul %204, %34, %cst_49 {dimension_numbers = #tpu.dot_dimension_numbers<[1], [0], [0], [1], [0, 0, 1, 1], [], []>} : vector<32x16xf32>, vector<16x48xf32>, vector<32x48xf32> -> vector<32x48xf32>
    %207 = vector.extract_strided_slice %205 {offsets = [0, 0], sizes = [32, 32], strides = [1, 1]} : vector<32x48xf32> to vector<32x32xf32>
    %208 = vector.extract_strided_slice %206 {offsets = [0, 0], sizes = [32, 32], strides = [1, 1]} : vector<32x48xf32> to vector<32x32xf32>
    %209 = arith.addf %207, %208 : vector<32x32xf32>
    %210 = arith.negf %209 : vector<32x32xf32>
    %211 = math.exp %210 : vector<32x32xf32>
    %cst_50 = arith.constant 1.000000e+00 : f32
    %212 = vector.broadcast %cst_50 : f32 to vector<32x32xf32>
    %213 = arith.addf %212, %211 : vector<32x32xf32>
    %214 = arith.divf %212, %213 : vector<32x32xf32>
    %215 = vector.extract_strided_slice %214 {offsets = [0, 0], sizes = [32, 16], strides = [1, 1]} : vector<32x32xf32> to vector<32x16xf32>
    %216 = vector.extract_strided_slice %214 {offsets = [0, 16], sizes = [32, 16], strides = [1, 1]} : vector<32x32xf32> to vector<32x16xf32>
    %217 = vector.extract_strided_slice %205 {offsets = [0, 32], sizes = [32, 16], strides = [1, 1]} : vector<32x48xf32> to vector<32x16xf32>
    %218 = vector.extract_strided_slice %206 {offsets = [0, 32], sizes = [32, 16], strides = [1, 1]} : vector<32x48xf32> to vector<32x16xf32>
    %219 = vector.broadcast %35 : vector<1x16xf32> to vector<32x16xf32>
    %220 = arith.addf %218, %219 : vector<32x16xf32>
    %221 = arith.mulf %215, %220 : vector<32x16xf32>
    %222 = arith.addf %217, %221 : vector<32x16xf32>
    %223 = math.tanh %222 : vector<32x16xf32>
    %cst_51 = arith.constant 1.000000e+00 : f32
    %224 = vector.broadcast %cst_51 : f32 to vector<32x16xf32>
    %225 = arith.subf %224, %216 : vector<32x16xf32>
    %226 = arith.mulf %225, %223 : vector<32x16xf32>
    %227 = arith.mulf %216, %204 : vector<32x16xf32>
    %228 = arith.addf %226, %227 : vector<32x16xf32>
    %c96_52 = arith.constant 96 : index
    %c0_53 = arith.constant 0 : index
    %229 = vector.load %arg2[%c96_52, %c0_53] : memref<296x128xf32, #tpu.memory_space<vmem>>, vector<32x32xf32>
    %c56 = arith.constant 56 : index
    %c0_54 = arith.constant 0 : index
    %230 = vector.load %arg2[%c56, %c0_54] : memref<296x128xf32, #tpu.memory_space<vmem>>, vector<16x16xf32>
    %c72 = arith.constant 72 : index
    %c0_55 = arith.constant 0 : index
    %231 = vector.load %arg2[%c72, %c0_55] : memref<296x128xf32, #tpu.memory_space<vmem>>, vector<1x16xf32>
    %c80 = arith.constant 80 : index
    %c0_56 = arith.constant 0 : index
    %232 = vector.load %arg2[%c80, %c0_56] : memref<296x128xf32, #tpu.memory_space<vmem>>, vector<1x16xf32>
    %c88 = arith.constant 88 : index
    %c0_57 = arith.constant 0 : index
    %233 = vector.load %arg2[%c88, %c0_57] : memref<296x128xf32, #tpu.memory_space<vmem>>, vector<1x16xf32>
    %cst_58 = arith.constant dense<0.000000e+00> : vector<32x16xf32>
    %234 = tpu.matmul %228, %230, %cst_58 {dimension_numbers = #tpu.dot_dimension_numbers<[1], [0], [0], [1], [0, 0, 1, 1], [], []>} : vector<32x16xf32>, vector<16x16xf32>, vector<32x16xf32> -> vector<32x16xf32>
    %235 = vector.broadcast %231 : vector<1x16xf32> to vector<32x16xf32>
    %236 = arith.mulf %234, %235 : vector<32x16xf32>
    %cst_59 = arith.constant dense<0.000000e+00> : vector<32xf32>
    %237 = vector.multi_reduction <add>, %236, %cst_59 [1] : vector<32x16xf32> to vector<32xf32>
    %238 = vector.shape_cast %237 : vector<32xf32> to vector<32x1xf32>
    %239 = vector.broadcast %232 : vector<1x16xf32> to vector<32x16xf32>
    %240 = arith.mulf %234, %239 : vector<32x16xf32>
    %cst_60 = arith.constant dense<0.000000e+00> : vector<32xf32>
    %241 = vector.multi_reduction <add>, %240, %cst_60 [1] : vector<32x16xf32> to vector<32xf32>
    %242 = vector.shape_cast %241 : vector<32xf32> to vector<32x1xf32>
    %243 = tpu.transpose %242, [1, 0] : vector<32x1xf32> -> vector<1x32xf32>
    %244 = vector.broadcast %238 : vector<32x1xf32> to vector<32x32xf32>
    %245 = vector.broadcast %243 : vector<1x32xf32> to vector<32x32xf32>
    %246 = arith.addf %244, %245 : vector<32x32xf32>
    %cst_61 = arith.constant 0.000000e+00 : f32
    %247 = vector.broadcast %cst_61 : f32 to vector<32x32xf32>
    %248 = arith.cmpf ogt, %246, %247 : vector<32x32xf32>
    %cst_62 = arith.constant 2.000000e-01 : f32
    %249 = vector.broadcast %cst_62 : f32 to vector<32x32xf32>
    %250 = arith.mulf %249, %246 : vector<32x32xf32>
    %251 = arith.select %248, %246, %250 : vector<32x32xi1>, vector<32x32xf32>
    %cst_63 = arith.constant 0.000000e+00 : f32
    %252 = vector.broadcast %cst_63 : f32 to vector<32x32xf32>
    %253 = arith.cmpf ogt, %229, %252 : vector<32x32xf32>
    %cst_64 = arith.constant -1.000000e+30 : f32
    %254 = vector.broadcast %cst_64 : f32 to vector<32x32xf32>
    %255 = arith.select %253, %251, %254 : vector<32x32xi1>, vector<32x32xf32>
    %cst_65 = arith.constant dense<0xFF800000> : vector<32xf32>
    %256 = vector.multi_reduction <maximumf>, %255, %cst_65 [1] : vector<32x32xf32> to vector<32xf32>
    %257 = vector.shape_cast %256 : vector<32xf32> to vector<32x1xf32>
    %258 = vector.broadcast %257 : vector<32x1xf32> to vector<32x32xf32>
    %259 = arith.subf %255, %258 : vector<32x32xf32>
    %260 = math.exp %259 : vector<32x32xf32>
    %cst_66 = arith.constant dense<0.000000e+00> : vector<32xf32>
    %261 = vector.multi_reduction <add>, %260, %cst_66 [1] : vector<32x32xf32> to vector<32xf32>
    %262 = vector.shape_cast %261 : vector<32xf32> to vector<32x1xf32>
    %263 = vector.broadcast %262 : vector<32x1xf32> to vector<32x32xf32>
    %264 = arith.divf %260, %263 : vector<32x32xf32>
    %cst_67 = arith.constant dense<0.000000e+00> : vector<32x16xf32>
    %265 = tpu.matmul %264, %234, %cst_67 {dimension_numbers = #tpu.dot_dimension_numbers<[1], [0], [0], [1], [0, 0, 1, 1], [], []>} : vector<32x32xf32>, vector<32x16xf32>, vector<32x16xf32> -> vector<32x16xf32>
    %266 = vector.broadcast %233 : vector<1x16xf32> to vector<32x16xf32>
    %267 = arith.addf %265, %266 : vector<32x16xf32>
    %c128_68 = arith.constant 128 : index
    %c0_69 = arith.constant 0 : index
    %268 = vector.load %arg2[%c128_68, %c0_69] : memref<296x128xf32, #tpu.memory_space<vmem>>, vector<6x32xf32>
    %269 = vector.shape_cast %268 : vector<6x32xf32> to vector<6x32x1xf32>
    %cst_70 = arith.constant 0.000000e+00 : f32
    %270 = vector.broadcast %cst_70 : f32 to vector<6x32x1xf32>
    %271 = arith.cmpf ogt, %269, %270 : vector<6x32x1xf32>
    %272 = vector.shape_cast %267 : vector<32x16xf32> to vector<1x32x16xf32>
    %cst_71 = arith.constant -1.000000e+30 : f32
    %273 = vector.shape_cast %271 : vector<6x32x1xi1> to vector<6x32x1xi1>
    %274 = vector.broadcast %273 : vector<6x32x1xi1> to vector<6x32x16xi1>
    %275 = vector.shape_cast %272 : vector<1x32x16xf32> to vector<1x32x16xf32>
    %276 = vector.broadcast %275 : vector<1x32x16xf32> to vector<6x32x16xf32>
    %277 = vector.broadcast %cst_71 : f32 to vector<6x32x16xf32>
    %278 = arith.select %274, %276, %277 : vector<6x32x16xi1>, vector<6x32x16xf32>
    %cst_72 = arith.constant dense<0xFF800000> : vector<6x16xf32>
    %279 = vector.multi_reduction <maximumf>, %278, %cst_72 [1] : vector<6x32x16xf32> to vector<6x16xf32>
    %c208 = arith.constant 208 : index
    %c0_73 = arith.constant 0 : index
    %280 = vector.load %arg2[%c208, %c0_73] : memref<296x128xf32, #tpu.memory_space<vmem>>, vector<6x6xf32>
    %c168 = arith.constant 168 : index
    %c0_74 = arith.constant 0 : index
    %281 = vector.load %arg2[%c168, %c0_74] : memref<296x128xf32, #tpu.memory_space<vmem>>, vector<16x16xf32>
    %c184 = arith.constant 184 : index
    %c0_75 = arith.constant 0 : index
    %282 = vector.load %arg2[%c184, %c0_75] : memref<296x128xf32, #tpu.memory_space<vmem>>, vector<1x16xf32>
    %c192_76 = arith.constant 192 : index
    %c0_77 = arith.constant 0 : index
    %283 = vector.load %arg2[%c192_76, %c0_77] : memref<296x128xf32, #tpu.memory_space<vmem>>, vector<1x16xf32>
    %c200 = arith.constant 200 : index
    %c0_78 = arith.constant 0 : index
    %284 = vector.load %arg2[%c200, %c0_78] : memref<296x128xf32, #tpu.memory_space<vmem>>, vector<1x16xf32>
    %cst_79 = arith.constant dense<0.000000e+00> : vector<6x16xf32>
    %285 = tpu.matmul %279, %281, %cst_79 {dimension_numbers = #tpu.dot_dimension_numbers<[1], [0], [0], [1], [0, 0, 1, 1], [], []>} : vector<6x16xf32>, vector<16x16xf32>, vector<6x16xf32> -> vector<6x16xf32>
    %286 = vector.broadcast %282 : vector<1x16xf32> to vector<6x16xf32>
    %287 = arith.mulf %285, %286 : vector<6x16xf32>
    %cst_80 = arith.constant dense<0.000000e+00> : vector<6xf32>
    %288 = vector.multi_reduction <add>, %287, %cst_80 [1] : vector<6x16xf32> to vector<6xf32>
    %289 = vector.shape_cast %288 : vector<6xf32> to vector<6x1xf32>
    %290 = vector.broadcast %283 : vector<1x16xf32> to vector<6x16xf32>
    %291 = arith.mulf %285, %290 : vector<6x16xf32>
    %cst_81 = arith.constant dense<0.000000e+00> : vector<6xf32>
    %292 = vector.multi_reduction <add>, %291, %cst_81 [1] : vector<6x16xf32> to vector<6xf32>
    %293 = vector.shape_cast %292 : vector<6xf32> to vector<6x1xf32>
    %294 = tpu.transpose %293, [1, 0] : vector<6x1xf32> -> vector<1x6xf32>
    %295 = vector.broadcast %289 : vector<6x1xf32> to vector<6x6xf32>
    %296 = vector.broadcast %294 : vector<1x6xf32> to vector<6x6xf32>
    %297 = arith.addf %295, %296 : vector<6x6xf32>
    %cst_82 = arith.constant 0.000000e+00 : f32
    %298 = vector.broadcast %cst_82 : f32 to vector<6x6xf32>
    %299 = arith.cmpf ogt, %297, %298 : vector<6x6xf32>
    %cst_83 = arith.constant 2.000000e-01 : f32
    %300 = vector.broadcast %cst_83 : f32 to vector<6x6xf32>
    %301 = arith.mulf %300, %297 : vector<6x6xf32>
    %302 = arith.select %299, %297, %301 : vector<6x6xi1>, vector<6x6xf32>
    %cst_84 = arith.constant 0.000000e+00 : f32
    %303 = vector.broadcast %cst_84 : f32 to vector<6x6xf32>
    %304 = arith.cmpf ogt, %280, %303 : vector<6x6xf32>
    %cst_85 = arith.constant -1.000000e+30 : f32
    %305 = vector.broadcast %cst_85 : f32 to vector<6x6xf32>
    %306 = arith.select %304, %302, %305 : vector<6x6xi1>, vector<6x6xf32>
    %cst_86 = arith.constant dense<0xFF800000> : vector<6xf32>
    %307 = vector.multi_reduction <maximumf>, %306, %cst_86 [1] : vector<6x6xf32> to vector<6xf32>
    %308 = vector.shape_cast %307 : vector<6xf32> to vector<6x1xf32>
    %309 = vector.broadcast %308 : vector<6x1xf32> to vector<6x6xf32>
    %310 = arith.subf %306, %309 : vector<6x6xf32>
    %311 = math.exp %310 : vector<6x6xf32>
    %cst_87 = arith.constant dense<0.000000e+00> : vector<6xf32>
    %312 = vector.multi_reduction <add>, %311, %cst_87 [1] : vector<6x6xf32> to vector<6xf32>
    %313 = vector.shape_cast %312 : vector<6xf32> to vector<6x1xf32>
    %314 = vector.broadcast %313 : vector<6x1xf32> to vector<6x6xf32>
    %315 = arith.divf %311, %314 : vector<6x6xf32>
    %cst_88 = arith.constant dense<0.000000e+00> : vector<6x16xf32>
    %316 = tpu.matmul %315, %285, %cst_88 {dimension_numbers = #tpu.dot_dimension_numbers<[1], [0], [0], [1], [0, 0, 1, 1], [], []>} : vector<6x6xf32>, vector<6x16xf32>, vector<6x16xf32> -> vector<6x16xf32>
    %317 = vector.broadcast %284 : vector<1x16xf32> to vector<6x16xf32>
    %318 = arith.addf %316, %317 : vector<6x16xf32>
    %c136 = arith.constant 136 : index
    %c0_89 = arith.constant 0 : index
    %319 = vector.load %arg2[%c136, %c0_89] : memref<296x128xf32, #tpu.memory_space<vmem>>, vector<32x6xf32>
    %cst_90 = arith.constant dense<0.000000e+00> : vector<32x16xf32>
    %320 = tpu.matmul %319, %318, %cst_90 {dimension_numbers = #tpu.dot_dimension_numbers<[1], [0], [0], [1], [0, 0, 1, 1], [], []>} : vector<32x6xf32>, vector<6x16xf32>, vector<32x16xf32> -> vector<32x16xf32>
    %321 = tpu.concatenate %228, %320, %267 in 1 : vector<32x16xf32>, vector<32x16xf32>, vector<32x16xf32> -> vector<32x48xf32>
    %c216 = arith.constant 216 : index
    %c0_91 = arith.constant 0 : index
    %322 = vector.load %arg2[%c216, %c0_91] : memref<296x128xf32, #tpu.memory_space<vmem>>, vector<48x16xf32>
    %cst_92 = arith.constant dense<0.000000e+00> : vector<32x16xf32>
    %323 = tpu.matmul %321, %322, %cst_92 {dimension_numbers = #tpu.dot_dimension_numbers<[1], [0], [0], [1], [0, 0, 1, 1], [], []>} : vector<32x48xf32>, vector<48x16xf32>, vector<32x16xf32> -> vector<32x16xf32>
    %c264 = arith.constant 264 : index
    %c0_93 = arith.constant 0 : index
    %324 = vector.load %arg2[%c264, %c0_93] : memref<296x128xf32, #tpu.memory_space<vmem>>, vector<1x16xf32>
    %325 = vector.broadcast %324 : vector<1x16xf32> to vector<32x16xf32>
    %326 = arith.addf %323, %325 : vector<32x16xf32>
    %cst_94 = arith.constant 0.000000e+00 : f32
    %327 = vector.broadcast %cst_94 : f32 to vector<32x16xf32>
    %328 = arith.maximumf %326, %327 : vector<32x16xf32>
    %c272 = arith.constant 272 : index
    %c0_95 = arith.constant 0 : index
    %329 = vector.load %arg2[%c272, %c0_95] : memref<296x128xf32, #tpu.memory_space<vmem>>, vector<16x4xf32>
    %cst_96 = arith.constant dense<0.000000e+00> : vector<32x4xf32>
    %330 = tpu.matmul %328, %329, %cst_96 {dimension_numbers = #tpu.dot_dimension_numbers<[1], [0], [0], [1], [0, 0, 1, 1], [], []>} : vector<32x16xf32>, vector<16x4xf32>, vector<32x4xf32> -> vector<32x4xf32>
    %c288 = arith.constant 288 : index
    %c0_97 = arith.constant 0 : index
    %331 = vector.load %arg2[%c288, %c0_97] : memref<296x128xf32, #tpu.memory_space<vmem>>, vector<1x4xf32>
    %332 = vector.broadcast %331 : vector<1x4xf32> to vector<32x4xf32>
    %333 = arith.addf %330, %332 : vector<32x4xf32>
    %cst_98 = arith.constant dense<0xFF800000> : vector<32xf32>
    %334 = vector.multi_reduction <maximumf>, %333, %cst_98 [1] : vector<32x4xf32> to vector<32xf32>
    %335 = vector.shape_cast %334 : vector<32xf32> to vector<32x1xf32>
    %336 = vector.broadcast %335 : vector<32x1xf32> to vector<32x4xf32>
    %337 = arith.subf %333, %336 : vector<32x4xf32>
    %338 = math.exp %337 : vector<32x4xf32>
    %cst_99 = arith.constant dense<0.000000e+00> : vector<32xf32>
    %339 = vector.multi_reduction <add>, %338, %cst_99 [1] : vector<32x4xf32> to vector<32xf32>
    %340 = vector.shape_cast %339 : vector<32xf32> to vector<32x1xf32>
    %341 = vector.broadcast %340 : vector<32x1xf32> to vector<32x4xf32>
    %342 = arith.divf %338, %341 : vector<32x4xf32>
    %343 = vector.extract_strided_slice %342 {offsets = [0, 0], sizes = [32, 1], strides = [1, 1]} : vector<32x4xf32> to vector<32x1xf32>
    %344 = vector.extract_strided_slice %342 {offsets = [0, 1], sizes = [32, 1], strides = [1, 1]} : vector<32x4xf32> to vector<32x1xf32>
    %345 = arith.addf %343, %344 : vector<32x1xf32>
    %346 = vector.extract_strided_slice %342 {offsets = [0, 2], sizes = [32, 1], strides = [1, 1]} : vector<32x4xf32> to vector<32x1xf32>
    %347 = arith.addf %345, %346 : vector<32x1xf32>
    %348 = vector.extract_strided_slice %342 {offsets = [0, 3], sizes = [32, 1], strides = [1, 1]} : vector<32x4xf32> to vector<32x1xf32>
    %349 = arith.addf %347, %348 : vector<32x1xf32>
    %350 = tpu.concatenate %343, %345, %347, %349 in 1 : vector<32x1xf32>, vector<32x1xf32>, vector<32x1xf32>, vector<32x1xf32> -> vector<32x4xf32>
    %cst_100 = arith.constant 5.000000e-08 : f32
    %cst_101 = arith.constant 0.99999994 : f32
    %351 = vector.broadcast %cst_100 : f32 to vector<32x4xf32>
    %352 = arith.maximumf %351, %350 : vector<32x4xf32>
    %353 = vector.broadcast %cst_101 : f32 to vector<32x4xf32>
    %354 = arith.minimumf %353, %352 : vector<32x4xf32>
    %355 = vector.shape_cast %354 : vector<32x4xf32> to vector<2x16x4xf32>
    %c0_102 = arith.constant 0 : index
    %c0_103 = arith.constant 0 : index
    %c0_104 = arith.constant 0 : index
    %356 = vector.load %arg3[%c0_102, %c0_103, %c0_104] : memref<2x16x4xf32, #tpu.memory_space<vmem>>, vector<2x16x4xf32>
    tpu.vector_store %arg3[%c0_102, %c0_103, %c0_104], %355 {strides = array<i32>} : memref<2x16x4xf32, #tpu.memory_space<vmem>>, vector<2x16x4xf32>,
    return
  }
  func.func @transform_0(%arg0: i32) -> (i32, i32, i32, i32) {
    %c0_i32 = arith.constant 0 : i32
    %c0_i32_0 = arith.constant 0 : i32
    %c0_i32_1 = arith.constant 0 : i32
    %c0_i32_2 = arith.constant 0 : i32
    return %c0_i32, %arg0, %c0_i32_0, %c0_i32_1 : i32, i32, i32, i32
  }
  func.func @transform_1(%arg0: i32) -> (i32, i32) {
    %c0_i32 = arith.constant 0 : i32
    %c0_i32_0 = arith.constant 0 : i32
    %c0_i32_1 = arith.constant 0 : i32
    return %c0_i32, %c0_i32_0 : i32, i32
  }
  func.func @transform_2(%arg0: i32) -> (i32, i32, i32) {
    %c0_i32 = arith.constant 0 : i32
    %c0_i32_0 = arith.constant 0 : i32
    %c0_i32_1 = arith.constant 0 : i32
    return %arg0, %c0_i32, %c0_i32_0 : i32, i32, i32
  }
}

</mosaic_0001>

<bundles_post_ra>
// kernel: tpu_custom_call.1
= control target key start
LH: loop header
LB: loop body
LE: loop exit
PB: predicated region body
PF: predicated region fallthrough
CT: control target
= control target key end

     0   :  { %s4784_s9 = smov 0   ;;  %s4786_s10 = smov 0   ;;  %s6399_s0 = inlined_call_operand.vmem [shape: f32[8,4,16,4], index: 0, kind: input, shape index: {}]   ;;  %s6400_s1 = inlined_call_operand.vmem [shape: f32[296,128], index: 1, kind: input, shape index: {}]   ;;  %s6401_s2 = inlined_call_operand.vmem [shape: f32[4,16,4], index: 2, kind: output, shape index: {}]  }
   0x1   :  { %s4788_s11 = smov 0  }
   0x2 LB: > { %s4263_s12 = sadd.s32 4294967295, %s4756_s11   ;;  %s4801_s13 = sadd.s32 1, %s4756_s11   ;;  %s4756_s11 = sphi %s4788_s11, %s6422_s11   ;;  %s4752_s10 = sphi %s4786_s10, %s6421_s10   ;;  %s4748_s9 = sphi %s4784_s9, %s6420_s9  }
   0x3   : > { %s16_s14 = ssub.s32 %s4756_s11, %s4801_s13  ;;  %s19_s15 = sadd.s32 1, %s4752_s10 }
   0x4   : > { %p17_p0 = scmp.eq.s32.totalorder %s16_s14, 0  ;;  %p26_p1 = scmp.ne.s32.totalorder %s4752_s10, %s4748_s9 }
   0x5   : > { %p27_p2 = scmp.eq.s32.totalorder %s4756_s11, 0  ;;  %p4266_p4 = scmp.ge.s32.totalorder %s4756_s11, 2 }
   0x6   : > { %s4810_s16 = scalar_select %p17_p0, %s4752_s10, %s19_s15  }
   0x7   : > { %p28_p3 = por %p27_p2, %p26_p1  ;;  %102 = sbr.rel (%p4266_p4) target bundleno = 48 (0x30), region = 20 }
   0xc   : > { %105 = sbr.rel (!%p28_p3) target bundleno = 48 (0x30), region = 24  ;;  %s107_s17 = sand.u32 (%p28_p3), 1, %s4752_s10  }
   0xd   : > { %s4396_s18 = sshll.u32 (%p28_p3), %s4756_s11, 5  ;;  %s4267_s19 = sshll.u32 (%p28_p3), %s107_s17, 8 }
   0xe   : > { %s4818_s22 = scalar_lea.vmem (%p28_p3), %s6399_s0, %s4396_s18  ;;  %s4823_s23 = scalar_lea.vmem (%p28_p3), [#allocation3], %s4267_s19 }
   0xf   : > { %v204_v0 = vld [vmem:[%s4818_s22] sm:$0xff] (%p28_p3)  ;;  %v206_v1 = vld [vmem:[%s4818_s22 + $0x8] sm:$0xff] (%p28_p3)  ;;  %v208_v2 = vld [vmem:[%s4818_s22 + $0x10] sm:$0xff] (%p28_p3) }
  0x10   : > { %205 = vst [vmem:[%s4823_s23] sm:$0xff] (%p28_p3), %v204_v0  ;;  %v210_v3 = vld [vmem:[%s4818_s22 + $0x18] sm:$0xff] (%p28_p3)  ;;  %v212_v4 = vld [vmem:[%s4818_s22 + $0x40] sm:$0xff] (%p28_p3)  ;;  %v214_v5 = vld [vmem:[%s4818_s22 + $0x48] sm:$0xff] (%p28_p3) }
  0x11   : > { %207 = vst [vmem:[%s4823_s23 + $0x8] sm:$0xff] %v206_v1  ;;  %v216_v6 = vld [vmem:[%s4818_s22 + $0x50] sm:$0xff]  ;;  %v218_v7 = vld [vmem:[%s4818_s22 + $0x58] sm:$0xff]  ;;  %v220_v8 = vld [vmem:[%s4818_s22 + $0x80] sm:$0xff] }
  0x12   : > { %209 = vst [vmem:[%s4823_s23 + $0x10] sm:$0xff] %v208_v2  ;;  %v222_v9 = vld [vmem:[%s4818_s22 + $0x88] sm:$0xff]  ;;  %v224_v10 = vld [vmem:[%s4818_s22 + $0x90] sm:$0xff]  ;;  %v226_v11 = vld [vmem:[%s4818_s22 + $0x98] sm:$0xff] }
  0x13   : > { %211 = vst [vmem:[%s4823_s23 + $0x18] sm:$0xff] %v210_v3  ;;  %v228_v12 = vld [vmem:[%s4818_s22 + $0xc0] sm:$0xff]  ;;  %v230_v13 = vld [vmem:[%s4818_s22 + $0xc8] sm:$0xff]  ;;  %v232_v14 = vld [vmem:[%s4818_s22 + $0xd0] sm:$0xff] }
  0x14   : > { %213 = vst [vmem:[%s4823_s23 + $0x20] sm:$0xff] %v212_v4  ;;  %v234_v15 = vld [vmem:[%s4818_s22 + $0xd8] sm:$0xff]  ;;  %v236_v16 = vld [vmem:[%s4818_s22 + $0x100] sm:$0xff]  ;;  %v238_v17 = vld [vmem:[%s4818_s22 + $0x108] sm:$0xff] }
  0x15   : > { %215 = vst [vmem:[%s4823_s23 + $0x28] sm:$0xff] %v214_v5  ;;  %v240_v18 = vld [vmem:[%s4818_s22 + $0x110] sm:$0xff]  ;;  %v242_v19 = vld [vmem:[%s4818_s22 + $0x118] sm:$0xff]  ;;  %v244_v20 = vld [vmem:[%s4818_s22 + $0x140] sm:$0xff] }
  0x16   : > { %217 = vst [vmem:[%s4823_s23 + $0x30] sm:$0xff] %v216_v6  ;;  %v246_v21 = vld [vmem:[%s4818_s22 + $0x148] sm:$0xff]  ;;  %v248_v22 = vld [vmem:[%s4818_s22 + $0x150] sm:$0xff]  ;;  %v250_v23 = vld [vmem:[%s4818_s22 + $0x158] sm:$0xff] }
  0x17   : > { %219 = vst [vmem:[%s4823_s23 + $0x38] sm:$0xff] %v218_v7  ;;  %v252_v24 = vld [vmem:[%s4818_s22 + $0x180] sm:$0xff]  ;;  %v254_v25 = vld [vmem:[%s4818_s22 + $0x188] sm:$0xff]  ;;  %v256_v26 = vld [vmem:[%s4818_s22 + $0x190] sm:$0xff] }
  0x18   : > { %221 = vst [vmem:[%s4823_s23 + $0x40] sm:$0xff] %v220_v8  ;;  %v258_v27 = vld [vmem:[%s4818_s22 + $0x198] sm:$0xff]  ;;  %v260_v28 = vld [vmem:[%s4818_s22 + $0x1c0] sm:$0xff]  ;;  %v262_v29 = vld [vmem:[%s4818_s22 + $0x1c8] sm:$0xff] }
  0x19   : > { %223 = vst [vmem:[%s4823_s23 + $0x48] sm:$0xff] %v222_v9  ;;  %v264_v30 = vld [vmem:[%s4818_s22 + $0x1d0] sm:$0xff]  ;;  %v266_v31 = vld [vmem:[%s4818_s22 + $0x1d8] sm:$0xff] }
  0x1a   : > { %225 = vst [vmem:[%s4823_s23 + $0x50] sm:$0xff] %v224_v10 }
  0x1b   : > { %227 = vst [vmem:[%s4823_s23 + $0x58] sm:$0xff] %v226_v11 }
  0x1c   : > { %229 = vst [vmem:[%s4823_s23 + $0x60] sm:$0xff] %v228_v12 }
  0x1d   : > { %231 = vst [vmem:[%s4823_s23 + $0x68] sm:$0xff] %v230_v13 }
  0x1e   : > { %233 = vst [vmem:[%s4823_s23 + $0x70] sm:$0xff] %v232_v14 }
  0x1f   : > { %235 = vst [vmem:[%s4823_s23 + $0x78] sm:$0xff] %v234_v15 }
  0x20   : > { %237 = vst [vmem:[%s4823_s23 + $0x80] sm:$0xff] %v236_v16 }
  0x21   : > { %239 = vst [vmem:[%s4823_s23 + $0x88] sm:$0xff] %v238_v17 }
  0x22   : > { %241 = vst [vmem:[%s4823_s23 + $0x90] sm:$0xff] %v240_v18 }
  0x23   : > { %243 = vst [vmem:[%s4823_s23 + $0x98] sm:$0xff] %v242_v19 }
  0x24   : > { %245 = vst [vmem:[%s4823_s23 + $0xa0] sm:$0xff] %v244_v20 }
  0x25   : > { %247 = vst [vmem:[%s4823_s23 + $0xa8] sm:$0xff] %v246_v21 }
  0x26   : > { %249 = vst [vmem:[%s4823_s23 + $0xb0] sm:$0xff] %v248_v22 }
  0x27   : > { %251 = vst [vmem:[%s4823_s23 + $0xb8] sm:$0xff] %v250_v23 }
  0x28   : > { %253 = vst [vmem:[%s4823_s23 + $0xc0] sm:$0xff] %v252_v24 }
  0x29   : > { %255 = vst [vmem:[%s4823_s23 + $0xc8] sm:$0xff] %v254_v25 }
  0x2a   : > { %257 = vst [vmem:[%s4823_s23 + $0xd0] sm:$0xff] %v256_v26 }
  0x2b   : > { %259 = vst [vmem:[%s4823_s23 + $0xd8] sm:$0xff] %v258_v27 }
  0x2c   : > { %261 = vst [vmem:[%s4823_s23 + $0xe0] sm:$0xff] %v260_v28 }
  0x2d   : > { %263 = vst [vmem:[%s4823_s23 + $0xe8] sm:$0xff] %v262_v29 }
  0x2e   : > { %265 = vst [vmem:[%s4823_s23 + $0xf0] sm:$0xff] %v264_v30 }
  0x2f   : > { %267 = vst [vmem:[%s4823_s23 + $0xf8] sm:$0xff] %v266_v31 }
  0x30 PF: > { %p4271_p5 = scmp.ge.s32.totalorder %s4756_s11, 1  ;;  %p272_p6 = scmp.lt.s32.totalorder %s4756_s11, 3 }
  0x32   : > { %p273_p7 = pnand %p4271_p5, %p272_p6 }
  0x33   : > { %s279_s4 = sand.u32 (!%p273_p7), 1, %s4748_s9   ;;  %s4758_s6 = smov (!%p273_p7), 32  }
  0x34   : > { %276 = sbr.rel (%p273_p7) target bundleno = 7429 (0x1d05), region = 62  ;;  %s4272_s5 = sshll.u32 (!%p273_p7), %s279_s4, 8 }
  0x35   : > { %s4911_s7 = scalar_lea.vmem (!%p273_p7), [#allocation3], %s4272_s5  ;;  %s4760_s17 = smov (!%p273_p7), 96  }
  0x36   : > { %s4761_s20 = smov (!%p273_p7), 112   ;;  %s4763_s3 = smov (!%p273_p7), 125  }
  0x37   : > { %s4764_s4 = smov (!%p273_p7), 127   ;;  %s4765_s5 = smov (!%p273_p7), 126  }
  0x38   : > { %s4766_s8 = smov (!%p273_p7), 1   ;;  %s4767_s9 = smov (!%p273_p7), 2  }
  0x39   : > { %v4891_v32 = vld [vmem:[%s6400_s1 + $0x28] sm:$0xff]  ;;  %v4896_v33 = vld [vmem:[%s6400_s1 + $0x20] sm:$0xff]  ;;  %v4456_v34 = vld [vmem:[%s6400_s1 + $0x30] ss:$0 sm:$0xff]  ;;  %vm1179_vm0 = vcmask 1043456   ;;  %vm6402_vm1 = vcmask 31744  }
  0x3a   : > { %1354 = vmatpush.msra.mxu1 %v4891_v32  ;;  %v1080_v35 = vld [vmem:[%s6400_s1 + $0x10] sm:$0xf]  ;;  %1451 = vrot.lane.b32.xlu0 %v4456_v34, %s4758_s6  ;;  %v4759_v36 = vmov 0.0   ;;  %v4914_v37 = vld [vmem:[%s4911_s7] sm:$0xff]  ;;  %v4917_v38 = vld [vmem:[%s4911_s7 + $0x8] sm:$0xff]  ;;  %vm6403_vm8 = vcmask 392192  }
  0x3b   : > { %4276 = vmatpush.msk.msra.mxu0 %vm1179_vm0, %v1080_v35  ;;  %4398 = vmatpush.msk.msra.mxu2 %vm1179_vm0, %v1080_v35  ;;  %v4920_v39 = vld [vmem:[%s4911_s7 + $0x10] sm:$0xff]  ;;  %v360_v40 = vsel %vm6402_vm1, %v4914_v37, 0.0  ;;  %v361_v41 = vsel %vm6402_vm1, %v4917_v38, 0.0  ;;  %v520_v42 = vmul.f32 %v4914_v37, %v4914_v37  ;;  %v521_v43 = vmul.f32 %v4917_v38, %v4917_v38  ;;  %v4932_v44 = vld [vmem:[%s4911_s7 + $0x18] sm:$0xff]  ;;  %s4768_s14 = smov 3  }
  0x3c   : > { %1355 = vmatpush.msra.mxu1 %v4896_v33  ;;  %4399 = vmatpush.msk.msra.mxu3 %vm1179_vm0, %v1080_v35  ;;  %v362_v45 = vadd.f32 %v361_v41, %v360_v40  ;;  %v369_v46 = vsel %vm6402_vm1, %v4920_v39, 0.0  ;;  %v370_v47 = vsel %vm6402_vm1, %v4932_v44, 0.0  ;;  %v522_v48 = vmul.f32 %v4920_v39, %v4920_v39  ;;  %v4960_v40 = vld [vmem:[%s6400_s1] sm:$0xff] }
  0x3d   : > { %1356 = vmatmul.f32.vlgmr.msra.gmra.mxu1 %v4759_v36  ;;  %1572 = vmatpush.msrb.mxu2 %v4891_v32  ;;  %v552_v49 = vsel %vm6402_vm1, %v520_v42, 0.0  ;;  %v553_v50 = vsel %vm6402_vm1, %v521_v43, 0.0  ;;  %v371_v51 = vadd.f32 %v370_v47, %v369_v46  ;;  %v523_v52 = vmul.f32 %v4932_v44, %v4932_v44  ;;  %v4966_v43 = vld [vmem:[%s6400_s1 + $0x8] sm:$0xff] }
  0x3e   : > { %1998 = vmatpush.msrb.mxu1 %v4891_v32  ;;  %1785 = vmatpush.msrb.mxu3 %v4891_v32  ;;  %v363_v53 = vrot.slane %v362_v45, 4  ;;  %v554_v54 = vadd.f32 %v553_v50, %v552_v49  ;;  %v561_v55 = vsel %vm6402_vm1, %v522_v48, 0.0  ;;  %v984_v46 = vperm.slane %v4960_v40, 0 }
  0x3f   : > { %1573 = vmatpush.msrb.mxu2 %v4896_v33  ;;  %v372_v56 = vrot.slane %v371_v51, 4  ;;  %v562_v57 = vsel %vm6402_vm1, %v523_v52, 0.0 }
  0x40   : > { %1999 = vmatpush.msrb.mxu1 %v4896_v33  ;;  %1786 = vmatpush.msrb.mxu3 %v4896_v33  ;;  %v364_v58 = vadd.f32 %v363_v53, %v362_v45  ;;  %v555_v59 = vrot.slane %v554_v54, 4  ;;  %v563_v60 = vadd.f32 %v562_v57, %v561_v55 }
  0x41   : > { %v373_v61 = vadd.f32 %v372_v56, %v371_v51  ;;  %v1032_v51 = vperm.slane %v4966_v43, 0 }
  0x42   : > { %2637 = vmatpush.msra.mxu1 %v4891_v32  ;;  %v365_v62 = vrot.slane %v364_v58, 2  ;;  %v556_v63 = vadd.f32 %v555_v59, %v554_v54  ;;  %v564_v0 = vrot.slane %v563_v60, 4 }
  0x43   : > { %v374_v1 = vrot.slane %v373_v61, 2 }
  0x44   : > { %2638 = vmatpush.msra.mxu1 %v4896_v33  ;;  %v366_v2 = vadd.f32 %v365_v62, %v364_v58  ;;  %v557_v3 = vrot.slane %v556_v63, 2  ;;  %v565_v4 = vadd.f32 %v564_v0, %v563_v60 }
  0x45   : > { %1359 = vmatmul.f32.gmra.mxu1 %v4759_v36  ;;  %v375_v5 = vadd.f32 %v374_v1, %v373_v61 }
  0x46   : > { %v367_v6 = vrot.slane %v366_v2, 1  ;;  %v558_v7 = vadd.f32 %v557_v3, %v556_v63  ;;  %v566_v8 = vrot.slane %v565_v4, 2 }
  0x47   : > { %v376_v9 = vrot.slane %v375_v5, 1 }
  0x48   : > { %v368_v10 = vadd.f32 %v367_v6, %v366_v2  ;;  %v559_v11 = vrot.slane %v558_v7, 1  ;;  %v567_v12 = vadd.f32 %v566_v8, %v565_v4  ;;  %v4990_v8 = vld [vmem:[%s6400_s1 + $0x18] ss:$0 sm:$0xff] }
  0x49   : > { %v377_v13 = vadd.f32 %v376_v9, %v375_v5 }
  0x4a   : > { %v504_v14 = vmul.f32 0.083333336, %v368_v10  ;;  %v560_v15 = vadd.f32 %v559_v11, %v558_v7  ;;  %v568_v16 = vrot.slane %v567_v12, 1 }
  0x4b   : > { %v505_v17 = vmul.f32 0.083333336, %v377_v13 }
  0x4c   : > { %v696_v18 = vmul.f32 0.083333336, %v560_v15  ;;  %v712_v19 = vmul.f32 %v504_v14, %v504_v14  ;;  %v569_v20 = vadd.f32 %v568_v16, %v567_v12  ;;  %v745_v47 = vsub.f32 %v4917_v38, %v504_v14 }
  0x4d   : > { %1362 = vmatmul.f32.gmra.mxu1 %v4759_v36  ;;  %v713_v21 = vmul.f32 %v505_v17, %v505_v17  ;;  %v746_v56 = vsub.f32 %v4920_v39, %v505_v17  ;;  %v747_v60 = vsub.f32 %v4932_v44, %v505_v17 }
  0x4e   : > { %v728_v22 = vsub.f32 %v696_v18, %v712_v19  ;;  %v697_v23 = vmul.f32 0.083333336, %v569_v20 }
  0x50   : > { %v776_v24 = vadd.f32 1e-05, %v728_v22  ;;  %v729_v25 = vsub.f32 %v697_v23, %v713_v21 }
  0x52   : > { %4466 = vrsqrt.f32 %v776_v24  ;;  %v777_v26 = vadd.f32 1e-05, %v729_v25  ;;  %vm798_vm2 = vweird.f32 %v776_v24 }
  0x54   : > { %4468 = vrsqrt.f32 %v777_v26  ;;  %vm808_vm5 = vweird.f32 %v777_v26 }
  0x55   : > { %1365 = vmatmul.f32.gmra.mxu1 %v4759_v36  ;;  %v744_v36 = vsub.f32 %v4914_v37, %v504_v14 }
  0x58   : > { %v4467_v27 = vpop.eup %4466 }
  0x59   : > { %v793_v28 = vmul.f32 %v4467_v27, %v776_v24  ;;  %vm799_vm3 = vweird.f32 %v4467_v27 }
  0x5a   : > { %v4469_v29 = vpop.eup %4468  ;;  %vm800_vm4 = vmor %vm798_vm2, %vm799_vm3 }
  0x5b   : > { %v794_v30 = vmul.f32 %v4467_v27, %v793_v28  ;;  %v803_v31 = vmul.f32 %v4469_v29, %v777_v26  ;;  %vm809_vm6 = vweird.f32 %v4469_v29 }
  0x5c   : > { %vm810_vm7 = vmor %vm808_vm5, %vm809_vm6 }
  0x5d   : > { %v795_v34 = vmul.f32 0.5, %v794_v30  ;;  %v804_v35 = vmul.f32 %v4469_v29, %v803_v31 }
  0x5f   : > { %v796_v41 = vsub.f32 1.5, %v795_v34  ;;  %v805_v42 = vmul.f32 0.5, %v804_v35 }
  0x61   : > { %v797_v45 = vmul.f32 %v4467_v27, %v796_v41  ;;  %v806_v49 = vsub.f32 1.5, %v805_v42 }
  0x63   : > { %v801_v48 = vsel %vm800_vm4, %v4467_v27, %v797_v45  ;;  %v807_v53 = vmul.f32 %v4469_v29, %v806_v49 }
  0x64   : > { %v952_v50 = vmul.f32 %v801_v48, %v744_v36  ;;  %v953_v52 = vmul.f32 %v801_v48, %v745_v47 }
  0x65   : > { %v811_v57 = vsel %vm810_vm7, %v4469_v29, %v807_v53 }
  0x66   : > { %v1000_v37 = vmul.f32 %v984_v46, %v952_v50  ;;  %v1001_v55 = vmul.f32 %v984_v46, %v953_v52  ;;  %v954_v38 = vmul.f32 %v811_v57, %v746_v56  ;;  %v955_v62 = vmul.f32 %v811_v57, %v747_v60 }
  0x68   : > { %v1048_v54 = vadd.f32 %v1032_v51, %v1000_v37  ;;  %v1049_v58 = vadd.f32 %v1032_v51, %v1001_v55  ;;  %v1002_v59 = vmul.f32 %v984_v46, %v954_v38  ;;  %v1003_v63 = vmul.f32 %v984_v46, %v955_v62 }
  0x6a   : > { %4277 = vmatmul.msk.f32.vlgmr.msra.gmra.mxu0 %vm6402_vm1, %v1048_v54  ;;  %v1050_v61 = vadd.f32 %v1032_v51, %v1002_v59  ;;  %v1051_v0 = vadd.f32 %v1032_v51, %v1003_v63 }
  0x72   : > { %4278 = vmatmul.msk.f32.gmra.mxu0 %vm6402_vm1, %v1049_v58 }
  0x7a   : > { %4279 = vmatmul.msk.f32.gmra.mxu0 %vm6402_vm1, %v1050_v61 }
  0x82   : > { %4280 = vmatmul.msk.f32.gmra.mxu0 %vm6402_vm1, %v1051_v0 }
  0xac   : > { %v4977_v1 = vpop.permute.xlu0 %1451 }
  0xba   : > { %v1357_v2 = vpop.f32.mrf.mxu1 }
  0xbb   : > { %v1454_v39 = vadd.f32 %v4977_v1, %v1357_v2 }
  0xbd   : > { %1462 = vrot.lane.b32.xlu0 %v1454_v39, %s4760_s17 }
  0xc2   : > { %v1360_v3 = vpop.f32.mrf.mxu1 }
  0xc3   : > { %v1455_v4 = vadd.f32 %v4977_v1, %v1360_v3 }
  0xc5   : > { %1464 = vrot.lane.b32.xlu1 %v1455_v4, %s4760_s17 }
  0xca   : > { %v1363_v44 = vpop.f32.mrf.mxu1 }
  0xcb   : > { %v1456_v5 = vadd.f32 %v4977_v1, %v1363_v44 }
  0xcd   : > { %1466 = vrot.lane.b32.xlu1 %v1456_v5, %s4760_s17 }
  0xd2   : > { %v1366_v6 = vpop.f32.mrf.mxu1 }
  0xd3   : > { %v1457_v7 = vadd.f32 %v4977_v1, %v1366_v6 }
  0xd5   : > { %1468 = vrot.lane.b32.xlu2 %v1457_v7, %s4760_s17 }
  0xe7   : > { %v1200_v9 = vpop.f32.mrf.mxu0 }
  0xe8   : > { %v1201_v10 = vadd.f32 %v4990_v8, %v1200_v9 }
  0xea   : > { %1297 = vst.msk [vmem:[#allocation2] sm:$0xff] %vm6403_vm8, %v1201_v10 }
  0xef   : > { %v1203_v11 = vpop.f32.mrf.mxu0 }
  0xf0   : > { %v1204_v12 = vadd.f32 %v4990_v8, %v1203_v11 }
  0xf1   : > { %v4997_v15 = vld [vmem:[#allocation2] sm:$0xff] }
  0xf2   : > { %1298 = vst.msk [vmem:[#allocation2 + $0x8] sm:$0xff] %vm6403_vm8, %v1204_v12  ;;  %v1369_v16 = vadd.f32 %v1357_v2, %v4997_v15 }
  0xf4   : > { %v4309_v18 = vmul.f32 -1.442695, %v1369_v16 }
  0xf6   : > { %4470 = vpow2.f32 %v4309_v18 }
  0xf7   : > { %v1206_v13 = vpop.f32.mrf.mxu0 }
  0xf8   : > { %v1207_v14 = vadd.f32 %v4990_v8, %v1206_v13 }
  0xf9   : > { %v5001_v19 = vld [vmem:[#allocation2 + $0x8] sm:$0xff] }
  0xfa   : > { %1299 = vst.msk [vmem:[#allocation2 + $0x10] sm:$0xff] %vm6403_vm8, %v1207_v14  ;;  %v1370_v21 = vadd.f32 %v1360_v3, %v5001_v19 }
  0xfc   : > { %v4310_v22 = vmul.f32 -1.442695, %v1370_v21  ;;  %v4471_v24 = vpop.eup %4470 }
  0xfd   : > { %v1385_v28 = vadd.f32 1.0, %v4471_v24 }
  0xfe   : > { %4472 = vpow2.f32 %v4310_v22 }
  0xff   : > { %v1209_v17 = vpop.f32.mrf.mxu0  ;;  %v1400_v56 = vand.u32 2147483648, %v1385_v28  ;;  %vm1394_vm10 = vweird.f32 %v1385_v28  ;;  %v1398_v57 = vand.u32 2147483647, %v1385_v28 }
 0x100   : > { %v1210_v20 = vadd.f32 %v4990_v8, %v1209_v17 }
 0x101   : > { %v5006_v23 = vld [vmem:[#allocation2 + $0x10] sm:$0xff]  ;;  %v1401_v61 = vor.u32 1.1754944e-38, %v1400_v56  ;;  %vm1399_vm12 = vcmp.eq.f32.partialorder %v1398_v57, 8.507059e+37 }
 0x102   : > { %1300 = vst.msk [vmem:[#allocation2 + $0x18] sm:$0xff] %vm6403_vm8, %v1210_v20  ;;  %v1371_v27 = vadd.f32 %v1363_v44, %v5006_v23 }
 0x104   : > { %v4311_v30 = vmul.f32 -1.442695, %v1371_v27  ;;  %v4473_v31 = vpop.eup %4472 }
 0x105   : > { %v1386_v34 = vadd.f32 1.0, %v4473_v31 }
 0x107   : > { %v1415_v5 = vand.u32 2147483648, %v1386_v34  ;;  %vm1409_vm2 = vweird.f32 %v1386_v34 }
 0x109   : > { %v5008_v25 = vld [vmem:[#allocation2 + $0x18] sm:$0xff]  ;;  %v1416_v13 = vor.u32 1.1754944e-38, %v1415_v5 }
 0x10a   : > { %v1372_v26 = vadd.f32 %v1366_v6, %v5008_v25  ;;  %v1413_v6 = vand.u32 2147483647, %v1386_v34 }
 0x10c   : > { %v4312_v29 = vmul.f32 -1.442695, %v1372_v26  ;;  %vm1414_vm5 = vcmp.eq.f32.partialorder %v1413_v6, 8.507059e+37 }
 0x10e   : > { %4474 = vpow2.f32 %v4312_v29 }
 0x10f   : > { %4476 = vrcp.f32 %v1385_v28 }
 0x110   : > { %4478 = vpow2.f32 %v4311_v30 }
 0x111   : > { %4480 = vrcp.f32 %v1386_v34 }
 0x114   : > { %v4475_v35 = vpop.eup %4474 }
 0x115   : > { %v1388_v41 = vadd.f32 1.0, %v4475_v35  ;;  %v4477_v36 = vpop.eup %4476 }
 0x116   : > { %v4479_v42 = vpop.eup %4478  ;;  %v1390_v45 = vmul.f32 %v4477_v36, %v1385_v28  ;;  %vm1395_vm9 = vweird.f32 %v4477_v36 }
 0x117   : > { %4482 = vrcp.f32 %v1388_v41  ;;  %v5012_v46 = vadd.f32 1.0, %v4479_v42  ;;  %v4481_v47 = vpop.eup %4480  ;;  %vm1396_vm11 = vmor %vm1394_vm10, %vm1395_vm9  ;;  %vm1439_vm13 = vweird.f32 %v1388_v41  ;;  %v1445_v0 = vand.u32 2147483648, %v1388_v41 }
 0x118   : > { %v1391_v48 = vsub.f32 1.0, %v1390_v45  ;;  %v1405_v50 = vmul.f32 %v4481_v47, %v1386_v34  ;;  %vm1410_vm15 = vweird.f32 %v4481_v47  ;;  %v1443_v4 = vand.u32 2147483647, %v1388_v41 }
 0x119   : > { %4484 = vrcp.f32 %v5012_v46  ;;  %v1446_v7 = vor.u32 1.1754944e-38, %v1445_v0  ;;  %vm1411_vm3 = vmor %vm1409_vm2, %vm1410_vm15  ;;  %v1430_v22 = vand.u32 2147483648, %v5012_v46  ;;  %vm1424_vm7 = vweird.f32 %v5012_v46 }
 0x11a   : > { %v1392_v51 = vmul.f32 %v4477_v36, %v1391_v48  ;;  %v1406_v52 = vsub.f32 1.0, %v1405_v50  ;;  %vm1444_vm4 = vcmp.eq.f32.partialorder %v1443_v4, 8.507059e+37  ;;  %v1428_v24 = vand.u32 2147483647, %v5012_v46 }
 0x11b   : > { %v1431_v27 = vor.u32 1.1754944e-38, %v1430_v22 }
 0x11c   : > { %v1393_v53 = vadd.f32 %v4477_v36, %v1392_v51  ;;  %v1407_v58 = vmul.f32 %v4481_v47, %v1406_v52  ;;  %vm1429_vm10 = vcmp.eq.f32.partialorder %v1428_v24, 8.507059e+37  ;;  %v5043_v52 = vld [vmem:[%s4911_s7 + $0xb0] sm:$0xff] }
 0x11d   : > { %v4483_v49 = vpop.eup %4482 }
 0x11e   : > { %v1435_v37 = vmul.f32 %v4483_v49, %v1388_v41  ;;  %v1397_v38 = vsel %vm1396_vm11, %v4477_v36, %v1393_v53  ;;  %vm1440_vm14 = vweird.f32 %v4483_v49  ;;  %v1408_v2 = vadd.f32 %v4481_v47, %v1407_v58 }
 0x11f   : > { %v4485_v55 = vpop.eup %4484  ;;  %v5016_v63 = vsel %vm1399_vm12, %v1401_v61, %v1397_v38  ;;  %vm1441_vm0 = vmor %vm1439_vm13, %vm1440_vm14 }
 0x120   : > { %v1436_v54 = vsub.f32 1.0, %v1435_v37  ;;  %v1420_v60 = vmul.f32 %v4485_v55, %v5012_v46  ;;  %v1412_v10 = vsel %vm1411_vm3, %v4481_v47, %v1408_v2  ;;  %vm1425_vm6 = vweird.f32 %v4485_v55 }
 0x121   : > { %v5022_v17 = vsel %vm1414_vm5, %v1416_v13, %v1412_v10  ;;  %vm1426_vm9 = vmor %vm1424_vm7, %vm1425_vm6  ;;  %v1526_v51 = vmul.f32 0.0, %v5016_v63 }
 0x122   : > { %v1437_v59 = vmul.f32 %v4483_v49, %v1436_v54  ;;  %v1421_v44 = vsub.f32 1.0, %v1420_v60 }
 0x124   : > { %v1438_v3 = vadd.f32 %v4483_v49, %v1437_v59  ;;  %v1422_v11 = vmul.f32 %v4485_v55, %v1421_v44 }
 0x126   : > { %v1442_v9 = vsel %vm1441_vm0, %v4483_v49, %v1438_v3  ;;  %v1423_v21 = vadd.f32 %v4485_v55, %v1422_v11  ;;  %v1502_v49 = vsub.f32 1.0, %v5016_v63 }
 0x127   : > { %v5020_v14 = vsel %vm1444_vm4, %v1446_v7, %v1442_v9 }
 0x128   : > { %v1427_v26 = vsel %vm1426_vm9, %v4485_v55, %v1423_v21  ;;  %v542_v55 = vmul.f32 %v5043_v52, %v5043_v52  ;;  %v1505_v60 = vsub.f32 1.0, %v5020_v14  ;;  %v1529_v0 = vmul.f32 0.0, %v5020_v14  ;;  %v5074_v21 = vld [vmem:[%s4911_s7 + $0xc8] sm:$0xff] }
 0x129   : > { %v1432_v29 = vsel %vm1429_vm10, %v1431_v27, %v1427_v26  ;;  %v469_v27 = vsel %vm6402_vm1, %v5074_v21, 0.0 }
 0x12a   : > { %v651_v58 = vsel %vm6402_vm1, %v542_v55, 0.0  ;;  %v1504_v9 = vsub.f32 1.0, %v1432_v29  ;;  %v1528_v13 = vmul.f32 0.0, %v1432_v29 }
 0x12f   : > { %v1463_v62 = vpop.permute.xlu0 %1462  ;;  %v1469_v12 = vpop.permute.xlu2 %1468 }
 0x130   : > { %v1474_v39 = vmul.f32 %v1463_v62, %v5016_v63  ;;  %v1477_v18 = vmul.f32 %v1469_v12, %v5020_v14 }
 0x132   : > { %1482 = vrot.lane.b32.xlu2 %v1474_v39, %s4758_s6 }
 0x137   : > { %v1465_v16 = vpop.permute.xlu1 %1464 }
 0x138   : > { %v1475_v20 = vmul.f32 %v1465_v16, %v5022_v17 }
 0x13a   : > { %1484 = vrot.lane.b32.xlu0 %v1475_v20, %s4758_s6  ;;  %1488 = vrot.lane.b32.xlu2 %v1477_v18, %s4758_s6  ;;  %v5071_v20 = vld [vmem:[%s4911_s7 + $0xc0] sm:$0xff] }
 0x13b   : > { %v468_v26 = vsel %vm6402_vm1, %v5071_v20, 0.0 }
 0x13f   : > { %v1467_v28 = vpop.permute.xlu1 %1466 }
 0x140   : > { %v1476_v30 = vmul.f32 %v1467_v28, %v1432_v29  ;;  %v470_v29 = vadd.f32 %v469_v27, %v468_v26 }
 0x142   : > { %1486 = vrot.lane.b32.xlu1 %v1476_v30, %s4758_s6 }
 0x18c   : > { %v1483_v31 = vpop.permute.xlu2 %1482 }
 0x18d   : > { %v1494_v34 = vadd.f32 %v1483_v31, %v4997_v15  ;;  %v544_v31 = vmul.f32 %v5071_v20, %v5071_v20 }
 0x18f   : > { %4486 = vtanh.f32 %v1494_v34  ;;  %v545_v34 = vmul.f32 %v5074_v21, %v5074_v21 }
 0x194   : > { %v1489_v35 = vpop.permute.xlu2 %1488 }
 0x195   : > { %v4487_v41 = vpop.eup %4486  ;;  %v1497_v36 = vadd.f32 %v1489_v35, %v5008_v25  ;;  %v471_v35 = vrot.slane %v470_v29, 4 }
 0x196   : > { %1510 = vrot.lane.b32.xlu0 %v4487_v41, %s4761_s20 }
 0x197   : > { %4488 = vtanh.f32 %v1497_v36  ;;  %v660_v36 = vsel %vm6402_vm1, %v544_v31, 0.0 }
 0x19d   : > { %v4489_v42 = vpop.eup %4488 }
 0x19e   : > { %1516 = vrot.lane.b32.xlu0 %v4489_v42, %s4761_s20  ;;  %v661_v42 = vsel %vm6402_vm1, %v545_v34, 0.0 }
 0x1ac   : > { %v1485_v45 = vpop.permute.xlu0 %1484 }
 0x1ad   : > { %v1495_v46 = vadd.f32 %v1485_v45, %v5001_v19  ;;  %v5046_v19 = vld [vmem:[%s4911_s7 + $0xb8] sm:$0xff]  ;;  %v472_v45 = vadd.f32 %v471_v35, %v470_v29 }
 0x1ae   : > { %v460_v54 = vsel %vm6402_vm1, %v5046_v19, 0.0  ;;  %v543_v57 = vmul.f32 %v5046_v19, %v5046_v19 }
 0x1af   : > { %4490 = vtanh.f32 %v1495_v46  ;;  %v662_v46 = vadd.f32 %v661_v42, %v660_v36 }
 0x1b0   : > { %v652_v59 = vsel %vm6402_vm1, %v543_v57, 0.0  ;;  %v1527_v57 = vmul.f32 0.0, %v5022_v17 }
 0x1b1   : > { %v653_v61 = vadd.f32 %v652_v59, %v651_v58 }
 0x1b3   : > { %v654_v39 = vrot.slane %v653_v61, 4 }
 0x1b4   : > { %v1487_v47 = vpop.permute.xlu1 %1486 }
 0x1b5   : > { %v4491_v15 = vpop.eup %4490  ;;  %v1496_v48 = vadd.f32 %v1487_v47, %v5006_v23  ;;  %v459_v23 = vsel %vm6402_vm1, %v5043_v52, 0.0  ;;  %v655_v44 = vadd.f32 %v654_v39, %v653_v61 }
 0x1b6   : > { %1512 = vrot.lane.b32.xlu1 %v4491_v15, %s4761_s20  ;;  %v461_v56 = vadd.f32 %v460_v54, %v459_v23  ;;  %v473_v15 = vrot.slane %v472_v45, 2 }
 0x1b7   : > { %4492 = vtanh.f32 %v1496_v48  ;;  %v656_v6 = vrot.slane %v655_v44, 2  ;;  %v663_v48 = vrot.slane %v662_v46, 4 }
 0x1b8   : > { %v462_v38 = vrot.slane %v461_v56, 4 }
 0x1b9   : > { %v657_v10 = vadd.f32 %v656_v6, %v655_v44 }
 0x1ba   : > { %v463_v63 = vadd.f32 %v462_v38, %v461_v56  ;;  %v347_v38 = vrot.slane %v4960_v40, 5 }
 0x1bb   : > { %v658_v16 = vrot.slane %v657_v10, 1 }
 0x1bc   : > { %v464_v3 = vrot.slane %v463_v63, 2 }
 0x1bd   : > { %v4493_v25 = vpop.eup %4492  ;;  %v659_v24 = vadd.f32 %v658_v16, %v657_v10  ;;  %v5125_v16 = vld [vmem:[%s4911_s7 + $0x28] sm:$0xff] }
 0x1be   : > { %1514 = vrot.lane.b32.xlu2 %v4493_v25, %s4761_s20  ;;  %v465_v5 = vadd.f32 %v464_v3, %v463_v63  ;;  %v474_v25 = vadd.f32 %v473_v15, %v472_v45  ;;  %v5101_v63 = vld [vmem:[%s4911_s7 + $0xd8] sm:$0xff]  ;;  %v356_v3 = vrot.slane %v4966_v43, 5  ;;  %v379_v27 = vsel %vm6402_vm1, %v5125_v16, 0.0 }
 0x1bf   : > { %v707_v30 = vmul.f32 0.083333336, %v659_v24  ;;  %v547_v10 = vmul.f32 %v5101_v63, %v5101_v63  ;;  %v525_v36 = vmul.f32 %v5125_v16, %v5125_v16  ;;  %v5138_v15 = vperm.slane %v347_v38, 0 }
 0x1c0   : > { %v466_v7 = vrot.slane %v465_v5, 1 }
 0x1c1   : > { %v670_v26 = vsel %vm6402_vm1, %v547_v10, 0.0 }
 0x1c2   : > { %v467_v12 = vadd.f32 %v466_v7, %v465_v5 }
 0x1c4   : > { %v5068_v18 = vmul.f32 0.083333336, %v467_v12 }
 0x1c6   : > { %v723_v28 = vmul.f32 %v5068_v18, %v5068_v18  ;;  %v766_v7 = vsub.f32 %v5043_v52, %v5068_v18  ;;  %v767_v34 = vsub.f32 %v5046_v19, %v5068_v18 }
 0x1c8   : > { %v739_v41 = vsub.f32 %v707_v30, %v723_v28 }
 0x1ca   : > { %v787_v47 = vadd.f32 1e-05, %v739_v41 }
 0x1cc   : > { %4494 = vrsqrt.f32 %v787_v47  ;;  %vm908_vm11 = vweird.f32 %v787_v47 }
 0x1d2   : > { %v4495_v56 = vpop.eup %4494 }
 0x1d3   : > { %v903_v59 = vmul.f32 %v4495_v56, %v787_v47  ;;  %vm909_vm12 = vweird.f32 %v4495_v56 }
 0x1d4   : > { %vm910_vm13 = vmor %vm908_vm11, %vm909_vm12  ;;  %vm1336_vm12 = vcmask 130048  }
 0x1d5   : > { %v904_v44 = vmul.f32 %v4495_v56, %v903_v59 }
 0x1d7   : > { %v905_v12 = vmul.f32 0.5, %v904_v44 }
 0x1d9   : > { %v906_v28 = vsub.f32 1.5, %v905_v12  ;;  %v357_v12 = vrot.slane %v4966_v43, 6 }
 0x1db   : > { %v907_v42 = vmul.f32 %v4495_v56, %v906_v28 }
 0x208   : > { %v1511_v50 = vpop.permute.xlu0 %1510 }
 0x209   : > { %v1522_v37 = vmul.f32 %v1511_v50, %v1502_v49  ;;  %v664_v49 = vadd.f32 %v663_v48, %v662_v46  ;;  %v475_v50 = vrot.slane %v474_v25, 1 }
 0x20b   : > { %v5048_v53 = vadd.f32 %v1526_v51, %v1522_v37  ;;  %v665_v51 = vrot.slane %v664_v49, 2  ;;  %v1503_v37 = vsub.f32 1.0, %v5022_v17  ;;  %v476_v54 = vadd.f32 %v475_v50, %v474_v25 }
 0x20c   : > { %v478_v17 = vsel %vm6402_vm1, %v5101_v63, 0.0  ;;  %v911_v50 = vsel %vm910_vm13, %v4495_v56, %v907_v42 }
 0x20d   : > { %1542 = vrot.lane.b32.xlu1 %v5048_v53, %s4761_s20  ;;  %v666_v55 = vadd.f32 %v665_v51, %v664_v49  ;;  %v571_v49 = vsel %vm6402_vm1, %v525_v36, 0.0  ;;  %v974_v18 = vmul.f32 %v911_v50, %v766_v7  ;;  %v5142_v51 = vperm.slane %v356_v3, 0 }
 0x20f   : > { %v667_v61 = vrot.slane %v666_v55, 1 }
 0x210   : > { %v1517_v62 = vpop.permute.xlu0 %1516 }
 0x211   : > { %v1525_v2 = vmul.f32 %v1517_v62, %v1505_v60  ;;  %v5095_v60 = vmul.f32 0.083333336, %v476_v54  ;;  %v5098_v62 = vld [vmem:[%s4911_s7 + $0xd0] sm:$0xff]  ;;  %v668_v5 = vadd.f32 %v667_v61, %v666_v55  ;;  %v975_v54 = vmul.f32 %v911_v50, %v767_v34  ;;  %v5160_v34 = vld [vmem:[%s4911_s7 + $0x38] sm:$0xff] }
 0x212   : > { %v546_v39 = vmul.f32 %v5098_v62, %v5098_v62  ;;  %v388_v36 = vsel %vm6402_vm1, %v5160_v34, 0.0  ;;  %v527_v50 = vmul.f32 %v5160_v34, %v5160_v34 }
 0x213   : > { %v5064_v4 = vadd.f32 %v1529_v0, %v1525_v2  ;;  %v477_v2 = vsel %vm6402_vm1, %v5098_v62, 0.0  ;;  %v724_v6 = vmul.f32 %v5095_v60, %v5095_v60 }
 0x215   : > { %1548 = vrot.lane.b32.xlu1 %v5064_v4, %s4761_s20 }
 0x218   : > { %v1515_v11 = vpop.permute.xlu2 %1514 }
 0x219   : > { %v1524_v14 = vmul.f32 %v1515_v11, %v1504_v9  ;;  %v479_v9 = vadd.f32 %v478_v17, %v477_v2  ;;  %v669_v11 = vsel %vm6402_vm1, %v546_v39, 0.0 }
 0x21a   : > { %v671_v30 = vadd.f32 %v670_v26, %v669_v11  ;;  %v348_v11 = vrot.slane %v4960_v40, 6 }
 0x21b   : > { %v5076_v22 = vadd.f32 %v1528_v13, %v1524_v14  ;;  %v708_v13 = vmul.f32 0.083333336, %v668_v5  ;;  %v5122_v14 = vld [vmem:[%s4911_s7 + $0x20] sm:$0xff]  ;;  %v480_v24 = vrot.slane %v479_v9, 4  ;;  %v1023_v5 = vmul.f32 %v5138_v15, %v975_v54 }
 0x21c   : > { %v378_v52 = vsel %vm6402_vm1, %v5122_v14, 0.0  ;;  %v524_v41 = vmul.f32 %v5122_v14, %v5122_v14  ;;  %v672_v46 = vrot.slane %v671_v30, 4 }
 0x21d   : > { %1546 = vrot.lane.b32.xlu0 %v5076_v22, %s4761_s20  ;;  %v740_v29 = vsub.f32 %v708_v13, %v724_v6  ;;  %v380_v31 = vadd.f32 %v379_v27, %v378_v52  ;;  %v481_v35 = vadd.f32 %v480_v24, %v479_v9  ;;  %v1071_v28 = vadd.f32 %v5142_v51, %v1023_v5 }
 0x21e   : > { %v570_v25 = vsel %vm6402_vm1, %v524_v41, 0.0  ;;  %v673_v19 = vadd.f32 %v672_v46, %v671_v30 }
 0x21f   : > { %v788_v45 = vadd.f32 1e-05, %v740_v29  ;;  %v381_v47 = vrot.slane %v380_v31, 4  ;;  %v482_v48 = vrot.slane %v481_v35, 2 }
 0x220   : > { %v674_v55 = vrot.slane %v673_v19, 2 }
 0x221   : > { %4496 = vrsqrt.f32 %v788_v45  ;;  %vm918_vm14 = vweird.f32 %v788_v45 }
 0x222   : > { %v675_v61 = vadd.f32 %v674_v55, %v673_v19  ;;  %v5181_v55 = vperm.slane %v348_v11, 0 }
 0x224   : > { %v676_v3 = vrot.slane %v675_v61, 1 }
 0x226   : > { %v677_v13 = vadd.f32 %v676_v3, %v675_v61 }
 0x227   : > { %v4497_v44 = vpop.eup %4496 }
 0x228   : > { %v1513_v23 = vpop.permute.xlu1 %1512  ;;  %v913_v7 = vmul.f32 %v4497_v44, %v788_v45  ;;  %vm919_vm15 = vweird.f32 %v4497_v44  ;;  %v709_v29 = vmul.f32 0.083333336, %v677_v13 }
 0x229   : > { %v1523_v58 = vmul.f32 %v1513_v23, %v1503_v37  ;;  %v483_v37 = vadd.f32 %v482_v48, %v481_v35  ;;  %v382_v23 = vadd.f32 %v381_v47, %v380_v31  ;;  %v5157_v31 = vld [vmem:[%s4911_s7 + $0x30] sm:$0xff]  ;;  %vm920_vm0 = vmor %vm918_vm14, %vm919_vm15 }
 0x22a   : > { %v914_v26 = vmul.f32 %v4497_v44, %v913_v7  ;;  %v526_v48 = vmul.f32 %v5157_v31, %v5157_v31 }
 0x22b   : > { %v5103_v0 = vadd.f32 %v1527_v57, %v1523_v58  ;;  %v572_v57 = vadd.f32 %v571_v49, %v570_v25  ;;  %v1022_v58 = vmul.f32 %v5138_v15, %v974_v18  ;;  %v484_v38 = vrot.slane %v483_v37, 1 }
 0x22c   : > { %v383_v59 = vrot.slane %v382_v23, 2  ;;  %v915_v35 = vmul.f32 0.5, %v914_v26  ;;  %v768_v25 = vsub.f32 %v5071_v20, %v5095_v60  ;;  %v580_v20 = vsel %vm6402_vm1, %v527_v50, 0.0 }
 0x22d   : > { %1544 = vrot.lane.b32.xlu2 %v5103_v0, %s4761_s20  ;;  %v573_v2 = vrot.slane %v572_v57, 4  ;;  %v1070_v17 = vadd.f32 %v5142_v51, %v1022_v58  ;;  %v485_v39 = vadd.f32 %v484_v38, %v483_v37 }
 0x22e   : > { %v384_v56 = vadd.f32 %v383_v59, %v382_v23  ;;  %v916_v49 = vsub.f32 1.5, %v915_v35  ;;  %v579_v23 = vsel %vm6402_vm1, %v526_v48, 0.0 }
 0x22f   : > { %v574_v6 = vadd.f32 %v573_v2, %v572_v57  ;;  %4299 = vmatmul.msk.f32.vlgmr.msra.gmra.mxu2 %vm6402_vm1, %v1070_v17  ;;  %v5148_v9 = vmul.f32 0.083333336, %v485_v39  ;;  %v769_v57 = vsub.f32 %v5074_v21, %v5095_v60  ;;  %v581_v59 = vadd.f32 %v580_v20, %v579_v23 }
 0x230   : > { %v385_v10 = vrot.slane %v384_v56, 1  ;;  %2211 = vmatpush.msra.mxu2 %v4891_v32  ;;  %v387_v32 = vsel %vm6402_vm1, %v5157_v31, 0.0  ;;  %v917_v54 = vmul.f32 %v4497_v44, %v916_v49  ;;  %v5186_v2 = vperm.slane %v357_v12, 0 }
 0x231   : > { %v575_v24 = vrot.slane %v574_v6, 2  ;;  %v725_v52 = vmul.f32 %v5148_v9, %v5148_v9  ;;  %v389_v47 = vadd.f32 %v388_v36, %v387_v32  ;;  %v352_v20 = vrot.slane %v4966_v43, 1 }
 0x232   : > { %v386_v27 = vadd.f32 %v385_v10, %v384_v56  ;;  %2212 = vmatpush.msra.mxu2 %v4896_v33  ;;  %v921_v45 = vsel %vm920_vm0, %v4497_v44, %v917_v54  ;;  %v582_v56 = vrot.slane %v581_v59, 4 }
 0x233   : > { %v576_v30 = vadd.f32 %v575_v24, %v574_v6  ;;  %v741_v42 = vsub.f32 %v709_v29, %v725_v52  ;;  %v390_v37 = vrot.slane %v389_v47, 4  ;;  %v976_v61 = vmul.f32 %v921_v45, %v768_v25 }
 0x234   : > { %v5163_v41 = vmul.f32 0.083333336, %v386_v27  ;;  %v977_v3 = vmul.f32 %v921_v45, %v769_v57  ;;  %v583_v10 = vadd.f32 %v582_v56, %v581_v59 }
 0x235   : > { %v577_v46 = vrot.slane %v576_v30, 1  ;;  %v789_v19 = vadd.f32 1e-05, %v741_v42  ;;  %v391_v38 = vadd.f32 %v390_v37, %v389_v47  ;;  %v1024_v5 = vmul.f32 %v5181_v55, %v976_v61 }
 0x236   : > { %v714_v33 = vmul.f32 %v5163_v41, %v5163_v41  ;;  %v584_v44 = vrot.slane %v583_v10, 2  ;;  %v1025_v12 = vmul.f32 %v5181_v55, %v977_v3  ;;  %v343_v37 = vrot.slane %v4960_v40, 1 }
 0x237   : > { %v578_v18 = vadd.f32 %v577_v46, %v576_v30  ;;  %4300 = vmatmul.msk.f32.gmra.mxu2 %vm6402_vm1, %v1071_v28  ;;  %4498 = vrsqrt.f32 %v789_v19  ;;  %v392_v39 = vrot.slane %v391_v38, 2  ;;  %v1072_v21 = vadd.f32 %v5186_v2, %v1024_v5 }
 0x238   : > { %v585_v52 = vadd.f32 %v584_v44, %v583_v10  ;;  %vm928_vm2 = vweird.f32 %v789_v19  ;;  %v1073_v35 = vadd.f32 %v5186_v2, %v1025_v12  ;;  %v770_v46 = vsub.f32 %v5098_v62, %v5148_v9 }
 0x239   : > { %v698_v58 = vmul.f32 0.083333336, %v578_v18  ;;  %v393_v7 = vadd.f32 %v392_v39, %v391_v38  ;;  %v748_v57 = vsub.f32 %v5122_v14, %v5163_v41  ;;  %v985_v45 = vperm.slane %v343_v37, 0 }
 0x23a   : > { %v586_v29 = vrot.slane %v585_v52, 1  ;;  %v1033_v40 = vperm.slane %v352_v20, 0  ;;  %v749_v39 = vsub.f32 %v5125_v16, %v5163_v41 }
 0x23b   : > { %v730_v17 = vsub.f32 %v698_v58, %v714_v33  ;;  %v394_v13 = vrot.slane %v393_v7, 1 }
 0x23c   : > { %v587_v42 = vadd.f32 %v586_v29, %v585_v52 }
 0x23d   : > { %v778_v6 = vadd.f32 1e-05, %v730_v17  ;;  %v4499_v11 = vpop.eup %4498  ;;  %v395_v26 = vadd.f32 %v394_v13, %v393_v7 }
 0x23e   : > { %v923_v60 = vmul.f32 %v4499_v11, %v789_v19  ;;  %vm929_vm3 = vweird.f32 %v4499_v11  ;;  %v699_v49 = vmul.f32 0.083333336, %v587_v42 }
 0x23f   : > { %4500 = vrsqrt.f32 %v778_v6  ;;  %4301 = vmatmul.msk.f32.gmra.mxu2 %vm6402_vm1, %v1072_v21  ;;  %v507_v28 = vmul.f32 0.083333336, %v395_v26  ;;  %vm930_vm4 = vmor %vm928_vm2, %vm929_vm3  ;;  %vm818_vm5 = vweird.f32 %v778_v6 }
 0x240   : > { %v924_v24 = vmul.f32 %v4499_v11, %v923_v60 }
 0x241   : > { %v715_v47 = vmul.f32 %v507_v28, %v507_v28  ;;  %v750_v21 = vsub.f32 %v5157_v31, %v507_v28  ;;  %v751_v44 = vsub.f32 %v5160_v34, %v507_v28  ;;  %v5218_v31 = vld [vmem:[%s6400_s1 + $0x28] sm:$0xff]  ;;  %v5224_v34 = vld [vmem:[%s6400_s1 + $0x20] sm:$0xff] }
 0x242   : > { %v925_v27 = vmul.f32 0.5, %v924_v24 }
 0x243   : > { %v731_v19 = vsub.f32 %v699_v49, %v715_v47 }
 0x244   : > { %v926_v32 = vsub.f32 1.5, %v925_v27 }
 0x245   : > { %v4501_v30 = vpop.eup %4500  ;;  %v779_v54 = vadd.f32 1e-05, %v731_v19 }
 0x246   : > { %v813_v36 = vmul.f32 %v4501_v30, %v778_v6  ;;  %v927_v48 = vmul.f32 %v4499_v11, %v926_v32  ;;  %vm819_vm6 = vweird.f32 %v4501_v30 }
 0x247   : > { %4302 = vmatmul.msk.f32.gmra.mxu2 %vm6402_vm1, %v1073_v35  ;;  %vm820_vm7 = vmor %vm818_vm5, %vm819_vm6  ;;  %4502 = vrsqrt.f32 %v779_v54  ;;  %vm828_vm9 = vweird.f32 %v779_v54 }
 0x248   : > { %v814_v25 = vmul.f32 %v4501_v30, %v813_v36  ;;  %v5196_v33 = vsel %vm930_vm4, %v4499_v11, %v927_v48 }
 0x249   : > { %v978_v18 = vmul.f32 %v5196_v33, %v770_v46 }
 0x24a   : > { %v815_v50 = vmul.f32 0.5, %v814_v25 }
 0x24b   : > { %v1026_v62 = vmul.f32 %v5181_v55, %v978_v18 }
 0x24c   : > { %v816_v23 = vsub.f32 1.5, %v815_v50 }
 0x24d   : > { %v1074_v38 = vadd.f32 %v5186_v2, %v1026_v62  ;;  %v4503_v56 = vpop.eup %4502 }
 0x24e   : > { %v817_v58 = vmul.f32 %v4501_v30, %v816_v23  ;;  %v823_v3 = vmul.f32 %v4503_v56, %v779_v54  ;;  %vm829_vm10 = vweird.f32 %v4503_v56 }
 0x24f   : > { %4303 = vmatmul.msk.f32.gmra.mxu2 %vm6402_vm1, %v1074_v38  ;;  %vm830_vm11 = vmor %vm828_vm9, %vm829_vm10 }
 0x250   : > { %v821_v59 = vsel %vm820_vm7, %v4501_v30, %v817_v58  ;;  %v824_v6 = vmul.f32 %v4503_v56, %v823_v3 }
 0x251   : > { %v956_v61 = vmul.f32 %v821_v59, %v748_v57  ;;  %v957_v5 = vmul.f32 %v821_v59, %v749_v39 }
 0x252   : > { %v825_v7 = vmul.f32 0.5, %v824_v6 }
 0x253   : > { %v1004_v17 = vmul.f32 %v985_v45, %v956_v61  ;;  %v1005_v14 = vmul.f32 %v985_v45, %v957_v5 }
 0x254   : > { %v826_v11 = vsub.f32 1.5, %v825_v7 }
 0x255   : > { %v1052_v43 = vadd.f32 %v1033_v40, %v1004_v17  ;;  %v1053_v10 = vadd.f32 %v1033_v40, %v1005_v14 }
 0x256   : > { %v827_v60 = vmul.f32 %v4503_v56, %v826_v11 }
 0x257   : > { %4281 = vmatmul.msk.f32.gmra.mxu0 %vm6402_vm1, %v1052_v43 }
 0x258   : > { %v831_v16 = vsel %vm830_vm11, %v4503_v56, %v827_v60 }
 0x259   : > { %v958_v41 = vmul.f32 %v831_v16, %v750_v21  ;;  %v959_v24 = vmul.f32 %v831_v16, %v751_v44 }
 0x25b   : > { %v1006_v13 = vmul.f32 %v985_v45, %v958_v41  ;;  %v1007_v26 = vmul.f32 %v985_v45, %v959_v24 }
 0x25d   : > { %v1054_v12 = vadd.f32 %v1033_v40, %v1006_v13  ;;  %v1055_v52 = vadd.f32 %v1033_v40, %v1007_v26 }
 0x25f   : > { %4282 = vmatmul.msk.f32.gmra.mxu0 %vm6402_vm1, %v1053_v10 }
 0x267   : > { %4283 = vmatmul.msk.f32.gmra.mxu0 %vm6402_vm1, %v1054_v12 }
 0x26f   : > { %4284 = vmatmul.msk.f32.gmra.mxu0 %vm6402_vm1, %v1055_v52 }
 0x27f   : > { %v1543_v27 = vpop.permute.xlu1 %1542 }
 0x280   : > { %4313 = vmatmul.msk.f32.vlgmr.msrb.gmra.mxu2 %vm1336_vm12, %v1543_v27 }
 0x281   : > { %2850 = vmatpush.msrb.mxu2 %v5218_v31 }
 0x283   : > { %2851 = vmatpush.msrb.mxu2 %v5224_v34 }
 0x287   : > { %v1545_v28 = vpop.permute.xlu2 %1544  ;;  %v1549_v30 = vpop.permute.xlu1 %1548 }
 0x288   : > { %4314 = vmatmul.msk.f32.gmra.mxu2 %vm1336_vm12, %v1545_v28 }
 0x28f   : > { %v1547_v29 = vpop.permute.xlu0 %1546 }
 0x290   : > { %4315 = vmatmul.msk.f32.gmra.mxu2 %vm1336_vm12, %v1547_v29 }
 0x298   : > { %4316 = vmatmul.msk.f32.gmra.mxu2 %vm1336_vm12, %v1549_v30 }
 0x2b2   : > { %v1266_v35 = vpop.f32.mrf.mxu2 }
 0x2b3   : > { %v1267_v32 = vadd.f32 %v4990_v8, %v1266_v35 }
 0x2b5   : > { %1319 = vst.msk [vmem:[#allocation2 + $0xb0] sm:$0xff] %vm6403_vm8, %v1267_v32 }
 0x2ba   : > { %v1269_v36 = vpop.f32.mrf.mxu2 }
 0x2bb   : > { %v1270_v42 = vadd.f32 %v4990_v8, %v1269_v36 }
 0x2bd   : > { %1320 = vst.msk [vmem:[#allocation2 + $0xb8] sm:$0xff] %vm6403_vm8, %v1270_v42 }
 0x2c2   : > { %v1272_v46 = vpop.f32.mrf.mxu2 }
 0x2c3   : > { %v1273_v47 = vadd.f32 %v4990_v8, %v1272_v46 }
 0x2c5   : > { %1321 = vst.msk [vmem:[#allocation2 + $0xc0] sm:$0xff] %vm6403_vm8, %v1273_v47 }
 0x2ca   : > { %v1275_v48 = vpop.f32.mrf.mxu2 }
 0x2cb   : > { %v1276_v25 = vadd.f32 %v4990_v8, %v1275_v48 }
 0x2cd   : > { %1322 = vst.msk [vmem:[#allocation2 + $0xc8] sm:$0xff] %vm6403_vm8, %v1276_v25 }
 0x2d2   : > { %v1278_v50 = vpop.f32.mrf.mxu2 }
 0x2d3   : > { %v1279_v18 = vadd.f32 %v4990_v8, %v1278_v50 }
 0x2d4   : > { %v1212_v49 = vpop.f32.mrf.mxu0 }
 0x2d5   : > { %v1213_v19 = vadd.f32 %v4990_v8, %v1212_v49  ;;  %1323 = vst.msk [vmem:[#allocation2 + $0xd0] sm:$0xff] %vm6403_vm8, %v1279_v18 }
 0x2d7   : > { %1301 = vst.msk [vmem:[#allocation2 + $0x20] sm:$0xff] %vm6403_vm8, %v1213_v19 }
 0x2dc   : > { %v1215_v37 = vpop.f32.mrf.mxu0 }
 0x2dd   : > { %v1216_v23 = vadd.f32 %v4990_v8, %v1215_v37 }
 0x2de   : > { %v5256_v39 = vld [vmem:[#allocation2 + $0x20] sm:$0xff] }
 0x2df   : > { %1302 = vst.msk [vmem:[#allocation2 + $0x28] sm:$0xff] %vm6403_vm8, %v1216_v23 }
 0x2e4   : > { %v1218_v54 = vpop.f32.mrf.mxu0 }
 0x2e5   : > { %v1219_v62 = vadd.f32 %v4990_v8, %v1218_v54 }
 0x2e6   : > { %v5262_v11 = vld [vmem:[#allocation2 + $0x28] sm:$0xff] }
 0x2e7   : > { %1303 = vst.msk [vmem:[#allocation2 + $0x30] sm:$0xff] %vm6403_vm8, %v1219_v62 }
 0x2ec   : > { %v1221_v20 = vpop.f32.mrf.mxu0 }
 0x2ed   : > { %v1222_v57 = vadd.f32 %v4990_v8, %v1221_v20 }
 0x2ee   : > { %v5265_v13 = vld [vmem:[#allocation2 + $0x30] sm:$0xff] }
 0x2ef   : > { %1304 = vst.msk [vmem:[#allocation2 + $0x38] sm:$0xff] %vm6403_vm8, %v1222_v57 }
 0x2f6   : > { %v5259_v14 = vld [vmem:[#allocation2 + $0x38] sm:$0xff] }
 0x303   : > { %v1575_v58 = vpop.f32.mrf.mxu2 }
 0x304   : > { %v1667_v38 = vadd.f32 %v1575_v58, %v4977_v1  ;;  %v1587_v56 = vadd.f32 %v1575_v58, %v5256_v39 }
 0x306   : > { %1675 = vrot.lane.b32.xlu2 %v1667_v38, %s4760_s17  ;;  %v4317_v43 = vmul.f32 -1.442695, %v1587_v56 }
 0x308   : > { %4504 = vpow2.f32 %v4317_v43 }
 0x30b   : > { %v1578_v45 = vpop.f32.mrf.mxu2 }
 0x30c   : > { %v1668_v59 = vadd.f32 %v1578_v45, %v4977_v1  ;;  %v1588_v60 = vadd.f32 %v1578_v45, %v5262_v11 }
 0x30e   : > { %1677 = vrot.lane.b32.xlu0 %v1668_v59, %s4760_s17  ;;  %v4505_v5 = vpop.eup %4504  ;;  %v4318_v41 = vmul.f32 -1.442695, %v1588_v60 }
 0x30f   : > { %v1603_v3 = vadd.f32 1.0, %v4505_v5 }
 0x311   : > { %4506 = vrcp.f32 %v1603_v3  ;;  %v1618_v27 = vand.u32 2147483648, %v1603_v3  ;;  %vm1612_vm14 = vweird.f32 %v1603_v3  ;;  %v1616_v29 = vand.u32 2147483647, %v1603_v3 }
 0x313   : > { %v1581_v61 = vpop.f32.mrf.mxu2  ;;  %v1619_v32 = vor.u32 1.1754944e-38, %v1618_v27  ;;  %vm1617_vm0 = vcmp.eq.f32.partialorder %v1616_v29, 8.507059e+37 }
 0x314   : > { %v1669_v40 = vadd.f32 %v1581_v61, %v4977_v1  ;;  %v1589_v24 = vadd.f32 %v1581_v61, %v5265_v13 }
 0x316   : > { %1679 = vrot.lane.b32.xlu1 %v1669_v40, %s4760_s17  ;;  %v4319_v28 = vmul.f32 -1.442695, %v1589_v24 }
 0x317   : > { %v4507_v7 = vpop.eup %4506 }
 0x318   : > { %v1608_v21 = vmul.f32 %v4507_v7, %v1603_v3  ;;  %vm1613_vm13 = vweird.f32 %v4507_v7 }
 0x319   : > { %vm1614_vm15 = vmor %vm1612_vm14, %vm1613_vm13 }
 0x31a   : > { %v1609_v16 = vsub.f32 1.0, %v1608_v21 }
 0x31b   : > { %v1584_v17 = vpop.f32.mrf.mxu2 }
 0x31c   : > { %v1670_v8 = vadd.f32 %v1584_v17, %v4977_v1  ;;  %v1590_v6 = vadd.f32 %v1584_v17, %v5259_v14  ;;  %v1610_v12 = vmul.f32 %v4507_v7, %v1609_v16 }
 0x31e   : > { %1681 = vrot.lane.b32.xlu2 %v1670_v8, %s4760_s17  ;;  %v4320_v10 = vmul.f32 -1.442695, %v1590_v6  ;;  %v1611_v52 = vadd.f32 %v4507_v7, %v1610_v12 }
 0x320   : > { %4508 = vpow2.f32 %v4320_v10  ;;  %v1615_v35 = vsel %vm1614_vm15, %v4507_v7, %v1611_v52 }
 0x321   : > { %4510 = vpow2.f32 %v4318_v41  ;;  %v5268_v42 = vsel %vm1617_vm0, %v1619_v32, %v1615_v35 }
 0x326   : > { %v4509_v44 = vpop.eup %4508 }
 0x327   : > { %v1606_v26 = vadd.f32 1.0, %v4509_v44  ;;  %v4511_v30 = vpop.eup %4510 }
 0x328   : > { %v1604_v36 = vadd.f32 1.0, %v4511_v30 }
 0x329   : > { %4512 = vrcp.f32 %v1606_v26  ;;  %v1663_v57 = vand.u32 2147483648, %v1606_v26  ;;  %vm1657_vm3 = vweird.f32 %v1606_v26  ;;  %v1661_v58 = vand.u32 2147483647, %v1606_v26 }
 0x32a   : > { %4514 = vpow2.f32 %v4319_v28  ;;  %v1633_v5 = vand.u32 2147483648, %v1604_v36  ;;  %vm1627_vm7 = vweird.f32 %v1604_v36  ;;  %v1631_v3 = vand.u32 2147483647, %v1604_v36 }
 0x32b   : > { %4516 = vrcp.f32 %v1604_v36  ;;  %v1664_v61 = vor.u32 1.1754944e-38, %v1663_v57  ;;  %vm1662_vm5 = vcmp.eq.f32.partialorder %v1661_v58, 8.507059e+37 }
 0x32c   : > { %v1634_v10 = vor.u32 1.1754944e-38, %v1633_v5  ;;  %vm1632_vm10 = vcmp.eq.f32.partialorder %v1631_v3, 8.507059e+37  ;;  %v1715_v5 = vsub.f32 1.0, %v5268_v42 }
 0x32f   : > { %v4513_v48 = vpop.eup %4512 }
 0x330   : > { %v4515_v25 = vpop.eup %4514  ;;  %v1653_v49 = vmul.f32 %v4513_v48, %v1606_v26  ;;  %vm1658_vm2 = vweird.f32 %v4513_v48 }
 0x331   : > { %v1605_v50 = vadd.f32 1.0, %v4515_v25  ;;  %v4517_v18 = vpop.eup %4516  ;;  %vm1659_vm4 = vmor %vm1657_vm3, %vm1658_vm2 }
 0x332   : > { %v1654_v19 = vsub.f32 1.0, %v1653_v49  ;;  %v1623_v23 = vmul.f32 %v4517_v18, %v1604_v36  ;;  %vm1628_vm6 = vweird.f32 %v4517_v18 }
 0x333   : > { %4518 = vrcp.f32 %v1605_v50  ;;  %vm1629_vm9 = vmor %vm1627_vm7, %vm1628_vm6  ;;  %v1648_v44 = vand.u32 2147483648, %v1605_v50  ;;  %vm1642_vm13 = vweird.f32 %v1605_v50  ;;  %v1646_v12 = vand.u32 2147483647, %v1605_v50 }
 0x334   : > { %v1655_v37 = vmul.f32 %v4513_v48, %v1654_v19  ;;  %v1624_v62 = vsub.f32 1.0, %v1623_v23  ;;  %v5293_v19 = vld [vmem:[%s4911_s7 + $0xe0] sm:$0xff] }
 0x335   : > { %v1649_v26 = vor.u32 1.1754944e-38, %v1648_v44  ;;  %vm1647_vm15 = vcmp.eq.f32.partialorder %v1646_v12, 8.507059e+37 }
 0x336   : > { %v1656_v54 = vadd.f32 %v4513_v48, %v1655_v37  ;;  %v1625_v45 = vmul.f32 %v4517_v18, %v1624_v62  ;;  %v548_v37 = vmul.f32 %v5293_v19, %v5293_v19 }
 0x338   : > { %v1660_v38 = vsel %vm1659_vm4, %v4513_v48, %v1656_v54  ;;  %v1626_v56 = vadd.f32 %v4517_v18, %v1625_v45  ;;  %v678_v54 = vsel %vm6402_vm1, %v548_v37, 0.0 }
 0x339   : > { %v4519_v20 = vpop.eup %4518  ;;  %v5272_v40 = vsel %vm1662_vm5, %v1664_v61, %v1660_v38 }
 0x33a   : > { %v1638_v59 = vmul.f32 %v4519_v20, %v1605_v50  ;;  %v1630_v6 = vsel %vm1629_vm9, %v4517_v18, %v1626_v56  ;;  %vm1643_vm11 = vweird.f32 %v4519_v20 }
 0x33b   : > { %v5276_v60 = vsel %vm1632_vm10, %v1634_v10, %v1630_v6  ;;  %vm1644_vm14 = vmor %vm1642_vm13, %vm1643_vm11 }
 0x33c   : > { %v1639_v43 = vsub.f32 1.0, %v1638_v59 }
 0x33e   : > { %v1640_v7 = vmul.f32 %v4519_v20, %v1639_v43 }
 0x340   : > { %v1641_v41 = vadd.f32 %v4519_v20, %v1640_v7 }
 0x342   : > { %v1645_v24 = vsel %vm1644_vm14, %v4519_v20, %v1641_v41 }
 0x343   : > { %v5280_v27 = vsel %vm1647_vm15, %v1649_v26, %v1645_v24  ;;  %v5318_v24 = vld [vmem:[%s4911_s7 + $0xf0] sm:$0xff] }
 0x344   : > { %v495_v26 = vsel %vm6402_vm1, %v5318_v24, 0.0 }
 0x360   : > { %v1676_v46 = vpop.permute.xlu2 %1675 }
 0x361   : > { %v1687_v47 = vmul.f32 %v1676_v46, %v5268_v42 }
 0x363   : > { %1695 = vrot.lane.b32.xlu0 %v1687_v47, %s4758_s6 }
 0x378   : > { %v1682_v17 = vpop.permute.xlu2 %1681 }
 0x379   : > { %v1690_v8 = vmul.f32 %v1682_v17, %v5272_v40 }
 0x37b   : > { %1701 = vrot.lane.b32.xlu0 %v1690_v8, %s4758_s6  ;;  %v771_v8 = vsub.f32 %v5101_v63, %v5148_v9  ;;  %v5321_v63 = vld [vmem:[%s4911_s7 + $0xf8] sm:$0xff] }
 0x37d   : > { %v979_v3 = vmul.f32 %v5196_v33, %v771_v8 }
 0x37f   : > { %v1027_v41 = vmul.f32 %v5181_v55, %v979_v3 }
 0x380   : > { %v1678_v21 = vpop.permute.xlu0 %1677 }
 0x381   : > { %v1688_v16 = vmul.f32 %v1678_v21, %v5276_v60  ;;  %v1739_v21 = vmul.f32 %v5268_v42, %v5048_v53  ;;  %v1075_v33 = vadd.f32 %v5186_v2, %v1027_v41  ;;  %v496_v53 = vsel %vm6402_vm1, %v5321_v63, 0.0  ;;  %v5376_v41 = vld [vmem:[%s6400_s1] sm:$0xff] }
 0x382   : > { %v551_v2 = vmul.f32 %v5321_v63, %v5321_v63 }
 0x383   : > { %1697 = vrot.lane.b32.xlu1 %v1688_v16, %s4758_s6  ;;  %4304 = vmatmul.msk.f32.vlgmr.msra.gmra.mxu3 %vm6402_vm1, %v1075_v33 }
 0x384   : > { %2424 = vmatpush.msra.mxu3 %v5218_v31 }
 0x386   : > { %2425 = vmatpush.msra.mxu3 %v5224_v34  ;;  %v5355_v34 = vld [vmem:[%s4911_s7 + $0x48] sm:$0xff] }
 0x388   : > { %v1680_v52 = vpop.permute.xlu1 %1679 }
 0x389   : > { %v1689_v28 = vmul.f32 %v1680_v52, %v5280_v27  ;;  %v497_v52 = vadd.f32 %v496_v53, %v495_v26 }
 0x38b   : > { %1699 = vrot.lane.b32.xlu2 %v1689_v28, %s4758_s6  ;;  %v550_v28 = vmul.f32 %v5318_v24, %v5318_v24 }
 0x3d5   : > { %v1696_v29 = vpop.permute.xlu0 %1695 }
 0x3d6   : > { %v1707_v30 = vadd.f32 %v1696_v29, %v5256_v39 }
 0x3d8   : > { %4520 = vtanh.f32 %v1707_v30  ;;  %v1716_v30 = vsub.f32 1.0, %v5276_v60 }
 0x3de   : > { %v4521_v35 = vpop.eup %4520 }
 0x3df   : > { %1723 = vrot.lane.b32.xlu1 %v4521_v35, %s4761_s20  ;;  %v498_v35 = vrot.slane %v497_v52, 4 }
 0x3e5   : > { %v1700_v32 = vpop.permute.xlu2 %1699 }
 0x3e6   : > { %v1709_v36 = vadd.f32 %v1700_v32, %v5265_v13  ;;  %v5296_v13 = vld [vmem:[%s4911_s7 + $0xe8] sm:$0xff]  ;;  %v687_v32 = vsel %vm6402_vm1, %v550_v28, 0.0 }
 0x3e7   : > { %v487_v18 = vsel %vm6402_vm1, %v5296_v13, 0.0  ;;  %v5387_v28 = vld [vmem:[%s6400_s1 + $0x8] sm:$0xff] }
 0x3e8   : > { %4522 = vtanh.f32 %v1709_v36  ;;  %v688_v36 = vsel %vm6402_vm1, %v551_v2, 0.0  ;;  %v358_v2 = vrot.slane %v5387_v28, 7 }
 0x3ed   : > { %v1702_v46 = vpop.permute.xlu0 %1701 }
 0x3ee   : > { %v4523_v47 = vpop.eup %4522  ;;  %v1710_v48 = vadd.f32 %v1702_v46, %v5259_v14  ;;  %v486_v14 = vsel %vm6402_vm1, %v5293_v19, 0.0 }
 0x3ef   : > { %1727 = vrot.lane.b32.xlu0 %v4523_v47, %s4761_s20  ;;  %v488_v23 = vadd.f32 %v487_v18, %v486_v14 }
 0x3f0   : > { %4524 = vtanh.f32 %v1710_v48  ;;  %v689_v48 = vadd.f32 %v688_v36, %v687_v32 }
 0x3f1   : > { %v489_v20 = vrot.slane %v488_v23, 4 }
 0x3f2   : > { %v690_v31 = vrot.slane %v689_v48, 4 }
 0x3f3   : > { %v490_v58 = vadd.f32 %v489_v20, %v488_v23 }
 0x3f4   : > { %v691_v18 = vadd.f32 %v690_v31, %v689_v48 }
 0x3f5   : > { %v1698_v25 = vpop.permute.xlu1 %1697  ;;  %v491_v45 = vrot.slane %v490_v58, 2 }
 0x3f6   : > { %v4525_v49 = vpop.eup %4524  ;;  %v1708_v39 = vadd.f32 %v1698_v25, %v5262_v11  ;;  %v549_v11 = vmul.f32 %v5296_v13, %v5296_v13  ;;  %v1740_v25 = vmul.f32 %v5276_v60, %v5103_v0  ;;  %v692_v23 = vrot.slane %v691_v18, 2 }
 0x3f7   : > { %1729 = vrot.lane.b32.xlu1 %v4525_v49, %s4761_s20  ;;  %v492_v61 = vadd.f32 %v491_v45, %v490_v58 }
 0x3f8   : > { %4526 = vtanh.f32 %v1708_v39  ;;  %v679_v62 = vsel %vm6402_vm1, %v549_v11, 0.0  ;;  %v499_v39 = vadd.f32 %v498_v35, %v497_v52  ;;  %v1717_v11 = vsub.f32 1.0, %v5280_v27 }
 0x3f9   : > { %v680_v57 = vadd.f32 %v679_v62, %v678_v54  ;;  %v493_v56 = vrot.slane %v492_v61, 1  ;;  %v5352_v54 = vld [vmem:[%s4911_s7 + $0x40] sm:$0xff]  ;;  %v397_v62 = vsel %vm6402_vm1, %v5355_v34, 0.0  ;;  %v1718_v52 = vsub.f32 1.0, %v5272_v40 }
 0x3fa   : > { %v500_v14 = vrot.slane %v499_v39, 2  ;;  %v396_v60 = vsel %vm6402_vm1, %v5352_v54, 0.0  ;;  %v528_v20 = vmul.f32 %v5352_v54, %v5352_v54 }
 0x3fb   : > { %v681_v38 = vrot.slane %v680_v57, 4  ;;  %v494_v7 = vadd.f32 %v493_v56, %v492_v61  ;;  %v398_v45 = vadd.f32 %v397_v62, %v396_v60  ;;  %v1741_v61 = vmul.f32 %v5280_v27, %v5076_v22 }
 0x3fc   : > { %v501_v37 = vadd.f32 %v500_v14, %v499_v39  ;;  %v588_v3 = vsel %vm6402_vm1, %v528_v20, 0.0  ;;  %v349_v22 = vrot.slane %v5376_v41, 7 }
 0x3fd   : > { %v682_v59 = vadd.f32 %v681_v38, %v680_v57  ;;  %v5315_v44 = vmul.f32 0.083333336, %v494_v7  ;;  %v693_v38 = vadd.f32 %v692_v23, %v691_v18  ;;  %v1039_v23 = vperm.slane %v358_v2, 0 }
 0x3fe   : > { %v4527_v50 = vpop.eup %4526  ;;  %v502_v0 = vrot.slane %v501_v37, 1 }
 0x3ff   : > { %1725 = vrot.lane.b32.xlu2 %v4527_v50, %s4761_s20  ;;  %v683_v17 = vrot.slane %v682_v59, 2  ;;  %v726_v55 = vmul.f32 %v5315_v44, %v5315_v44  ;;  %v772_v35 = vsub.f32 %v5293_v19, %v5315_v44  ;;  %v773_v39 = vsub.f32 %v5296_v13, %v5315_v44 }
 0x400   : > { %v503_v56 = vadd.f32 %v502_v0, %v501_v37 }
 0x401   : > { %v684_v43 = vadd.f32 %v683_v17, %v682_v59  ;;  %v529_v59 = vmul.f32 %v5355_v34, %v5355_v34 }
 0x403   : > { %v685_v10 = vrot.slane %v684_v43, 1 }
 0x405   : > { %v686_v12 = vadd.f32 %v685_v10, %v684_v43  ;;  %v694_v43 = vrot.slane %v693_v38, 1 }
 0x407   : > { %v710_v42 = vmul.f32 0.083333336, %v686_v12  ;;  %v695_v27 = vadd.f32 %v694_v43, %v693_v38 }
 0x409   : > { %v742_v29 = vsub.f32 %v710_v42, %v726_v55  ;;  %v711_v53 = vmul.f32 0.083333336, %v695_v27 }
 0x40b   : > { %v790_v47 = vadd.f32 1e-05, %v742_v29 }
 0x40d   : > { %4528 = vrsqrt.f32 %v790_v47  ;;  %vm938_vm0 = vweird.f32 %v790_v47 }
 0x413   : > { %v4529_v57 = vpop.eup %4528 }
 0x414   : > { %v933_v8 = vmul.f32 %v4529_v57, %v790_v47  ;;  %vm939_vm2 = vweird.f32 %v4529_v57  ;;  %v1742_v47 = vmul.f32 %v5272_v40, %v5064_v4 }
 0x415   : > { %vm940_vm3 = vmor %vm938_vm0, %vm939_vm2 }
 0x416   : > { %v934_v10 = vmul.f32 %v4529_v57, %v933_v8 }
 0x418   : > { %v935_v33 = vmul.f32 0.5, %v934_v10 }
 0x41a   : > { %v936_v29 = vsub.f32 1.5, %v935_v33 }
 0x451   : > { %v1724_v6 = vpop.permute.xlu1 %1723 }
 0x452   : > { %v1735_v16 = vmul.f32 %v1724_v6, %v1715_v5  ;;  %v399_v5 = vrot.slane %v398_v45, 4  ;;  %v589_v6 = vsel %vm6402_vm1, %v529_v59, 0.0 }
 0x454   : > { %v5323_v9 = vadd.f32 %v1739_v21, %v1735_v16  ;;  %v5371_v21 = vmul.f32 0.083333336, %v503_v56  ;;  %v590_v16 = vadd.f32 %v589_v6, %v588_v3  ;;  %v400_v12 = vadd.f32 %v399_v5, %v398_v45 }
 0x456   : > { %1755 = vrot.lane.b32.xlu2 %v5323_v9, %s4761_s20  ;;  %v727_v26 = vmul.f32 %v5371_v21, %v5371_v21  ;;  %v401_v42 = vrot.slane %v400_v12, 2  ;;  %v591_v55 = vrot.slane %v590_v16, 4  ;;  %v774_v3 = vsub.f32 %v5318_v24, %v5371_v21 }
 0x457   : > { %v775_v10 = vsub.f32 %v5321_v63, %v5371_v21  ;;  %v344_v24 = vrot.slane %v5376_v41, 2  ;;  %v353_v63 = vrot.slane %v5387_v28, 2 }
 0x458   : > { %v743_v32 = vsub.f32 %v711_v53, %v727_v26  ;;  %v402_v36 = vadd.f32 %v401_v42, %v400_v12 }
 0x459   : > { %v1726_v46 = vpop.permute.xlu2 %1725 }
 0x45a   : > { %v1736_v49 = vmul.f32 %v1726_v46, %v1716_v30  ;;  %v592_v46 = vadd.f32 %v591_v55, %v590_v16  ;;  %v791_v31 = vadd.f32 1e-05, %v743_v32  ;;  %v403_v14 = vrot.slane %v402_v36, 1 }
 0x45c   : > { %v5346_v50 = vadd.f32 %v1740_v25, %v1736_v49  ;;  %v937_v25 = vmul.f32 %v4529_v57, %v936_v29  ;;  %v991_v49 = vperm.slane %v349_v22, 0  ;;  %v593_v18 = vrot.slane %v592_v46, 2  ;;  %v319_v29 = vld [vmem:[%s4911_s7 + $0x50] sm:$0xff] }
 0x45d   : > { %4530 = vrsqrt.f32 %v791_v31  ;;  %v404_v0 = vadd.f32 %v403_v14, %v402_v36  ;;  %vm948_vm4 = vweird.f32 %v791_v31  ;;  %v530_v36 = vmul.f32 %v319_v29, %v319_v29 }
 0x45e   : > { %1757 = vrot.lane.b32.xlu0 %v5346_v50, %s4761_s20  ;;  %v594_v4 = vadd.f32 %v593_v18, %v592_v46 }
 0x45f   : > { %v5400_v62 = vmul.f32 0.083333336, %v404_v0 }
 0x460   : > { %v595_v20 = vrot.slane %v594_v4, 1 }
 0x461   : > { %v1728_v58 = vpop.permute.xlu0 %1727  ;;  %v752_v21 = vsub.f32 %v5352_v54, %v5400_v62 }
 0x462   : > { %v1737_v17 = vmul.f32 %v1728_v58, %v1717_v11  ;;  %v941_v11 = vsel %vm940_vm3, %v4529_v57, %v937_v25  ;;  %v596_v44 = vadd.f32 %v595_v20, %v594_v4  ;;  %v716_v58 = vmul.f32 %v5400_v62, %v5400_v62 }
 0x463   : > { %v980_v19 = vmul.f32 %v941_v11, %v772_v35  ;;  %v981_v60 = vmul.f32 %v941_v11, %v773_v39  ;;  %v4531_v38 = vpop.eup %4530  ;;  %v405_v35 = vsel %vm6402_vm1, %v319_v29, 0.0  ;;  %v597_v39 = vsel %vm6402_vm1, %v530_v36, 0.0  ;;  %v5434_v36 = vld [vmem:[%s6400_s1 + $0x18] ss:$0 sm:$0xff] }
 0x464   : > { %v5369_v7 = vadd.f32 %v1741_v61, %v1737_v17  ;;  %v943_v45 = vmul.f32 %v4531_v38, %v791_v31  ;;  %v700_v59 = vmul.f32 0.083333336, %v596_v44  ;;  %vm949_vm5 = vweird.f32 %v4531_v38 }
 0x465   : > { %v1028_v40 = vmul.f32 %v991_v49, %v980_v19  ;;  %v1029_v57 = vmul.f32 %v991_v49, %v981_v60  ;;  %vm950_vm6 = vmor %vm948_vm4, %vm949_vm5  ;;  %v1034_v19 = vperm.slane %v353_v63, 0 }
 0x466   : > { %1759 = vrot.lane.b32.xlu1 %v5369_v7, %s4761_s20  ;;  %v944_v61 = vmul.f32 %v4531_v38, %v943_v45  ;;  %v732_v17 = vsub.f32 %v700_v59, %v716_v58 }
 0x467   : > { %v1076_v13 = vadd.f32 %v1039_v23, %v1028_v40  ;;  %v1077_v8 = vadd.f32 %v1039_v23, %v1029_v57 }
 0x468   : > { %v945_v56 = vmul.f32 0.5, %v944_v61  ;;  %v780_v43 = vadd.f32 1e-05, %v732_v17 }
 0x469   : > { %v1730_v30 = vpop.permute.xlu1 %1729  ;;  %4305 = vmatmul.msk.f32.gmra.mxu3 %vm6402_vm1, %v1076_v13 }
 0x46a   : > { %v1738_v48 = vmul.f32 %v1730_v30, %v1718_v52  ;;  %v946_v5 = vsub.f32 1.5, %v945_v56  ;;  %4532 = vrsqrt.f32 %v780_v43  ;;  %vm838_vm7 = vweird.f32 %v780_v43  ;;  %v320_v30 = vld [vmem:[%s4911_s7 + $0x58] sm:$0xff] }
 0x46b   : > { %v406_v32 = vsel %vm6402_vm1, %v320_v30, 0.0  ;;  %v531_v46 = vmul.f32 %v320_v30, %v320_v30 }
 0x46c   : > { %v5396_v37 = vadd.f32 %v1742_v47, %v1738_v48  ;;  %v947_v6 = vmul.f32 %v4531_v38, %v946_v5  ;;  %v407_v25 = vadd.f32 %v406_v32, %v405_v35  ;;  %v1281_v32 = vpop.f32.mrf.mxu3 }
 0x46d   : > { %v598_v31 = vsel %vm6402_vm1, %v531_v46, 0.0  ;;  %v1282_v46 = vadd.f32 %v5434_v36, %v1281_v32 }
 0x46e   : > { %1761 = vrot.lane.b32.xlu2 %v5396_v37, %s4761_s20  ;;  %v951_v16 = vsel %vm950_vm6, %v4531_v38, %v947_v6  ;;  %v408_v54 = vrot.slane %v407_v25, 4  ;;  %v599_v18 = vadd.f32 %v598_v31, %v597_v39  ;;  %v753_v6 = vsub.f32 %v5355_v34, %v5400_v62 }
 0x46f   : > { %v982_v22 = vmul.f32 %v951_v16, %v774_v3  ;;  %v983_v33 = vmul.f32 %v951_v16, %v775_v10  ;;  %1324 = vst.msk [vmem:[#allocation2 + $0xd8] sm:$0xff] %vm6403_vm8, %v1282_v46 }
 0x470   : > { %v4533_v27 = vpop.eup %4532  ;;  %v409_v0 = vadd.f32 %v408_v54, %v407_v25  ;;  %v600_v4 = vrot.slane %v599_v18, 4 }
 0x471   : > { %4306 = vmatmul.msk.f32.gmra.mxu3 %vm6402_vm1, %v1077_v8  ;;  %v1030_v12 = vmul.f32 %v991_v49, %v982_v22  ;;  %v833_v26 = vmul.f32 %v4533_v27, %v780_v43  ;;  %v1031_v55 = vmul.f32 %v991_v49, %v983_v33  ;;  %vm839_vm9 = vweird.f32 %v4533_v27 }
 0x472   : > { %vm840_vm10 = vmor %vm838_vm7, %vm839_vm9  ;;  %v986_v49 = vperm.slane %v344_v24, 0  ;;  %v410_v60 = vrot.slane %v409_v0, 2  ;;  %v601_v20 = vadd.f32 %v600_v4, %v599_v18 }
 0x473   : > { %v1078_v53 = vadd.f32 %v1039_v23, %v1030_v12  ;;  %v834_v42 = vmul.f32 %v4533_v27, %v833_v26  ;;  %v1079_v47 = vadd.f32 %v1039_v23, %v1031_v55 }
 0x474   : > { %v411_v13 = vadd.f32 %v410_v60, %v409_v0  ;;  %v602_v44 = vrot.slane %v601_v20, 2 }
 0x475   : > { %v835_v52 = vmul.f32 0.5, %v834_v42 }
 0x476   : > { %v412_v58 = vrot.slane %v411_v13, 1  ;;  %v603_v38 = vadd.f32 %v602_v44, %v601_v20 }
 0x477   : > { %v836_v2 = vsub.f32 1.5, %v835_v52 }
 0x478   : > { %v413_v57 = vadd.f32 %v412_v58, %v411_v13  ;;  %v604_v45 = vrot.slane %v603_v38, 1 }
 0x479   : > { %4307 = vmatmul.msk.f32.gmra.mxu3 %vm6402_vm1, %v1078_v53  ;;  %v837_v48 = vmul.f32 %v4533_v27, %v836_v2 }
 0x47a   : > { %v509_v59 = vmul.f32 0.083333336, %v413_v57  ;;  %v605_v61 = vadd.f32 %v604_v45, %v603_v38 }
 0x47b   : > { %v841_v14 = vsel %vm840_vm10, %v4533_v27, %v837_v48 }
 0x47c   : > { %v960_v11 = vmul.f32 %v841_v14, %v752_v21  ;;  %v701_v17 = vmul.f32 0.083333336, %v605_v61  ;;  %v717_v8 = vmul.f32 %v509_v59, %v509_v59  ;;  %v961_v16 = vmul.f32 %v841_v14, %v753_v6 }
 0x47d   : > { %v754_v53 = vsub.f32 %v319_v29, %v509_v59  ;;  %v755_v62 = vsub.f32 %v320_v30, %v509_v59 }
 0x47e   : > { %v1008_v40 = vmul.f32 %v986_v49, %v960_v11  ;;  %v733_v56 = vsub.f32 %v701_v17, %v717_v8  ;;  %v1009_v27 = vmul.f32 %v986_v49, %v961_v16 }
 0x480   : > { %v1056_v23 = vadd.f32 %v1034_v19, %v1008_v40  ;;  %v781_v43 = vadd.f32 1e-05, %v733_v56  ;;  %v1057_v33 = vadd.f32 %v1034_v19, %v1009_v27 }
 0x481   : > { %4308 = vmatmul.msk.f32.gmra.mxu3 %vm6402_vm1, %v1079_v47 }
 0x482   : > { %4285 = vmatmul.msk.f32.gmra.mxu0 %vm6402_vm1, %v1056_v23  ;;  %4534 = vrsqrt.f32 %v781_v43  ;;  %vm848_vm11 = vweird.f32 %v781_v43 }
 0x488   : > { %v4535_v5 = vpop.eup %4534 }
 0x489   : > { %v843_v3 = vmul.f32 %v4535_v5, %v781_v43  ;;  %vm849_vm13 = vweird.f32 %v4535_v5 }
 0x48a   : > { %4286 = vmatmul.msk.f32.gmra.mxu0 %vm6402_vm1, %v1057_v33  ;;  %vm850_vm14 = vmor %vm848_vm11, %vm849_vm13 }
 0x48b   : > { %v844_v10 = vmul.f32 %v4535_v5, %v843_v3 }
 0x48d   : > { %v845_v22 = vmul.f32 0.5, %v844_v10 }
 0x48f   : > { %v846_v12 = vsub.f32 1.5, %v845_v22 }
 0x491   : > { %v847_v26 = vmul.f32 %v4535_v5, %v846_v12 }
 0x493   : > { %v851_v55 = vsel %vm850_vm14, %v4535_v5, %v847_v26 }
 0x494   : > { %v962_v52 = vmul.f32 %v851_v55, %v754_v53  ;;  %v963_v63 = vmul.f32 %v851_v55, %v755_v62 }
 0x496   : > { %v1010_v24 = vmul.f32 %v986_v49, %v962_v52  ;;  %v1011_v21 = vmul.f32 %v986_v49, %v963_v63 }
 0x498   : > { %v1058_v34 = vadd.f32 %v1034_v19, %v1010_v24  ;;  %v1059_v2 = vadd.f32 %v1034_v19, %v1011_v21 }
 0x49a   : > { %4287 = vmatmul.msk.f32.gmra.mxu0 %vm6402_vm1, %v1058_v34 }
 0x4a2   : > { %4288 = vmatmul.msk.f32.gmra.mxu0 %vm6402_vm1, %v1059_v2 }
 0x4b0   : > { %v1756_v42 = vpop.permute.xlu2 %1755 }
 0x4b1   : > { %4321 = vmatmul.msk.f32.vlgmr.msrb.gmra.mxu3 %vm1336_vm12, %v1756_v42 }
 0x4c8   : > { %v1762_v30 = vpop.permute.xlu2 %1761 }
 0x4d0   : > { %v1758_v35 = vpop.permute.xlu0 %1757 }
 0x4d1   : > { %4322 = vmatmul.msk.f32.gmra.mxu3 %vm1336_vm12, %v1758_v35 }
 0x4d8   : > { %v1760_v29 = vpop.permute.xlu1 %1759 }
 0x4d9   : > { %4323 = vmatmul.msk.f32.gmra.mxu3 %vm1336_vm12, %v1760_v29 }
 0x4e1   : > { %4324 = vmatmul.msk.f32.gmra.mxu3 %vm1336_vm12, %v1762_v30 }
 0x4ec   : > { %v1284_v47 = vpop.f32.mrf.mxu3 }
 0x4ed   : > { %v1285_v48 = vadd.f32 %v5434_v36, %v1284_v47 }
 0x4ef   : > { %1325 = vst.msk [vmem:[#allocation2 + $0xe0] sm:$0xff] %vm6403_vm8, %v1285_v48 }
 0x4f4   : > { %v1287_v25 = vpop.f32.mrf.mxu3 }
 0x4f5   : > { %v1288_v49 = vadd.f32 %v5434_v36, %v1287_v25 }
 0x4f7   : > { %1326 = vst.msk [vmem:[#allocation2 + $0xe8] sm:$0xff] %vm6403_vm8, %v1288_v49 }
 0x4fc   : > { %v1290_v39 = vpop.f32.mrf.mxu3 }
 0x4fd   : > { %v1291_v31 = vadd.f32 %v5434_v36, %v1290_v39 }
 0x4ff   : > { %1327 = vst.msk [vmem:[#allocation2 + $0xf0] sm:$0xff] %vm6403_vm8, %v1291_v31  ;;  %v1224_v14 = vpop.f32.mrf.mxu0 }
 0x500   : > { %v1225_v54 = vadd.f32 %v5434_v36, %v1224_v14 }
 0x502   : > { %1305 = vst.msk [vmem:[#allocation2 + $0x40] sm:$0xff] %vm6403_vm8, %v1225_v54 }
 0x504   : > { %v1293_v18 = vpop.f32.mrf.mxu3 }
 0x505   : > { %v1294_v11 = vadd.f32 %v5434_v36, %v1293_v18 }
 0x507   : > { %1328 = vst.msk [vmem:[#allocation2 + $0xf8] sm:$0xff] %vm6403_vm8, %v1294_v11  ;;  %v1227_v19 = vpop.f32.mrf.mxu0 }
 0x508   : > { %v1228_v0 = vadd.f32 %v5434_v36, %v1227_v19 }
 0x509   : > { %v5463_v61 = vld [vmem:[#allocation2 + $0x40] sm:$0xff] }
 0x50a   : > { %1306 = vst.msk [vmem:[#allocation2 + $0x48] sm:$0xff] %vm6403_vm8, %v1228_v0 }
 0x511   : > { %v5469_v16 = vld [vmem:[#allocation2 + $0x48] sm:$0xff] }
 0x517   : > { %v1230_v40 = vpop.f32.mrf.mxu0 }
 0x518   : > { %v1231_v20 = vadd.f32 %v5434_v36, %v1230_v40 }
 0x51a   : > { %1307 = vst.msk [vmem:[#allocation2 + $0x50] sm:$0xff] %vm6403_vm8, %v1231_v20 }
 0x51f   : > { %v1233_v23 = vpop.f32.mrf.mxu0 }
 0x520   : > { %v1234_v13 = vadd.f32 %v5434_v36, %v1233_v23 }
 0x521   : > { %v5466_v56 = vld [vmem:[#allocation2 + $0x50] sm:$0xff] }
 0x522   : > { %1308 = vst.msk [vmem:[#allocation2 + $0x58] sm:$0xff] %vm6403_vm8, %v1234_v13 }
 0x529   : > { %v5472_v62 = vld [vmem:[#allocation2 + $0x58] sm:$0xff] }
 0x534   : > { %v1788_v4 = vpop.f32.mrf.mxu3 }
 0x535   : > { %v1880_v60 = vadd.f32 %v1788_v4, %v4977_v1  ;;  %v1800_v17 = vadd.f32 %v1788_v4, %v5463_v61 }
 0x537   : > { %1888 = vrot.lane.b32.xlu0 %v1880_v60, %s4760_s17  ;;  %v4325_v8 = vmul.f32 -1.442695, %v1800_v17 }
 0x539   : > { %4536 = vpow2.f32 %v4325_v8 }
 0x53f   : > { %v4537_v43 = vpop.eup %4536 }
 0x540   : > { %v1816_v3 = vadd.f32 1.0, %v4537_v43 }
 0x542   : > { %4538 = vrcp.f32 %v1816_v3  ;;  %v1831_v24 = vand.u32 2147483648, %v1816_v3  ;;  %vm1825_vm0 = vweird.f32 %v1816_v3  ;;  %v1829_v34 = vand.u32 2147483647, %v1816_v3 }
 0x544   : > { %v1832_v35 = vor.u32 1.1754944e-38, %v1831_v24  ;;  %vm1830_vm3 = vcmp.eq.f32.partialorder %v1829_v34, 8.507059e+37 }
 0x548   : > { %v4539_v10 = vpop.eup %4538 }
 0x549   : > { %v1821_v27 = vmul.f32 %v4539_v10, %v1816_v3  ;;  %vm1826_vm15 = vweird.f32 %v4539_v10 }
 0x54a   : > { %vm1827_vm2 = vmor %vm1825_vm0, %vm1826_vm15 }
 0x54b   : > { %v1822_v26 = vsub.f32 1.0, %v1821_v27 }
 0x54d   : > { %v1823_v42 = vmul.f32 %v4539_v10, %v1822_v26 }
 0x54f   : > { %v1824_v55 = vadd.f32 %v4539_v10, %v1823_v42 }
 0x551   : > { %v1828_v21 = vsel %vm1827_vm2, %v4539_v10, %v1824_v55 }
 0x552   : > { %v5475_v30 = vsel %vm1830_vm3, %v1832_v35, %v1828_v21 }
 0x554   : > { %v1791_v44 = vpop.f32.mrf.mxu3 }
 0x555   : > { %v1881_v58 = vadd.f32 %v1791_v44, %v4977_v1  ;;  %v1801_v12 = vadd.f32 %v1791_v44, %v5469_v16 }
 0x557   : > { %1890 = vrot.lane.b32.xlu1 %v1881_v58, %s4760_s17  ;;  %v4326_v53 = vmul.f32 -1.442695, %v1801_v12 }
 0x55c   : > { %v1794_v38 = vpop.f32.mrf.mxu3 }
 0x55d   : > { %v1882_v57 = vadd.f32 %v1794_v38, %v4977_v1  ;;  %v1802_v5 = vadd.f32 %v1794_v38, %v5466_v56 }
 0x55f   : > { %1892 = vrot.lane.b32.xlu2 %v1882_v57, %s4760_s17  ;;  %v4327_v6 = vmul.f32 -1.442695, %v1802_v5 }
 0x561   : > { %4540 = vpow2.f32 %v4327_v6 }
 0x564   : > { %v1797_v45 = vpop.f32.mrf.mxu3 }
 0x565   : > { %v1883_v59 = vadd.f32 %v1797_v45, %v4977_v1  ;;  %v1803_v29 = vadd.f32 %v1797_v45, %v5472_v62 }
 0x567   : > { %1894 = vrot.lane.b32.xlu0 %v1883_v59, %s4760_s17  ;;  %v4541_v22 = vpop.eup %4540  ;;  %v4328_v25 = vmul.f32 -1.442695, %v1803_v29 }
 0x568   : > { %v1818_v33 = vadd.f32 1.0, %v4541_v22 }
 0x56a   : > { %4542 = vrcp.f32 %v1818_v33  ;;  %v1861_v14 = vand.u32 2147483648, %v1818_v33  ;;  %vm1855_vm5 = vweird.f32 %v1818_v33  ;;  %v1859_v54 = vand.u32 2147483647, %v1818_v33 }
 0x56b   : > { %4544 = vpow2.f32 %v4326_v53 }
 0x56c   : > { %v1862_v0 = vor.u32 1.1754944e-38, %v1861_v14  ;;  %vm1860_vm7 = vcmp.eq.f32.partialorder %v1859_v54, 8.507059e+37 }
 0x570   : > { %v4543_v52 = vpop.eup %4542 }
 0x571   : > { %v4545_v63 = vpop.eup %4544  ;;  %v1851_v2 = vmul.f32 %v4543_v52, %v1818_v33  ;;  %vm1856_vm4 = vweird.f32 %v4543_v52 }
 0x572   : > { %v1817_v32 = vadd.f32 1.0, %v4545_v63  ;;  %vm1857_vm6 = vmor %vm1855_vm5, %vm1856_vm4 }
 0x573   : > { %v1852_v48 = vsub.f32 1.0, %v1851_v2 }
 0x574   : > { %4546 = vrcp.f32 %v1817_v32  ;;  %v1846_v38 = vand.u32 2147483648, %v1817_v32  ;;  %vm1840_vm10 = vweird.f32 %v1817_v32  ;;  %v1844_v57 = vand.u32 2147483647, %v1817_v32 }
 0x575   : > { %v1853_v49 = vmul.f32 %v4543_v52, %v1852_v48  ;;  %4548 = vpow2.f32 %v4328_v25 }
 0x576   : > { %v1847_v17 = vor.u32 1.1754944e-38, %v1846_v38  ;;  %vm1845_vm13 = vcmp.eq.f32.partialorder %v1844_v57, 8.507059e+37 }
 0x577   : > { %v1854_v39 = vadd.f32 %v4543_v52, %v1853_v49  ;;  %v321_v49 = vld [vmem:[%s4911_s7 + $0x60] sm:$0xff] }
 0x578   : > { %v532_v14 = vmul.f32 %v321_v49, %v321_v49 }
 0x579   : > { %v1858_v11 = vsel %vm1857_vm6, %v4543_v52, %v1854_v39  ;;  %v5508_v39 = vld [vmem:[%s4911_s7 + $0x68] sm:$0xff] }
 0x57a   : > { %v4547_v31 = vpop.eup %4546  ;;  %v5479_v40 = vsel %vm1860_vm7, %v1862_v0, %v1858_v11  ;;  %v533_v54 = vmul.f32 %v5508_v39, %v5508_v39 }
 0x57b   : > { %v4549_v18 = vpop.eup %4548  ;;  %v1836_v19 = vmul.f32 %v4547_v31, %v1817_v32  ;;  %vm1841_vm9 = vweird.f32 %v4547_v31 }
 0x57c   : > { %v1819_v4 = vadd.f32 1.0, %v4549_v18  ;;  %vm1842_vm11 = vmor %vm1840_vm10, %vm1841_vm9 }
 0x57d   : > { %v1837_v23 = vsub.f32 1.0, %v1836_v19 }
 0x57e   : > { %4550 = vrcp.f32 %v1819_v4  ;;  %v1876_v22 = vand.u32 2147483648, %v1819_v4  ;;  %vm1870_vm15 = vweird.f32 %v1819_v4  ;;  %v1874_v27 = vand.u32 2147483647, %v1819_v4 }
 0x57f   : > { %v1838_v13 = vmul.f32 %v4547_v31, %v1837_v23 }
 0x580   : > { %v1877_v33 = vor.u32 1.1754944e-38, %v1876_v22  ;;  %vm1875_vm2 = vcmp.eq.f32.partialorder %v1874_v27, 8.507059e+37 }
 0x581   : > { %v1839_v44 = vadd.f32 %v4547_v31, %v1838_v13 }
 0x583   : > { %v1843_v45 = vsel %vm1842_vm11, %v4547_v31, %v1839_v44  ;;  %v415_v31 = vsel %vm6402_vm1, %v5508_v39, 0.0 }
 0x584   : > { %v4551_v58 = vpop.eup %4550  ;;  %v5483_v43 = vsel %vm1845_vm13, %v1847_v17, %v1843_v45 }
 0x585   : > { %v1866_v59 = vmul.f32 %v4551_v58, %v1819_v4  ;;  %vm1871_vm14 = vweird.f32 %v4551_v58  ;;  %v1929_v23 = vsub.f32 1.0, %v5483_v43  ;;  %v1953_v38 = vmul.f32 %v5483_v43, %v5346_v50 }
 0x586   : > { %vm1872_vm0 = vmor %vm1870_vm15, %vm1871_vm14 }
 0x587   : > { %v1867_v3 = vsub.f32 1.0, %v1866_v59 }
 0x589   : > { %v1868_v6 = vmul.f32 %v4551_v58, %v1867_v3 }
 0x58b   : > { %v1869_v10 = vadd.f32 %v4551_v58, %v1868_v6 }
 0x58d   : > { %v1873_v12 = vsel %vm1872_vm0, %v4551_v58, %v1869_v10  ;;  %v1930_v10 = vsub.f32 1.0, %v5479_v40 }
 0x58e   : > { %v5487_v53 = vsel %vm1875_vm2, %v1877_v33, %v1873_v12 }
 0x5a9   : > { %v1889_v46 = vpop.permute.xlu0 %1888 }
 0x5aa   : > { %v1900_v47 = vmul.f32 %v1889_v46, %v5475_v30  ;;  %v1928_v46 = vsub.f32 1.0, %v5475_v30 }
 0x5ac   : > { %1908 = vrot.lane.b32.xlu1 %v1900_v47, %s4758_s6 }
 0x5b9   : > { %v1893_v60 = vpop.permute.xlu2 %1892 }
 0x5ba   : > { %v1902_v20 = vmul.f32 %v1893_v60, %v5479_v40 }
 0x5bc   : > { %1912 = vrot.lane.b32.xlu0 %v1902_v20, %s4758_s6 }
 0x5c9   : > { %v1891_v8 = vpop.permute.xlu1 %1890 }
 0x5ca   : > { %v1901_v5 = vmul.f32 %v1891_v8, %v5483_v43  ;;  %v1954_v43 = vmul.f32 %v5479_v40, %v5369_v7 }
 0x5cc   : > { %1910 = vrot.lane.b32.xlu2 %v1901_v5, %s4758_s6 }
 0x5d9   : > { %v1895_v26 = vpop.permute.xlu0 %1894 }
 0x5da   : > { %v1903_v42 = vmul.f32 %v1895_v26, %v5487_v53 }
 0x5dc   : > { %1914 = vrot.lane.b32.xlu1 %v1903_v42, %s4758_s6 }
 0x61e   : > { %v1909_v55 = vpop.permute.xlu1 %1908 }
 0x61f   : > { %v1920_v52 = vadd.f32 %v1909_v55, %v5463_v61  ;;  %v1931_v55 = vsub.f32 1.0, %v5487_v53 }
 0x621   : > { %4552 = vtanh.f32 %v1920_v52 }
 0x626   : > { %v1911_v24 = vpop.permute.xlu2 %1910 }
 0x627   : > { %v4553_v34 = vpop.eup %4552  ;;  %v1921_v63 = vadd.f32 %v1911_v24, %v5469_v16  ;;  %v1955_v24 = vmul.f32 %v5487_v53, %v5396_v37 }
 0x628   : > { %1936 = vrot.lane.b32.xlu2 %v4553_v34, %s4761_s20 }
 0x629   : > { %4554 = vtanh.f32 %v1921_v63 }
 0x62e   : > { %v1913_v21 = vpop.permute.xlu0 %1912 }
 0x62f   : > { %v4555_v2 = vpop.eup %4554  ;;  %v1922_v35 = vadd.f32 %v1913_v21, %v5466_v56  ;;  %v1952_v56 = vmul.f32 %v5475_v30, %v5323_v9  ;;  %v606_v9 = vsel %vm6402_vm1, %v532_v14, 0.0  ;;  %v607_v30 = vsel %vm6402_vm1, %v533_v54, 0.0 }
 0x630   : > { %1938 = vrot.lane.b32.xlu0 %v4555_v2, %s4761_s20  ;;  %v608_v19 = vadd.f32 %v607_v30, %v606_v9 }
 0x631   : > { %4556 = vtanh.f32 %v1922_v35  ;;  %v345_v35 = vrot.slane %v5376_v41, 3 }
 0x632   : > { %v609_v4 = vrot.slane %v608_v19, 4 }
 0x634   : > { %v610_v20 = vadd.f32 %v609_v4, %v608_v19 }
 0x636   : > { %v611_v44 = vrot.slane %v610_v20, 2 }
 0x637   : > { %v4557_v29 = vpop.eup %4556 }
 0x638   : > { %1940 = vrot.lane.b32.xlu1 %v4557_v29, %s4761_s20  ;;  %v612_v59 = vadd.f32 %v611_v44, %v610_v20 }
 0x63a   : > { %v613_v5 = vrot.slane %v612_v59, 1 }
 0x63c   : > { %v614_v6 = vadd.f32 %v613_v5, %v612_v59 }
 0x63e   : > { %v702_v22 = vmul.f32 0.083333336, %v614_v6 }
 0x64e   : > { %v1915_v61 = vpop.permute.xlu1 %1914 }
 0x64f   : > { %v1923_v32 = vadd.f32 %v1915_v61, %v5472_v62  ;;  %v414_v62 = vsel %vm6402_vm1, %v321_v49, 0.0  ;;  %v354_v61 = vrot.slane %v5387_v28, 3 }
 0x650   : > { %v416_v18 = vadd.f32 %v415_v31, %v414_v62  ;;  %v323_v62 = vld [vmem:[%s4911_s7 + $0x70] sm:$0xff]  ;;  %v324_v31 = vld [vmem:[%s4911_s7 + $0x78] sm:$0xff] }
 0x651   : > { %4558 = vtanh.f32 %v1923_v32  ;;  %v987_v32 = vperm.slane %v345_v35, 0  ;;  %v423_v14 = vsel %vm6402_vm1, %v323_v62, 0.0  ;;  %v424_v41 = vsel %vm6402_vm1, %v324_v31, 0.0 }
 0x652   : > { %v417_v11 = vrot.slane %v416_v18, 4  ;;  %v534_v54 = vmul.f32 %v323_v62, %v323_v62  ;;  %v535_v28 = vmul.f32 %v324_v31, %v324_v31 }
 0x654   : > { %v418_v0 = vadd.f32 %v417_v11, %v416_v18  ;;  %v425_v18 = vadd.f32 %v424_v41, %v423_v14  ;;  %v616_v9 = vsel %vm6402_vm1, %v535_v28, 0.0 }
 0x656   : > { %v419_v60 = vrot.slane %v418_v0, 2  ;;  %v426_v30 = vrot.slane %v425_v18, 4 }
 0x657   : > { %v4559_v16 = vpop.eup %4558 }
 0x658   : > { %1942 = vrot.lane.b32.xlu2 %v4559_v16, %s4761_s20  ;;  %v420_v13 = vadd.f32 %v419_v60, %v418_v0  ;;  %v427_v19 = vadd.f32 %v426_v30, %v425_v18 }
 0x65a   : > { %v421_v45 = vrot.slane %v420_v13, 1  ;;  %v428_v4 = vrot.slane %v427_v19, 2 }
 0x65c   : > { %v422_v8 = vadd.f32 %v421_v45, %v420_v13  ;;  %v429_v20 = vadd.f32 %v428_v4, %v427_v19 }
 0x65e   : > { %v5524_v3 = vmul.f32 0.083333336, %v422_v8  ;;  %v430_v13 = vrot.slane %v429_v20, 1 }
 0x660   : > { %v718_v27 = vmul.f32 %v5524_v3, %v5524_v3  ;;  %v756_v37 = vsub.f32 %v321_v49, %v5524_v3  ;;  %v615_v49 = vsel %vm6402_vm1, %v534_v54, 0.0 }
 0x661   : > { %v617_v11 = vadd.f32 %v616_v9, %v615_v49 }
 0x662   : > { %v734_v33 = vsub.f32 %v702_v22, %v718_v27  ;;  %v757_v22 = vsub.f32 %v5508_v39, %v5524_v3 }
 0x663   : > { %v618_v0 = vrot.slane %v617_v11, 4 }
 0x664   : > { %v782_v42 = vadd.f32 1e-05, %v734_v33 }
 0x665   : > { %v619_v60 = vadd.f32 %v618_v0, %v617_v11 }
 0x666   : > { %4560 = vrsqrt.f32 %v782_v42  ;;  %vm858_vm3 = vweird.f32 %v782_v42 }
 0x66c   : > { %v4561_v63 = vpop.eup %4560 }
 0x66d   : > { %v853_v7 = vmul.f32 %v4561_v63, %v782_v42  ;;  %vm859_vm4 = vweird.f32 %v4561_v63 }
 0x66e   : > { %vm860_vm5 = vmor %vm858_vm3, %vm859_vm4 }
 0x66f   : > { %v854_v40 = vmul.f32 %v4561_v63, %v853_v7 }
 0x671   : > { %v855_v2 = vmul.f32 0.5, %v854_v40 }
 0x673   : > { %v856_v29 = vsub.f32 1.5, %v855_v2 }
 0x675   : > { %v857_v53 = vmul.f32 %v4561_v63, %v856_v29 }
 0x677   : > { %v861_v16 = vsel %vm860_vm5, %v4561_v63, %v857_v53 }
 0x682   : > { %v1937_v47 = vpop.permute.xlu2 %1936 }
 0x683   : > { %v1948_v48 = vmul.f32 %v1937_v47, %v1928_v46  ;;  %v964_v46 = vmul.f32 %v861_v16, %v756_v37  ;;  %v1035_v47 = vperm.slane %v354_v61, 0 }
 0x685   : > { %v5502_v25 = vadd.f32 %v1952_v56, %v1948_v48  ;;  %v1012_v56 = vmul.f32 %v987_v32, %v964_v46 }
 0x687   : > { %1968 = vrot.lane.b32.xlu0 %v5502_v25, %s4761_s20  ;;  %v1060_v48 = vadd.f32 %v1035_v47, %v1012_v56 }
 0x689   : > { %4289 = vmatmul.msk.f32.gmra.mxu0 %vm6402_vm1, %v1060_v48 }
 0x6a2   : > { %v1939_v58 = vpop.permute.xlu0 %1938 }
 0x6a3   : > { %v1949_v57 = vmul.f32 %v1939_v58, %v1929_v23  ;;  %v620_v23 = vrot.slane %v619_v60, 2  ;;  %v431_v58 = vadd.f32 %v430_v13, %v429_v20 }
 0x6a5   : > { %v5520_v17 = vadd.f32 %v1953_v38, %v1949_v57  ;;  %v621_v44 = vadd.f32 %v620_v23, %v619_v60  ;;  %v511_v57 = vmul.f32 0.083333336, %v431_v58 }
 0x6a7   : > { %1970 = vrot.lane.b32.xlu1 %v5520_v17, %s4761_s20  ;;  %v622_v38 = vrot.slane %v621_v44, 1  ;;  %v719_v8 = vmul.f32 %v511_v57, %v511_v57  ;;  %v759_v39 = vsub.f32 %v324_v31, %v511_v57 }
 0x6a9   : > { %v623_v45 = vadd.f32 %v622_v38, %v621_v44 }
 0x6aa   : > { %v1941_v50 = vpop.permute.xlu1 %1940 }
 0x6ab   : > { %v1950_v12 = vmul.f32 %v1941_v50, %v1930_v10  ;;  %v703_v59 = vmul.f32 0.083333336, %v623_v45  ;;  %v965_v50 = vmul.f32 %v861_v16, %v757_v22 }
 0x6ad   : > { %v5531_v26 = vadd.f32 %v1954_v43, %v1950_v12  ;;  %v735_v5 = vsub.f32 %v703_v59, %v719_v8  ;;  %v1013_v12 = vmul.f32 %v987_v32, %v965_v50 }
 0x6af   : > { %1972 = vrot.lane.b32.xlu2 %v5531_v26, %s4761_s20  ;;  %v783_v6 = vadd.f32 1e-05, %v735_v5  ;;  %v1061_v42 = vadd.f32 %v1035_v47, %v1013_v12 }
 0x6b1   : > { %4562 = vrsqrt.f32 %v783_v6  ;;  %vm868_vm6 = vweird.f32 %v783_v6  ;;  %4290 = vmatmul.msk.f32.gmra.mxu0 %vm6402_vm1, %v1061_v42 }
 0x6b2   : > { %v1943_v52 = vpop.permute.xlu2 %1942 }
 0x6b3   : > { %v1951_v34 = vmul.f32 %v1943_v52, %v1931_v55  ;;  %v758_v52 = vsub.f32 %v323_v62, %v511_v57 }
 0x6b5   : > { %v5538_v21 = vadd.f32 %v1955_v24, %v1951_v34 }
 0x6b7   : > { %1974 = vrot.lane.b32.xlu0 %v5538_v21, %s4761_s20  ;;  %v4563_v10 = vpop.eup %4562 }
 0x6b8   : > { %v863_v27 = vmul.f32 %v4563_v10, %v783_v6  ;;  %vm869_vm7 = vweird.f32 %v4563_v10 }
 0x6b9   : > { %vm870_vm9 = vmor %vm868_vm6, %vm869_vm7 }
 0x6ba   : > { %v864_v43 = vmul.f32 %v4563_v10, %v863_v27 }
 0x6bc   : > { %v865_v33 = vmul.f32 0.5, %v864_v43 }
 0x6be   : > { %v866_v55 = vsub.f32 1.5, %v865_v33 }
 0x6c0   : > { %v867_v24 = vmul.f32 %v4563_v10, %v866_v55 }
 0x6c2   : > { %v871_v34 = vsel %vm870_vm9, %v4563_v10, %v867_v24 }
 0x6c3   : > { %v966_v63 = vmul.f32 %v871_v34, %v758_v52  ;;  %v967_v3 = vmul.f32 %v871_v34, %v759_v39 }
 0x6c5   : > { %v1014_v7 = vmul.f32 %v987_v32, %v966_v63  ;;  %v1015_v35 = vmul.f32 %v987_v32, %v967_v3 }
 0x6c7   : > { %v1062_v40 = vadd.f32 %v1035_v47, %v1014_v7  ;;  %v1063_v29 = vadd.f32 %v1035_v47, %v1015_v35 }
 0x6c9   : > { %4291 = vmatmul.msk.f32.gmra.mxu0 %vm6402_vm1, %v1062_v40 }
 0x6d1   : > { %4292 = vmatmul.msk.f32.gmra.mxu0 %vm6402_vm1, %v1063_v29 }
 0x6f9   : > { %v1969_v2 = vpop.permute.xlu0 %1968 }
 0x6fa   : > { %4329 = vmatmul.msk.f32.vlgmr.msrb.gmra.mxu1 %vm1336_vm12, %v1969_v2 }
 0x706   : > { %v1236_v16 = vpop.f32.mrf.mxu0 }
 0x707   : > { %v1237_v46 = vadd.f32 %v5434_v36, %v1236_v16 }
 0x709   : > { %v1973_v37 = vpop.permute.xlu2 %1972  ;;  %1309 = vst.msk [vmem:[#allocation2 + $0x60] sm:$0xff] %vm6403_vm8, %v1237_v46 }
 0x710   : > { %v5577_v11 = vld [vmem:[#allocation2 + $0x60] sm:$0xff] }
 0x719   : > { %v1971_v61 = vpop.permute.xlu1 %1970 }
 0x71a   : > { %4330 = vmatmul.msk.f32.gmra.mxu1 %vm1336_vm12, %v1971_v61 }
 0x722   : > { %4331 = vmatmul.msk.f32.gmra.mxu1 %vm1336_vm12, %v1973_v37 }
 0x729   : > { %v1975_v53 = vpop.permute.xlu0 %1974 }
 0x72a   : > { %4332 = vmatmul.msk.f32.gmra.mxu1 %vm1336_vm12, %v1975_v53 }
 0x72e   : > { %v1239_v56 = vpop.f32.mrf.mxu0 }
 0x72f   : > { %v1240_v32 = vadd.f32 %v5434_v36, %v1239_v56 }
 0x731   : > { %1310 = vst.msk [vmem:[#allocation2 + $0x68] sm:$0xff] %vm6403_vm8, %v1240_v32 }
 0x738   : > { %v5580_v0 = vld [vmem:[#allocation2 + $0x68] sm:$0xff] }
 0x746   : > { %v1242_v48 = vpop.f32.mrf.mxu0 }
 0x747   : > { %v1243_v31 = vadd.f32 %v5434_v36, %v1242_v48 }
 0x749   : > { %1311 = vst.msk [vmem:[#allocation2 + $0x70] sm:$0xff] %vm6403_vm8, %v1243_v31 }
 0x74e   : > { %v1245_v14 = vpop.f32.mrf.mxu0 }
 0x74f   : > { %v1246_v41 = vadd.f32 %v5434_v36, %v1245_v14 }
 0x750   : > { %v5583_v59 = vld [vmem:[#allocation2 + $0x70] sm:$0xff] }
 0x751   : > { %1312 = vst.msk [vmem:[#allocation2 + $0x78] sm:$0xff] %vm6403_vm8, %v1246_v41 }
 0x758   : > { %v5586_v12 = vld [vmem:[#allocation2 + $0x78] sm:$0xff] }
 0x777   : > { %v2001_v47 = vpop.f32.mrf.mxu1 }
 0x778   : > { %v2093_v62 = vadd.f32 %v2001_v47, %v4977_v1  ;;  %v2013_v36 = vadd.f32 %v2001_v47, %v5577_v11 }
 0x77a   : > { %2101 = vrot.lane.b32.xlu1 %v2093_v62, %s4760_s17  ;;  %v4333_v19 = vmul.f32 -1.442695, %v2013_v36 }
 0x77c   : > { %4564 = vpow2.f32 %v4333_v19 }
 0x782   : > { %v4565_v20 = vpop.eup %4564 }
 0x783   : > { %v2029_v23 = vadd.f32 1.0, %v4565_v20 }
 0x785   : > { %v2044_v27 = vand.u32 2147483648, %v2029_v23  ;;  %vm2038_vm11 = vweird.f32 %v2029_v23  ;;  %v2042_v43 = vand.u32 2147483647, %v2029_v23 }
 0x787   : > { %v2045_v55 = vor.u32 1.1754944e-38, %v2044_v27  ;;  %vm2043_vm14 = vcmp.eq.f32.partialorder %v2042_v43, 8.507059e+37 }
 0x797   : > { %v2004_v54 = vpop.f32.mrf.mxu1 }
 0x798   : > { %v2094_v28 = vadd.f32 %v2004_v54, %v4977_v1  ;;  %v2014_v4 = vadd.f32 %v2004_v54, %v5580_v0 }
 0x79a   : > { %2103 = vrot.lane.b32.xlu2 %v2094_v28, %s4760_s17  ;;  %v4334_v60 = vmul.f32 -1.442695, %v2014_v4 }
 0x79c   : > { %4566 = vpow2.f32 %v4334_v60 }
 0x79d   : > { %4568 = vrcp.f32 %v2029_v23 }
 0x79f   : > { %v2007_v18 = vpop.f32.mrf.mxu1 }
 0x7a0   : > { %v2095_v49 = vadd.f32 %v2007_v18, %v4977_v1  ;;  %v2015_v6 = vadd.f32 %v2007_v18, %v5583_v59 }
 0x7a2   : > { %2105 = vrot.lane.b32.xlu0 %v2095_v49, %s4760_s17  ;;  %v4567_v13 = vpop.eup %4566  ;;  %v4335_v50 = vmul.f32 -1.442695, %v2015_v6 }
 0x7a3   : > { %v2030_v44 = vadd.f32 1.0, %v4567_v13  ;;  %v4569_v58 = vpop.eup %4568 }
 0x7a4   : > { %v2034_v38 = vmul.f32 %v4569_v58, %v2029_v23  ;;  %vm2039_vm10 = vweird.f32 %v4569_v58 }
 0x7a5   : > { %4570 = vrcp.f32 %v2030_v44  ;;  %vm2040_vm13 = vmor %vm2038_vm11, %vm2039_vm10  ;;  %v2059_v40 = vand.u32 2147483648, %v2030_v44  ;;  %vm2053_vm0 = vweird.f32 %v2030_v44  ;;  %v2057_v39 = vand.u32 2147483647, %v2030_v44 }
 0x7a6   : > { %v2035_v57 = vsub.f32 1.0, %v2034_v38  ;;  %4572 = vpow2.f32 %v4335_v50 }
 0x7a7   : > { %v2010_v9 = vpop.f32.mrf.mxu1  ;;  %v2060_v29 = vor.u32 1.1754944e-38, %v2059_v40  ;;  %vm2058_vm3 = vcmp.eq.f32.partialorder %v2057_v39, 8.507059e+37 }
 0x7a8   : > { %v2096_v30 = vadd.f32 %v2010_v9, %v4977_v1  ;;  %v2036_v8 = vmul.f32 %v4569_v58, %v2035_v57  ;;  %v2016_v52 = vadd.f32 %v2010_v9, %v5586_v12 }
 0x7aa   : > { %2107 = vrot.lane.b32.xlu1 %v2096_v30, %s4760_s17  ;;  %v2037_v10 = vadd.f32 %v4569_v58, %v2036_v8  ;;  %v4336_v2 = vmul.f32 -1.442695, %v2016_v52 }
 0x7ab   : > { %v4571_v45 = vpop.eup %4570 }
 0x7ac   : > { %v2049_v5 = vmul.f32 %v4571_v45, %v2030_v44  ;;  %v2041_v33 = vsel %vm2040_vm13, %v4569_v58, %v2037_v10  ;;  %vm2054_vm15 = vweird.f32 %v4571_v45  ;;  %v4573_v3 = vpop.eup %4572  ;;  %4574 = vpow2.f32 %v4336_v2 }
 0x7ad   : > { %v5589_v34 = vsel %vm2043_vm14, %v2045_v55, %v2041_v33  ;;  %vm2055_vm2 = vmor %vm2053_vm0, %vm2054_vm15  ;;  %v2031_v61 = vadd.f32 1.0, %v4573_v3 }
 0x7ae   : > { %v2050_v22 = vsub.f32 1.0, %v2049_v5  ;;  %v2165_v52 = vmul.f32 %v5589_v34, %v5502_v25 }
 0x7af   : > { %4576 = vrcp.f32 %v2031_v61  ;;  %v2074_v28 = vand.u32 2147483648, %v2031_v61  ;;  %vm2068_vm5 = vweird.f32 %v2031_v61  ;;  %v2072_v18 = vand.u32 2147483647, %v2031_v61 }
 0x7b0   : > { %v2051_v42 = vmul.f32 %v4571_v45, %v2050_v22 }
 0x7b1   : > { %v2075_v30 = vor.u32 1.1754944e-38, %v2074_v28  ;;  %vm2073_vm7 = vcmp.eq.f32.partialorder %v2072_v18, 8.507059e+37 }
 0x7b2   : > { %v2052_v7 = vadd.f32 %v4571_v45, %v2051_v42  ;;  %v4575_v46 = vpop.eup %4574 }
 0x7b3   : > { %v2032_v56 = vadd.f32 1.0, %v4575_v46 }
 0x7b4   : > { %v2056_v35 = vsel %vm2055_vm2, %v4571_v45, %v2052_v7  ;;  %v5624_v7 = vld [vmem:[%s4911_s7 + $0x88] sm:$0xff] }
 0x7b5   : > { %v5593_v37 = vsel %vm2058_vm3, %v2060_v29, %v2056_v35  ;;  %v4577_v32 = vpop.eup %4576  ;;  %4578 = vrcp.f32 %v2032_v56  ;;  %v2089_v20 = vand.u32 2147483648, %v2032_v56  ;;  %vm2083_vm10 = vweird.f32 %v2032_v56 }
 0x7b6   : > { %v2064_v47 = vmul.f32 %v4577_v32, %v2031_v61  ;;  %vm2069_vm4 = vweird.f32 %v4577_v32  ;;  %v2087_v23 = vand.u32 2147483647, %v2032_v56  ;;  %v433_v40 = vsel %vm6402_vm1, %v5624_v7, 0.0 }
 0x7b7   : > { %vm2070_vm6 = vmor %vm2068_vm5, %vm2069_vm4  ;;  %v2090_v44 = vor.u32 1.1754944e-38, %v2089_v20  ;;  %v537_v25 = vmul.f32 %v5624_v7, %v5624_v7 }
 0x7b8   : > { %v2065_v48 = vsub.f32 1.0, %v2064_v47  ;;  %vm2088_vm13 = vcmp.eq.f32.partialorder %v2087_v23, 8.507059e+37 }
 0x7b9   : > { %v625_v3 = vsel %vm6402_vm1, %v537_v25, 0.0 }
 0x7ba   : > { %v2066_v31 = vmul.f32 %v4577_v32, %v2065_v48 }
 0x7bb   : > { %v4579_v62 = vpop.eup %4578 }
 0x7bc   : > { %v2079_v14 = vmul.f32 %v4579_v62, %v2032_v56  ;;  %v2067_v41 = vadd.f32 %v4577_v32, %v2066_v31  ;;  %vm2084_vm9 = vweird.f32 %v4579_v62  ;;  %v2142_v56 = vsub.f32 1.0, %v5593_v37 }
 0x7bd   : > { %vm2085_vm11 = vmor %vm2083_vm10, %vm2084_vm9 }
 0x7be   : > { %v2080_v54 = vsub.f32 1.0, %v2079_v14  ;;  %v2071_v49 = vsel %vm2070_vm6, %v4577_v32, %v2067_v41 }
 0x7bf   : > { %v5597_v19 = vsel %vm2073_vm7, %v2075_v30, %v2071_v49 }
 0x7c0   : > { %v2081_v9 = vmul.f32 %v4579_v62, %v2080_v54  ;;  %v2143_v30 = vsub.f32 1.0, %v5597_v19 }
 0x7c2   : > { %v2082_v60 = vadd.f32 %v4579_v62, %v2081_v9 }
 0x7c4   : > { %v2086_v13 = vsel %vm2085_vm11, %v4579_v62, %v2082_v60  ;;  %v2166_v62 = vmul.f32 %v5593_v37, %v5520_v17  ;;  %v2167_v17 = vmul.f32 %v5597_v19, %v5531_v26 }
 0x7c5   : > { %v5601_v38 = vsel %vm2088_vm13, %v2090_v44, %v2086_v13 }
 0x7c6   : > { %v2144_v44 = vsub.f32 1.0, %v5601_v38 }
 0x7ec   : > { %v2102_v24 = vpop.permute.xlu1 %2101 }
 0x7ed   : > { %v2113_v63 = vmul.f32 %v2102_v24, %v5589_v34 }
 0x7ef   : > { %2121 = vrot.lane.b32.xlu2 %v2113_v63, %s4758_s6  ;;  %v5621_v63 = vld [vmem:[%s4911_s7 + $0x80] sm:$0xff] }
 0x7f0   : > { %v536_v2 = vmul.f32 %v5621_v63, %v5621_v63 }
 0x7f2   : > { %v624_v39 = vsel %vm6402_vm1, %v536_v2, 0.0 }
 0x7f3   : > { %v626_v29 = vadd.f32 %v625_v3, %v624_v39 }
 0x7f4   : > { %v2104_v53 = vpop.permute.xlu2 %2103 }
 0x7f5   : > { %v2114_v16 = vmul.f32 %v2104_v53, %v5593_v37  ;;  %v627_v53 = vrot.slane %v626_v29, 4 }
 0x7f7   : > { %2123 = vrot.lane.b32.xlu0 %v2114_v16, %s4758_s6  ;;  %v628_v46 = vadd.f32 %v627_v53, %v626_v29 }
 0x7f9   : > { %v629_v47 = vrot.slane %v628_v46, 2 }
 0x7fb   : > { %v630_v41 = vadd.f32 %v629_v47, %v628_v46 }
 0x7fd   : > { %v631_v18 = vrot.slane %v630_v41, 1 }
 0x7ff   : > { %v632_v9 = vadd.f32 %v631_v18, %v630_v41 }
 0x814   : > { %v2106_v36 = vpop.permute.xlu0 %2105 }
 0x815   : > { %v2115_v4 = vmul.f32 %v2106_v36, %v5597_v19  ;;  %v704_v36 = vmul.f32 0.083333336, %v632_v9 }
 0x817   : > { %2125 = vrot.lane.b32.xlu1 %v2115_v4, %s4758_s6 }
 0x81c   : > { %v2108_v58 = vpop.permute.xlu1 %2107 }
 0x81d   : > { %v2116_v57 = vmul.f32 %v2108_v58, %v5601_v38 }
 0x81f   : > { %2127 = vrot.lane.b32.xlu2 %v2116_v57, %s4758_s6  ;;  %v2168_v57 = vmul.f32 %v5601_v38, %v5538_v21  ;;  %v4732_v38 = vld [vmem:[%s6400_s1 + $0x8] sm:$0xff] }
 0x849   : > { %v2122_v45 = vpop.permute.xlu2 %2121 }
 0x84a   : > { %v2133_v8 = vadd.f32 %v2122_v45, %v5577_v11 }
 0x84c   : > { %4580 = vtanh.f32 %v2133_v8 }
 0x852   : > { %v4581_v5 = vpop.eup %4580 }
 0x853   : > { %2149 = vrot.lane.b32.xlu0 %v4581_v5, %s4761_s20 }
 0x869   : > { %v2124_v6 = vpop.permute.xlu0 %2123 }
 0x86a   : > { %v2134_v10 = vadd.f32 %v2124_v6, %v5580_v0  ;;  %v2141_v0 = vsub.f32 1.0, %v5589_v34 }
 0x86c   : > { %4582 = vtanh.f32 %v2134_v10  ;;  %v4731_v10 = vld [vmem:[%s6400_s1] sm:$0xff] }
 0x872   : > { %v4583_v22 = vpop.eup %4582 }
 0x873   : > { %2151 = vrot.lane.b32.xlu1 %v4583_v22, %s4761_s20  ;;  %v346_v22 = vrot.slane %v4731_v10, 4 }
 0x879   : > { %v2128_v27 = vpop.permute.xlu2 %2127 }
 0x87a   : > { %v2136_v50 = vadd.f32 %v2128_v27, %v5586_v12  ;;  %v355_v27 = vrot.slane %v4732_v38, 4 }
 0x87c   : > { %4584 = vtanh.f32 %v2136_v50 }
 0x882   : > { %v4585_v43 = vpop.eup %4584 }
 0x883   : > { %2155 = vrot.lane.b32.xlu0 %v4585_v43, %s4761_s20 }
 0x889   : > { %v2126_v11 = vpop.permute.xlu1 %2125 }
 0x88a   : > { %v2135_v33 = vadd.f32 %v2126_v11, %v5583_v59  ;;  %v432_v59 = vsel %vm6402_vm1, %v5621_v63, 0.0  ;;  %v988_v11 = vperm.slane %v346_v22, 0 }
 0x88b   : > { %v434_v34 = vadd.f32 %v433_v40, %v432_v59  ;;  %v328_v59 = vld [vmem:[%s4911_s7 + $0x98] sm:$0xff] }
 0x88c   : > { %4586 = vtanh.f32 %v2135_v33  ;;  %v442_v2 = vsel %vm6402_vm1, %v328_v59, 0.0 }
 0x88d   : > { %v435_v35 = vrot.slane %v434_v34, 4 }
 0x88f   : > { %v436_v61 = vadd.f32 %v435_v35, %v434_v34  ;;  %v539_v34 = vmul.f32 %v328_v59, %v328_v59 }
 0x891   : > { %v437_v16 = vrot.slane %v436_v61, 2  ;;  %v634_v3 = vsel %vm6402_vm1, %v539_v34, 0.0 }
 0x892   : > { %v4587_v42 = vpop.eup %4586 }
 0x893   : > { %2153 = vrot.lane.b32.xlu2 %v4587_v42, %s4761_s20  ;;  %v438_v32 = vadd.f32 %v437_v16, %v436_v61 }
 0x895   : > { %v439_v14 = vrot.slane %v438_v32, 1 }
 0x897   : > { %v440_v28 = vadd.f32 %v439_v14, %v438_v32 }
 0x899   : > { %v512_v49 = vmul.f32 0.083333336, %v440_v28 }
 0x89b   : > { %v720_v4 = vmul.f32 %v512_v49, %v512_v49  ;;  %v760_v50 = vsub.f32 %v5621_v63, %v512_v49  ;;  %v761_v16 = vsub.f32 %v5624_v7, %v512_v49 }
 0x89d   : > { %v736_v20 = vsub.f32 %v704_v36, %v720_v4 }
 0x89f   : > { %v784_v13 = vadd.f32 1e-05, %v736_v20 }
 0x8a1   : > { %4588 = vrsqrt.f32 %v784_v13  ;;  %vm878_vm14 = vweird.f32 %v784_v13 }
 0x8a7   : > { %v4589_v8 = vpop.eup %4588 }
 0x8a8   : > { %v873_v26 = vmul.f32 %v4589_v8, %v784_v13  ;;  %vm879_vm15 = vweird.f32 %v4589_v8 }
 0x8a9   : > { %vm880_vm0 = vmor %vm878_vm14, %vm879_vm15 }
 0x8aa   : > { %v874_v19 = vmul.f32 %v4589_v8, %v873_v26 }
 0x8ac   : > { %v875_v6 = vmul.f32 0.5, %v874_v19 }
 0x8ae   : > { %v876_v21 = vsub.f32 1.5, %v875_v6 }
 0x8b0   : > { %v877_v43 = vmul.f32 %v4589_v8, %v876_v21 }
 0x8b2   : > { %v881_v33 = vsel %vm880_vm0, %v4589_v8, %v877_v43 }
 0x8b3   : > { %v968_v42 = vmul.f32 %v881_v33, %v760_v50  ;;  %v969_v32 = vmul.f32 %v881_v33, %v761_v16  ;;  %v5682_v33 = vld [vmem:[%s6400_s1 + $0x18] ss:$0 sm:$0xff] }
 0x8c5   : > { %v2150_v55 = vpop.permute.xlu0 %2149 }
 0x8c6   : > { %v2161_v24 = vmul.f32 %v2150_v55, %v2141_v0  ;;  %v1036_v0 = vperm.slane %v355_v27, 0  ;;  %v1016_v55 = vmul.f32 %v988_v11, %v968_v42 }
 0x8c8   : > { %v5616_v12 = vadd.f32 %v2165_v52, %v2161_v24  ;;  %v1064_v52 = vadd.f32 %v1036_v0, %v1016_v55  ;;  %v327_v24 = vld [vmem:[%s4911_s7 + $0x90] sm:$0xff] }
 0x8c9   : > { %v441_v40 = vsel %vm6402_vm1, %v327_v24, 0.0  ;;  %v538_v25 = vmul.f32 %v327_v24, %v327_v24 }
 0x8ca   : > { %2181 = vrot.lane.b32.xlu1 %v5616_v12, %s4761_s20  ;;  %4293 = vmatmul.msk.f32.gmra.mxu0 %vm6402_vm1, %v1064_v52  ;;  %v443_v39 = vadd.f32 %v442_v2, %v441_v40 }
 0x8cb   : > { %v633_v63 = vsel %vm6402_vm1, %v538_v25, 0.0 }
 0x8cc   : > { %v444_v35 = vrot.slane %v443_v39, 4  ;;  %v635_v29 = vadd.f32 %v634_v3, %v633_v63 }
 0x8ce   : > { %v445_v61 = vadd.f32 %v444_v35, %v443_v39  ;;  %v636_v53 = vrot.slane %v635_v29, 4 }
 0x8d0   : > { %v446_v46 = vrot.slane %v445_v61, 2 }
 0x8d2   : > { %v447_v47 = vadd.f32 %v446_v46, %v445_v61 }
 0x8e5   : > { %v2152_v48 = vpop.permute.xlu1 %2151 }
 0x8e6   : > { %v2162_v31 = vmul.f32 %v2152_v48, %v2142_v56  ;;  %v637_v56 = vadd.f32 %v636_v53, %v635_v29 }
 0x8e8   : > { %v5639_v54 = vadd.f32 %v2166_v62, %v2162_v31  ;;  %v638_v48 = vrot.slane %v637_v56, 2  ;;  %v1017_v62 = vmul.f32 %v988_v11, %v969_v32  ;;  %v448_v31 = vrot.slane %v447_v47, 1 }
 0x8ea   : > { %2183 = vrot.lane.b32.xlu2 %v5639_v54, %s4761_s20  ;;  %v639_v14 = vadd.f32 %v638_v48, %v637_v56  ;;  %v1065_v41 = vadd.f32 %v1036_v0, %v1017_v62  ;;  %v449_v28 = vadd.f32 %v448_v31, %v447_v47 }
 0x8ec   : > { %v640_v18 = vrot.slane %v639_v14, 1  ;;  %4294 = vmatmul.msk.f32.gmra.mxu0 %vm6402_vm1, %v1065_v41  ;;  %v513_v9 = vmul.f32 0.083333336, %v449_v28 }
 0x8ed   : > { %v2154_v60 = vpop.permute.xlu2 %2153 }
 0x8ee   : > { %v2163_v37 = vmul.f32 %v2154_v60, %v2143_v30  ;;  %v641_v30 = vadd.f32 %v640_v18, %v639_v14  ;;  %v721_v4 = vmul.f32 %v513_v9, %v513_v9  ;;  %v763_v6 = vsub.f32 %v328_v59, %v513_v9 }
 0x8f0   : > { %v5646_v23 = vadd.f32 %v2167_v17, %v2163_v37  ;;  %v705_v36 = vmul.f32 0.083333336, %v641_v30 }
 0x8f2   : > { %2185 = vrot.lane.b32.xlu0 %v5646_v23, %s4761_s20  ;;  %v737_v60 = vsub.f32 %v705_v36, %v721_v4 }
 0x8f4   : > { %v785_v17 = vadd.f32 1e-05, %v737_v60 }
 0x8f5   : > { %v2156_v58 = vpop.permute.xlu0 %2155 }
 0x8f6   : > { %v2164_v45 = vmul.f32 %v2156_v58, %v2144_v44  ;;  %4590 = vrsqrt.f32 %v785_v17  ;;  %vm888_vm2 = vweird.f32 %v785_v17  ;;  %v762_v44 = vsub.f32 %v327_v24, %v513_v9 }
 0x8f8   : > { %v5653_v5 = vadd.f32 %v2168_v57, %v2164_v45 }
 0x8fa   : > { %2187 = vrot.lane.b32.xlu1 %v5653_v5, %s4761_s20 }
 0x8fc   : > { %v4591_v7 = vpop.eup %4590 }
 0x8fd   : > { %v883_v49 = vmul.f32 %v4591_v7, %v785_v17  ;;  %vm889_vm3 = vweird.f32 %v4591_v7 }
 0x8fe   : > { %vm890_vm4 = vmor %vm888_vm2, %vm889_vm3 }
 0x8ff   : > { %v884_v37 = vmul.f32 %v4591_v7, %v883_v49 }
 0x901   : > { %v885_v20 = vmul.f32 0.5, %v884_v37 }
 0x903   : > { %v886_v13 = vsub.f32 1.5, %v885_v20 }
 0x905   : > { %v887_v58 = vmul.f32 %v4591_v7, %v886_v13 }
 0x907   : > { %v891_v45 = vsel %vm890_vm4, %v4591_v7, %v887_v58 }
 0x908   : > { %v970_v8 = vmul.f32 %v891_v45, %v762_v44  ;;  %v971_v22 = vmul.f32 %v891_v45, %v763_v6 }
 0x90a   : > { %v1018_v26 = vmul.f32 %v988_v11, %v970_v8  ;;  %v1019_v21 = vmul.f32 %v988_v11, %v971_v22 }
 0x90c   : > { %v1066_v19 = vadd.f32 %v1036_v0, %v1018_v26  ;;  %v1067_v38 = vadd.f32 %v1036_v0, %v1019_v21 }
 0x90e   : > { %4295 = vmatmul.msk.f32.gmra.mxu0 %vm6402_vm1, %v1066_v19 }
 0x916   : > { %4296 = vmatmul.msk.f32.gmra.mxu0 %vm6402_vm1, %v1067_v38 }
 0x93c   : > { %v2182_v57 = vpop.permute.xlu1 %2181 }
 0x93d   : > { %4337 = vmatmul.msk.f32.vlgmr.msra.gmra.mxu2 %vm1336_vm12, %v2182_v57 }
 0x944   : > { %v2184_v10 = vpop.permute.xlu2 %2183 }
 0x945   : > { %4338 = vmatmul.msk.f32.gmra.mxu2 %vm1336_vm12, %v2184_v10 }
 0x947   : > { %v1248_v43 = vpop.f32.mrf.mxu0 }
 0x948   : > { %v1249_v42 = vadd.f32 %v5682_v33, %v1248_v43 }
 0x94a   : > { %1313 = vst.msk [vmem:[#allocation2 + $0x80] sm:$0xff] %vm6403_vm8, %v1249_v42 }
 0x951   : > { %v5696_v63 = vld [vmem:[#allocation2 + $0x80] sm:$0xff] }
 0x964   : > { %v2186_v27 = vpop.permute.xlu0 %2185 }
 0x965   : > { %4339 = vmatmul.msk.f32.gmra.mxu2 %vm1336_vm12, %v2186_v27 }
 0x969   : > { %v1251_v11 = vpop.f32.mrf.mxu0 }
 0x96a   : > { %v1252_v0 = vadd.f32 %v5682_v33, %v1251_v11 }
 0x96c   : > { %v2188_v50 = vpop.permute.xlu1 %2187  ;;  %1314 = vst.msk [vmem:[#allocation2 + $0x88] sm:$0xff] %vm6403_vm8, %v1252_v0 }
 0x96d   : > { %4340 = vmatmul.msk.f32.gmra.mxu2 %vm1336_vm12, %v2188_v50 }
 0x973   : > { %v5703_v32 = vld [vmem:[#allocation2 + $0x88] sm:$0xff] }
 0x98b   : > { %v1254_v52 = vpop.f32.mrf.mxu0 }
 0x98c   : > { %v1255_v59 = vadd.f32 %v5682_v33, %v1254_v52 }
 0x98e   : > { %1315 = vst.msk [vmem:[#allocation2 + $0x90] sm:$0xff] %vm6403_vm8, %v1255_v59 }
 0x993   : > { %v1257_v2 = vpop.f32.mrf.mxu0 }
 0x994   : > { %v1258_v34 = vadd.f32 %v5682_v33, %v1257_v2 }
 0x995   : > { %v5713_v44 = vld [vmem:[#allocation2 + $0x90] sm:$0xff] }
 0x996   : > { %1316 = vst.msk [vmem:[#allocation2 + $0x98] sm:$0xff] %vm6403_vm8, %v1258_v34 }
 0x99d   : > { %v5706_v9 = vld [vmem:[#allocation2 + $0x98] sm:$0xff] }
 0x9c0   : > { %v2214_v55 = vpop.f32.mrf.mxu2 }
 0x9c1   : > { %v2306_v24 = vadd.f32 %v2214_v55, %v4977_v1  ;;  %v2226_v35 = vadd.f32 %v2214_v55, %v5696_v63 }
 0x9c3   : > { %2314 = vrot.lane.b32.xlu2 %v2306_v24, %s4760_s17  ;;  %v4341_v29 = vmul.f32 -1.442695, %v2226_v35 }
 0x9c5   : > { %4592 = vpow2.f32 %v4341_v29 }
 0x9c8   : > { %v2217_v40 = vpop.f32.mrf.mxu2 }
 0x9c9   : > { %v2307_v25 = vadd.f32 %v2217_v40, %v4977_v1  ;;  %v2227_v48 = vadd.f32 %v2217_v40, %v5703_v32 }
 0x9cb   : > { %2316 = vrot.lane.b32.xlu0 %v2307_v25, %s4760_s17  ;;  %v4593_v16 = vpop.eup %4592  ;;  %v4342_v31 = vmul.f32 -1.442695, %v2227_v48 }
 0x9cc   : > { %v2242_v46 = vadd.f32 1.0, %v4593_v16 }
 0x9ce   : > { %4594 = vrcp.f32 %v2242_v46  ;;  %v2257_v28 = vand.u32 2147483648, %v2242_v46  ;;  %vm2251_vm6 = vweird.f32 %v2242_v46  ;;  %v2255_v18 = vand.u32 2147483647, %v2242_v46 }
 0x9cf   : > { %4596 = vpow2.f32 %v4342_v31 }
 0x9d0   : > { %v2258_v4 = vor.u32 1.1754944e-38, %v2257_v28  ;;  %vm2256_vm9 = vcmp.eq.f32.partialorder %v2255_v18, 8.507059e+37 }
 0x9d4   : > { %v4595_v56 = vpop.eup %4594 }
 0x9d5   : > { %v2247_v47 = vmul.f32 %v4595_v56, %v2242_v46  ;;  %vm2252_vm5 = vweird.f32 %v4595_v56  ;;  %v4597_v30 = vpop.eup %4596 }
 0x9d6   : > { %vm2253_vm7 = vmor %vm2251_vm6, %vm2252_vm5  ;;  %v2243_v17 = vadd.f32 1.0, %v4597_v30 }
 0x9d7   : > { %v2248_v62 = vsub.f32 1.0, %v2247_v47 }
 0x9d8   : > { %4598 = vrcp.f32 %v2243_v17  ;;  %v2272_v21 = vand.u32 2147483648, %v2243_v17  ;;  %vm2266_vm11 = vweird.f32 %v2243_v17  ;;  %v2270_v38 = vand.u32 2147483647, %v2243_v17 }
 0x9d9   : > { %v2249_v14 = vmul.f32 %v4595_v56, %v2248_v62 }
 0x9da   : > { %v2273_v42 = vor.u32 1.1754944e-38, %v2272_v21  ;;  %vm2271_vm14 = vcmp.eq.f32.partialorder %v2270_v38, 8.507059e+37 }
 0x9db   : > { %v2250_v41 = vadd.f32 %v4595_v56, %v2249_v14 }
 0x9dd   : > { %v2254_v36 = vsel %vm2253_vm7, %v4595_v56, %v2250_v41 }
 0x9de   : > { %v5709_v7 = vsel %vm2256_vm9, %v2258_v4, %v2254_v36  ;;  %v4599_v13 = vpop.eup %4598 }
 0x9df   : > { %v2262_v57 = vmul.f32 %v4599_v13, %v2243_v17  ;;  %vm2267_vm10 = vweird.f32 %v4599_v13 }
 0x9e0   : > { %vm2268_vm13 = vmor %vm2266_vm11, %vm2267_vm10 }
 0x9e1   : > { %v2263_v26 = vsub.f32 1.0, %v2262_v57 }
 0x9e3   : > { %v2264_v6 = vmul.f32 %v4599_v13, %v2263_v26 }
 0x9e5   : > { %v2265_v10 = vadd.f32 %v4599_v13, %v2264_v6 }
 0x9e7   : > { %v2269_v50 = vsel %vm2268_vm13, %v4599_v13, %v2265_v10 }
 0x9e8   : > { %v2220_v39 = vpop.f32.mrf.mxu2  ;;  %v5716_v55 = vsel %vm2271_vm14, %v2273_v42, %v2269_v50 }
 0x9e9   : > { %v2308_v3 = vadd.f32 %v2220_v39, %v4977_v1  ;;  %v2228_v45 = vadd.f32 %v2220_v39, %v5713_v44 }
 0x9eb   : > { %2318 = vrot.lane.b32.xlu1 %v2308_v3, %s4760_s17  ;;  %v4343_v19 = vmul.f32 -1.442695, %v2228_v45 }
 0x9f0   : > { %v2223_v61 = vpop.f32.mrf.mxu2 }
 0x9f1   : > { %v2309_v53 = vadd.f32 %v2223_v61, %v4977_v1  ;;  %v2229_v60 = vadd.f32 %v2223_v61, %v5706_v9 }
 0x9f3   : > { %2320 = vrot.lane.b32.xlu2 %v2309_v53, %s4760_s17  ;;  %v4344_v20 = vmul.f32 -1.442695, %v2229_v60 }
 0x9f5   : > { %4600 = vpow2.f32 %v4344_v20 }
 0x9fb   : > { %v4601_v58 = vpop.eup %4600 }
 0x9fc   : > { %v2245_v8 = vadd.f32 1.0, %v4601_v58 }
 0x9fe   : > { %4602 = vrcp.f32 %v2245_v8  ;;  %v2302_v25 = vand.u32 2147483648, %v2245_v8  ;;  %vm2296_vm0 = vweird.f32 %v2245_v8  ;;  %v2300_v34 = vand.u32 2147483647, %v2245_v8 }
 0x9ff   : > { %4604 = vpow2.f32 %v4343_v19  ;;  %v2379_v19 = vmul.f32 %v5716_v55, %v5639_v54 }
 0xa00   : > { %v2303_v35 = vor.u32 1.1754944e-38, %v2302_v25  ;;  %vm2301_vm3 = vcmp.eq.f32.partialorder %v2300_v34, 8.507059e+37 }
 0xa04   : > { %v4603_v22 = vpop.eup %4602 }
 0xa05   : > { %v4605_v27 = vpop.eup %4604  ;;  %v2292_v43 = vmul.f32 %v4603_v22, %v2245_v8  ;;  %vm2297_vm15 = vweird.f32 %v4603_v22 }
 0xa06   : > { %v2244_v11 = vadd.f32 1.0, %v4605_v27  ;;  %vm2298_vm2 = vmor %vm2296_vm0, %vm2297_vm15 }
 0xa07   : > { %v2293_v24 = vsub.f32 1.0, %v2292_v43 }
 0xa08   : > { %4606 = vrcp.f32 %v2244_v11  ;;  %v2287_v47 = vand.u32 2147483648, %v2244_v11  ;;  %vm2281_vm5 = vweird.f32 %v2244_v11  ;;  %v2285_v48 = vand.u32 2147483647, %v2244_v11 }
 0xa09   : > { %v2294_v59 = vmul.f32 %v4603_v22, %v2293_v24 }
 0xa0a   : > { %v2288_v31 = vor.u32 1.1754944e-38, %v2287_v47  ;;  %vm2286_vm7 = vcmp.eq.f32.partialorder %v2285_v48, 8.507059e+37 }
 0xa0b   : > { %v2295_v40 = vadd.f32 %v4603_v22, %v2294_v59 }
 0xa0d   : > { %v2299_v39 = vsel %vm2298_vm2, %v4603_v22, %v2295_v40  ;;  %v329_v22 = vld [vmem:[%s4911_s7 + $0xa0] sm:$0xff] }
 0xa0e   : > { %v4607_v2 = vpop.eup %4606  ;;  %v5720_v29 = vsel %vm2301_vm3, %v2303_v35, %v2299_v39  ;;  %v540_v38 = vmul.f32 %v329_v22, %v329_v22 }
 0xa0f   : > { %v2277_v3 = vmul.f32 %v4607_v2, %v2244_v11  ;;  %vm2282_vm4 = vweird.f32 %v4607_v2 }
 0xa10   : > { %vm2283_vm6 = vmor %vm2281_vm5, %vm2282_vm4  ;;  %v642_v43 = vsel %vm6402_vm1, %v540_v38, 0.0 }
 0xa11   : > { %v2278_v16 = vsub.f32 1.0, %v2277_v3 }
 0xa13   : > { %v2279_v46 = vmul.f32 %v4607_v2, %v2278_v16 }
 0xa15   : > { %v2280_v56 = vadd.f32 %v4607_v2, %v2279_v46 }
 0xa17   : > { %v2284_v62 = vsel %vm2283_vm6, %v4607_v2, %v2280_v56 }
 0xa18   : > { %v5724_v41 = vsel %vm2286_vm7, %v2288_v31, %v2284_v62 }
 0xa19   : > { %v2356_v56 = vsub.f32 1.0, %v5724_v41  ;;  %v2380_v48 = vmul.f32 %v5724_v41, %v5646_v23 }
 0xa1d   : > { %v2315_v49 = vpop.permute.xlu2 %2314 }
 0xa1e   : > { %v2326_v37 = vmul.f32 %v2315_v49, %v5709_v7 }
 0xa20   : > { %2334 = vrot.lane.b32.xlu0 %v2326_v37, %s4758_s6 }
 0xa3d   : > { %v2317_v0 = vpop.permute.xlu0 %2316 }
 0xa3e   : > { %v2327_v52 = vmul.f32 %v2317_v0, %v5716_v55 }
 0xa40   : > { %2336 = vrot.lane.b32.xlu1 %v2327_v52, %s4758_s6 }
 0xa4d   : > { %v2321_v61 = vpop.permute.xlu2 %2320 }
 0xa4e   : > { %v2329_v53 = vmul.f32 %v2321_v61, %v5720_v29 }
 0xa50   : > { %2340 = vrot.lane.b32.xlu0 %v2329_v53, %s4758_s6 }
 0xa5d   : > { %v2319_v14 = vpop.permute.xlu1 %2318 }
 0xa5e   : > { %v2328_v28 = vmul.f32 %v2319_v14, %v5724_v41 }
 0xa60   : > { %2338 = vrot.lane.b32.xlu2 %v2328_v28, %s4758_s6 }
 0xa92   : > { %v2335_v18 = vpop.permute.xlu0 %2334 }
 0xa93   : > { %v2346_v30 = vadd.f32 %v2335_v18, %v5696_v63  ;;  %v2357_v18 = vsub.f32 1.0, %v5720_v29 }
 0xa95   : > { %4608 = vtanh.f32 %v2346_v30 }
 0xa9b   : > { %v4609_v36 = vpop.eup %4608 }
 0xa9c   : > { %2362 = vrot.lane.b32.xlu1 %v4609_v36, %s4761_s20  ;;  %v2381_v36 = vmul.f32 %v5720_v29, %v5653_v5 }
 0xab2   : > { %v2337_v4 = vpop.permute.xlu1 %2336 }
 0xab3   : > { %v2347_v60 = vadd.f32 %v2337_v4, %v5703_v32  ;;  %v2354_v32 = vsub.f32 1.0, %v5709_v7 }
 0xab5   : > { %4610 = vtanh.f32 %v2347_v60 }
 0xaba   : > { %v2339_v17 = vpop.permute.xlu2 %2338 }
 0xabb   : > { %v4611_v49 = vpop.eup %4610  ;;  %v2348_v37 = vadd.f32 %v2339_v17, %v5713_v44  ;;  %v2378_v44 = vmul.f32 %v5709_v7, %v5616_v12  ;;  %v330_v12 = vld [vmem:[%s4911_s7 + $0xa8] sm:$0xff]  ;;  %v450_v7 = vsel %vm6402_vm1, %v329_v22, 0.0  ;;  %s4273_s7 = sshll.u32 %s4263_s12, 1 }
 0xabc   : > { %2364 = vrot.lane.b32.xlu2 %v4611_v49, %s4761_s20  ;;  %v451_v21 = vsel %vm6402_vm1, %v330_v12, 0.0  ;;  %v541_v27 = vmul.f32 %v330_v12, %v330_v12  ;;  %p303_p8 = scmp.lt.s32.totalorder %s4273_s7, 3 }
 0xabd   : > { %4612 = vtanh.f32 %v2348_v37  ;;  %v452_v50 = vadd.f32 %v451_v21, %v450_v7 }
 0xabe   : > { %v643_v42 = vsel %vm6402_vm1, %v541_v27, 0.0  ;;  %s6424_s7 = smov (!%p303_p8, %s4273_s7), 3 }
 0xabf   : > { %v453_v54 = vrot.slane %v452_v50, 4  ;;  %v644_v11 = vadd.f32 %v643_v42, %v642_v43  ;;  %s4397_s15 = sshll.u32 %s6424_s7, 4 }
 0xac1   : > { %v454_v0 = vadd.f32 %v453_v54, %v452_v50 }
 0xac2   : > { %v2341_v20 = vpop.permute.xlu0 %2340 }
 0xac3   : > { %v4613_v13 = vpop.eup %4612  ;;  %v2349_v58 = vadd.f32 %v2341_v20, %v5706_v9  ;;  %v2355_v9 = vsub.f32 1.0, %v5716_v55  ;;  %v645_v55 = vrot.slane %v644_v11, 4  ;;  %v455_v52 = vrot.slane %v454_v0, 2 }
 0xac4   : > { %2366 = vrot.lane.b32.xlu0 %v4613_v13, %s4761_s20 }
 0xac5   : > { %4614 = vtanh.f32 %v2349_v58  ;;  %v646_v24 = vadd.f32 %v645_v55, %v644_v11  ;;  %v456_v59 = vadd.f32 %v455_v52, %v454_v0 }
 0xac7   : > { %v647_v40 = vrot.slane %v646_v24, 2  ;;  %v457_v2 = vrot.slane %v456_v59, 1 }
 0xac9   : > { %v648_v25 = vadd.f32 %v647_v40, %v646_v24  ;;  %v458_v34 = vadd.f32 %v457_v2, %v456_v59 }
 0xacb   : > { %v4615_v63 = vpop.eup %4614  ;;  %v649_v39 = vrot.slane %v648_v25, 1  ;;  %v514_v3 = vmul.f32 0.083333336, %v458_v34  ;;  %v5798_v34 = vld [vmem:[#allocation2 + $0xb0] sm:$0xff] }
 0xacc   : > { %2368 = vrot.lane.b32.xlu1 %v4615_v63, %s4761_s20 }
 0xacd   : > { %v650_v35 = vadd.f32 %v649_v39, %v648_v25  ;;  %v722_v53 = vmul.f32 %v514_v3, %v514_v3  ;;  %v764_v49 = vsub.f32 %v329_v22, %v514_v3  ;;  %v765_v29 = vsub.f32 %v330_v12, %v514_v3 }
 0xacf   : > { %v706_v61 = vmul.f32 0.083333336, %v650_v35 }
 0xad1   : > { %v738_v16 = vsub.f32 %v706_v61, %v722_v53 }
 0xad3   : > { %v786_v46 = vadd.f32 1e-05, %v738_v16 }
 0xad5   : > { %4616 = vrsqrt.f32 %v786_v46  ;;  %vm898_vm9 = vweird.f32 %v786_v46 }
 0xadb   : > { %v4617_v14 = vpop.eup %4616 }
 0xadc   : > { %v893_v28 = vmul.f32 %v4617_v14, %v786_v46  ;;  %vm899_vm10 = vweird.f32 %v4617_v14 }
 0xadd   : > { %vm900_vm11 = vmor %vm898_vm9, %vm899_vm10 }
 0xade   : > { %v894_v30 = vmul.f32 %v4617_v14, %v893_v28 }
 0xae0   : > { %v895_v17 = vmul.f32 0.5, %v894_v30 }
 0xae2   : > { %v896_v41 = vsub.f32 1.5, %v895_v17 }
 0xae4   : > { %v897_v37 = vmul.f32 %v4617_v14, %v896_v41 }
 0xae6   : > { %v901_v20 = vsel %vm900_vm11, %v4617_v14, %v897_v37 }
 0xae7   : > { %v972_v13 = vmul.f32 %v901_v20, %v764_v49  ;;  %v973_v63 = vmul.f32 %v901_v20, %v765_v29  ;;  %v5805_v49 = vld [vmem:[#allocation2 + $0xb8] sm:$0xff] }
 0xae9   : > { %v1020_v58 = vmul.f32 %v5138_v15, %v972_v13 }
 0xaeb   : > { %v1068_v5 = vadd.f32 %v5142_v51, %v1020_v58 }
 0xaed   : > { %4297 = vmatmul.msk.f32.gmra.mxu0 %vm6402_vm1, %v1068_v5 }
 0xb0e   : > { %v2363_v57 = vpop.permute.xlu1 %2362 }
 0xb0f   : > { %v2374_v45 = vmul.f32 %v2363_v57, %v2354_v32  ;;  %v1021_v32 = vmul.f32 %v5138_v15, %v973_v63 }
 0xb11   : > { %v5739_v8 = vadd.f32 %v2378_v44, %v2374_v45  ;;  %v1069_v57 = vadd.f32 %v5142_v51, %v1021_v32 }
 0xb13   : > { %2394 = vrot.lane.b32.xlu2 %v5739_v8, %s4761_s20  ;;  %4298 = vmatmul.msk.f32.gmra.mxu0 %vm6402_vm1, %v1069_v57 }
 0xb16   : > { %v2365_v26 = vpop.permute.xlu2 %2364 }
 0xb17   : > { %v2375_v6 = vmul.f32 %v2365_v26, %v2355_v9 }
 0xb19   : > { %v5746_v10 = vadd.f32 %v2379_v19, %v2375_v6 }
 0xb1b   : > { %2396 = vrot.lane.b32.xlu0 %v5746_v10, %s4761_s20 }
 0xb36   : > { %v2367_v47 = vpop.permute.xlu0 %2366 }
 0xb37   : > { %v2376_v62 = vmul.f32 %v2367_v47, %v2356_v56 }
 0xb39   : > { %v5759_v31 = vadd.f32 %v2380_v48, %v2376_v62 }
 0xb3b   : > { %2398 = vrot.lane.b32.xlu1 %v5759_v31, %s4761_s20 }
 0xb3e   : > { %v2369_v4 = vpop.permute.xlu1 %2368 }
 0xb3f   : > { %v2377_v60 = vmul.f32 %v2369_v4, %v2357_v18 }
 0xb41   : > { %v5766_v23 = vadd.f32 %v2381_v36, %v2377_v60 }
 0xb43   : > { %2400 = vrot.lane.b32.xlu2 %v5766_v23, %s4761_s20 }
 0xb6a   : > { %v1260_v19 = vpop.f32.mrf.mxu0 }
 0xb6b   : > { %v1261_v6 = vadd.f32 %v5682_v33, %v1260_v19 }
 0xb6d   : > { %v2395_v44 = vpop.permute.xlu2 %2394  ;;  %1317 = vst.msk [vmem:[#allocation2 + $0xa0] sm:$0xff] %vm6403_vm8, %v1261_v6 }
 0xb6e   : > { %4345 = vmatmul.msk.f32.vlgmr.msra.gmra.mxu3 %vm1336_vm12, %v2395_v44 }
 0xb74   : > { %v5788_v27 = vld [vmem:[#allocation2 + $0xa0] sm:$0xff] }
 0xb8d   : > { %v2397_v45 = vpop.permute.xlu0 %2396 }
 0xb8e   : > { %4346 = vmatmul.msk.f32.gmra.mxu3 %vm1336_vm12, %v2397_v45 }
 0xb90   : > { %v1263_v15 = vpop.f32.mrf.mxu0 }
 0xb91   : > { %v1264_v51 = vadd.f32 %v5682_v33, %v1263_v15 }
 0xb93   : > { %1318 = vst.msk [vmem:[#allocation2 + $0xa8] sm:$0xff] %vm6403_vm8, %v1264_v51 }
 0xb9a   : > { %v5795_v52 = vld [vmem:[#allocation2 + $0xa8] sm:$0xff] }
 0xb9d   : > { %v2401_v26 = vpop.permute.xlu2 %2400 }
 0xbad   : > { %v2399_v9 = vpop.permute.xlu1 %2398 }
 0xbae   : > { %4347 = vmatmul.msk.f32.gmra.mxu3 %vm1336_vm12, %v2399_v9 }
 0xbb6   : > { %4348 = vmatmul.msk.f32.gmra.mxu3 %vm1336_vm12, %v2401_v26 }
 0xbf1   : > { %v2427_v22 = vpop.f32.mrf.mxu3 }
 0xbf2   : > { %v2519_v12 = vadd.f32 %v2427_v22, %v4977_v1  ;;  %v2439_v33 = vadd.f32 %v2427_v22, %v5788_v27 }
 0xbf4   : > { %2527 = vrot.lane.b32.xlu0 %v2519_v12, %s4760_s17  ;;  %v4349_v43 = vmul.f32 -1.442695, %v2439_v33 }
 0xbf6   : > { %4618 = vpow2.f32 %v4349_v43 }
 0xbfc   : > { %v4619_v11 = vpop.eup %4618 }
 0xbfd   : > { %v2455_v0 = vadd.f32 1.0, %v4619_v11 }
 0xbff   : > { %4620 = vrcp.f32 %v2455_v0  ;;  %v2470_v35 = vand.u32 2147483648, %v2455_v0  ;;  %vm2464_vm14 = vweird.f32 %v2455_v0  ;;  %v2468_v53 = vand.u32 2147483647, %v2455_v0 }
 0xc01   : > { %v2471_v56 = vor.u32 1.1754944e-38, %v2470_v35  ;;  %vm2469_vm0 = vcmp.eq.f32.partialorder %v2468_v53, 8.507059e+37 }
 0xc05   : > { %v4621_v55 = vpop.eup %4620 }
 0xc06   : > { %v2460_v24 = vmul.f32 %v4621_v55, %v2455_v0  ;;  %vm2465_vm13 = vweird.f32 %v4621_v55 }
 0xc07   : > { %vm2466_vm15 = vmor %vm2464_vm14, %vm2465_vm13 }
 0xc08   : > { %v2461_v40 = vsub.f32 1.0, %v2460_v24 }
 0xc0a   : > { %v2462_v25 = vmul.f32 %v4621_v55, %v2461_v40 }
 0xc0c   : > { %v2463_v3 = vadd.f32 %v4621_v55, %v2462_v25 }
 0xc0e   : > { %v2467_v46 = vsel %vm2466_vm15, %v4621_v55, %v2463_v3 }
 0xc0f   : > { %v5801_v62 = vsel %vm2469_vm0, %v2471_v56, %v2467_v46 }
 0xc11   : > { %v2430_v7 = vpop.f32.mrf.mxu3 }
 0xc12   : > { %v2520_v21 = vadd.f32 %v2430_v7, %v4977_v1  ;;  %v2440_v59 = vadd.f32 %v2430_v7, %v5795_v52 }
 0xc14   : > { %2529 = vrot.lane.b32.xlu1 %v2520_v21, %s4760_s17  ;;  %v4350_v2 = vmul.f32 -1.442695, %v2440_v59 }
 0xc16   : > { %4622 = vpow2.f32 %v4350_v2 }
 0xc1c   : > { %v4623_v16 = vpop.eup %4622 }
 0xc1d   : > { %v2456_v47 = vadd.f32 1.0, %v4623_v16 }
 0xc1f   : > { %v2485_v58 = vand.u32 2147483648, %v2456_v47  ;;  %vm2479_vm3 = vweird.f32 %v2456_v47  ;;  %v2483_v29 = vand.u32 2147483647, %v2456_v47 }
 0xc21   : > { %v2486_v57 = vor.u32 1.1754944e-38, %v2485_v58  ;;  %vm2484_vm5 = vcmp.eq.f32.partialorder %v2483_v29, 8.507059e+37 }
 0xc31   : > { %v2433_v38 = vpop.f32.mrf.mxu3 }
 0xc32   : > { %v2521_v50 = vadd.f32 %v2433_v38, %v4977_v1  ;;  %v2441_v39 = vadd.f32 %v2433_v38, %v5798_v34 }
 0xc34   : > { %2531 = vrot.lane.b32.xlu2 %v2521_v50, %s4760_s17  ;;  %v4351_v61 = vmul.f32 -1.442695, %v2441_v39 }
 0xc36   : > { %4624 = vpow2.f32 %v4351_v61 }
 0xc37   : > { %4626 = vrcp.f32 %v2456_v47 }
 0xc39   : > { %v2436_v42 = vpop.f32.mrf.mxu3 }
 0xc3a   : > { %v2522_v54 = vadd.f32 %v2436_v42, %v4977_v1  ;;  %v2442_v37 = vadd.f32 %v2436_v42, %v5805_v49 }
 0xc3c   : > { %2533 = vrot.lane.b32.xlu0 %v2522_v54, %s4760_s17  ;;  %v4625_v28 = vpop.eup %4624  ;;  %v4352_v5 = vmul.f32 -1.442695, %v2442_v37 }
 0xc3d   : > { %v2457_v18 = vadd.f32 1.0, %v4625_v28  ;;  %v4627_v30 = vpop.eup %4626  ;;  %v2591_v28 = vmul.f32 %v5801_v62, %v5739_v8 }
 0xc3e   : > { %v2475_v36 = vmul.f32 %v4627_v30, %v2456_v47  ;;  %vm2480_vm2 = vweird.f32 %v4627_v30 }
 0xc3f   : > { %4628 = vrcp.f32 %v2457_v18  ;;  %vm2481_vm4 = vmor %vm2479_vm3, %vm2480_vm2  ;;  %v2500_v19 = vand.u32 2147483648, %v2457_v18  ;;  %vm2494_vm7 = vweird.f32 %v2457_v18  ;;  %v2498_v6 = vand.u32 2147483647, %v2457_v18 }
 0xc40   : > { %v2476_v4 = vsub.f32 1.0, %v2475_v36  ;;  %4630 = vpow2.f32 %v4352_v5 }
 0xc41   : > { %v2501_v22 = vor.u32 1.1754944e-38, %v2500_v19  ;;  %vm2499_vm10 = vcmp.eq.f32.partialorder %v2498_v6, 8.507059e+37  ;;  %v5856_v19 = vld [vmem:[#allocation2 + $0xc0] sm:$0xff] }
 0xc42   : > { %v2477_v17 = vmul.f32 %v4627_v30, %v2476_v4 }
 0xc44   : > { %v2478_v20 = vadd.f32 %v4627_v30, %v2477_v17 }
 0xc45   : > { %v4629_v60 = vpop.eup %4628 }
 0xc46   : > { %v2490_v41 = vmul.f32 %v4629_v60, %v2457_v18  ;;  %v2482_v63 = vsel %vm2481_vm4, %v4627_v30, %v2478_v20  ;;  %vm2495_vm6 = vweird.f32 %v4629_v60  ;;  %v4631_v15 = vpop.eup %4630 }
 0xc47   : > { %v5808_v45 = vsel %vm2484_vm5, %v2486_v57, %v2482_v63  ;;  %vm2496_vm9 = vmor %vm2494_vm7, %vm2495_vm6  ;;  %v2458_v12 = vadd.f32 1.0, %v4631_v15 }
 0xc48   : > { %v2491_v13 = vsub.f32 1.0, %v2490_v41  ;;  %v2592_v4 = vmul.f32 %v5808_v45, %v5746_v10 }
 0xc49   : > { %4632 = vrcp.f32 %v2458_v12  ;;  %v2515_v11 = vand.u32 2147483648, %v2458_v12  ;;  %vm2509_vm13 = vweird.f32 %v2458_v12  ;;  %v2513_v0 = vand.u32 2147483647, %v2458_v12 }
 0xc4a   : > { %v2492_v32 = vmul.f32 %v4629_v60, %v2491_v13 }
 0xc4b   : > { %v2516_v24 = vor.u32 1.1754944e-38, %v2515_v11  ;;  %vm2514_vm15 = vcmp.eq.f32.partialorder %v2513_v0, 8.507059e+37 }
 0xc4c   : > { %v2493_v26 = vadd.f32 %v4629_v60, %v2492_v32 }
 0xc4e   : > { %v2497_v51 = vsel %vm2496_vm9, %v4629_v60, %v2493_v26 }
 0xc4f   : > { %v2502_v7 = vsel %vm2499_vm10, %v2501_v22, %v2497_v51  ;;  %v4633_v50 = vpop.eup %4632 }
 0xc50   : > { %v2505_v33 = vmul.f32 %v4633_v50, %v2458_v12  ;;  %vm2510_vm11 = vweird.f32 %v4633_v50  ;;  %v2569_v41 = vsub.f32 1.0, %v2502_v7  ;;  %v5860_v12 = vld [vmem:[#allocation2 + $0xc8] sm:$0xff] }
 0xc51   : > { %vm2511_vm14 = vmor %vm2509_vm13, %vm2510_vm11 }
 0xc52   : > { %v2506_v43 = vsub.f32 1.0, %v2505_v33 }
 0xc54   : > { %v2507_v42 = vmul.f32 %v4633_v50, %v2506_v43 }
 0xc56   : > { %v2508_v54 = vadd.f32 %v4633_v50, %v2507_v42 }
 0xc58   : > { %v2512_v55 = vsel %vm2511_vm14, %v4633_v50, %v2508_v54 }
 0xc59   : > { %v2517_v40 = vsel %vm2514_vm15, %v2516_v24, %v2512_v55 }
 0xc5a   : > { %v2570_v20 = vsub.f32 1.0, %v2517_v40  ;;  %v2594_v10 = vmul.f32 %v2517_v40, %v5766_v23 }
 0xc66   : > { %v2528_v48 = vpop.permute.xlu0 %2527 }
 0xc67   : > { %v2539_v14 = vmul.f32 %v2528_v48, %v5801_v62 }
 0xc69   : > { %2547 = vrot.lane.b32.xlu1 %v2539_v14, %s4758_s6 }
 0xc86   : > { %v2530_v44 = vpop.permute.xlu1 %2529 }
 0xc87   : > { %v2540_v9 = vmul.f32 %v2530_v44, %v5808_v45 }
 0xc89   : > { %2549 = vrot.lane.b32.xlu2 %v2540_v9, %s4758_s6 }
 0xc8e   : > { %v2532_v21 = vpop.permute.xlu2 %2531 }
 0xc8f   : > { %v2541_v38 = vmul.f32 %v2532_v21, %v2502_v7 }
 0xc91   : > { %2551 = vrot.lane.b32.xlu0 %v2541_v38, %s4758_s6 }
 0xcae   : > { %v2534_v59 = vpop.permute.xlu0 %2533 }
 0xcaf   : > { %v2542_v2 = vmul.f32 %v2534_v59, %v2517_v40  ;;  %v5864_v59 = vld [vmem:[#allocation2 + $0xd0] sm:$0xff] }
 0xcb1   : > { %2553 = vrot.lane.b32.xlu1 %v2542_v2, %s4758_s6 }
 0xcdb   : > { %v2548_v25 = vpop.permute.xlu1 %2547 }
 0xcdc   : > { %v2559_v39 = vadd.f32 %v2548_v25, %v5788_v27 }
 0xcde   : > { %4634 = vtanh.f32 %v2559_v39 }
 0xce3   : > { %v2550_v3 = vpop.permute.xlu2 %2549 }
 0xce4   : > { %v4635_v35 = vpop.eup %4634  ;;  %v2560_v61 = vadd.f32 %v2550_v3, %v5795_v52  ;;  %v2567_v52 = vsub.f32 1.0, %v5801_v62  ;;  %v2593_v62 = vmul.f32 %v2502_v7, %v5759_v31 }
 0xce5   : > { %2575 = vrot.lane.b32.xlu2 %v4635_v35, %s4761_s20 }
 0xce6   : > { %4636 = vtanh.f32 %v2560_v61 }
 0xcec   : > { %v4637_v53 = vpop.eup %4636 }
 0xced   : > { %2577 = vrot.lane.b32.xlu0 %v4637_v53, %s4761_s20 }
 0xd03   : > { %v2552_v16 = vpop.permute.xlu0 %2551 }
 0xd04   : > { %v2561_v46 = vadd.f32 %v2552_v16, %v5798_v34  ;;  %v2568_v34 = vsub.f32 1.0, %v5808_v45 }
 0xd06   : > { %4638 = vtanh.f32 %v2561_v46 }
 0xd0c   : > { %v4639_v56 = vpop.eup %4638 }
 0xd0d   : > { %2579 = vrot.lane.b32.xlu1 %v4639_v56, %s4761_s20 }
 0xd23   : > { %v2554_v47 = vpop.permute.xlu1 %2553 }
 0xd24   : > { %v2562_v27 = vadd.f32 %v2554_v47, %v5805_v49 }
 0xd26   : > { %4640 = vtanh.f32 %v2562_v27 }
 0xd2c   : > { %v4641_v48 = vpop.eup %4640 }
 0xd2d   : > { %2581 = vrot.lane.b32.xlu2 %v4641_v48, %s4761_s20 }
 0xd3f   : > { %v2576_v14 = vpop.permute.xlu2 %2575 }
 0xd40   : > { %v2587_v18 = vmul.f32 %v2576_v14, %v2567_v52 }
 0xd42   : > { %v5825_v30 = vadd.f32 %v2591_v28, %v2587_v18 }
 0xd44   : > { %2607 = vrot.lane.b32.xlu0 %v5825_v30, %s4761_s20 }
 0xd5f   : > { %v2578_v36 = vpop.permute.xlu0 %2577 }
 0xd60   : > { %v2588_v60 = vmul.f32 %v2578_v36, %v2568_v34 }
 0xd62   : > { %v5832_v17 = vadd.f32 %v2592_v4, %v2588_v60 }
 0xd64   : > { %2609 = vrot.lane.b32.xlu1 %v5832_v17, %s4761_s20 }
 0xd7f   : > { %v2580_v8 = vpop.permute.xlu1 %2579 }
 0xd80   : > { %v2589_v49 = vmul.f32 %v2580_v8, %v2569_v41 }
 0xd82   : > { %v5837_v37 = vadd.f32 %v2593_v62, %v2589_v49  ;;  %v2602_v62 = vld [vmem:[#allocation2 + $0xd8] sm:$0xff] }
 0xd84   : > { %2611 = vrot.lane.b32.xlu2 %v5837_v37, %s4761_s20 }
 0xd87   : > { %v2582_v13 = vpop.permute.xlu2 %2581 }
 0xd88   : > { %v2590_v58 = vmul.f32 %v2582_v13, %v2570_v20 }
 0xd8a   : > { %v5842_v5 = vadd.f32 %v2594_v10, %v2590_v58 }
 0xd8c   : > { %2613 = vrot.lane.b32.xlu0 %v5842_v5, %s4761_s20 }
 0xdb6   : > { %v2608_v29 = vpop.permute.xlu0 %2607 }
 0xdb7   : > { %4353 = vmatmul.msk.f32.vlgmr.msra.gmra.mxu1 %vm1336_vm12, %v2608_v29 }
 0xdd6   : > { %v2610_v31 = vpop.permute.xlu1 %2609 }
 0xdd7   : > { %4354 = vmatmul.msk.f32.gmra.mxu1 %vm1336_vm12, %v2610_v31 }
 0xdde   : > { %v2612_v63 = vpop.permute.xlu2 %2611 }
 0xddf   : > { %4355 = vmatmul.msk.f32.gmra.mxu1 %vm1336_vm12, %v2612_v63 }
 0xdfe   : > { %v2614_v32 = vpop.permute.xlu0 %2613 }
 0xdff   : > { %4356 = vmatmul.msk.f32.gmra.mxu1 %vm1336_vm12, %v2614_v32 }
 0xe34   : > { %v2640_v57 = vpop.f32.mrf.mxu1 }
 0xe35   : > { %v2732_v23 = vadd.f32 %v2640_v57, %v4977_v1  ;;  %v2652_v6 = vadd.f32 %v2640_v57, %v5856_v19 }
 0xe37   : > { %2740 = vrot.lane.b32.xlu1 %v2732_v23, %s4760_s17  ;;  %v4357_v15 = vmul.f32 -1.442695, %v2652_v6 }
 0xe39   : > { %4642 = vpow2.f32 %v4357_v15 }
 0xe3f   : > { %v4643_v38 = vpop.eup %4642 }
 0xe40   : > { %v2668_v50 = vadd.f32 1.0, %v4643_v38 }
 0xe42   : > { %v2683_v39 = vand.u32 2147483648, %v2668_v50  ;;  %vm2677_vm2 = vweird.f32 %v2668_v50  ;;  %v2681_v35 = vand.u32 2147483647, %v2668_v50 }
 0xe44   : > { %v2684_v16 = vor.u32 1.1754944e-38, %v2683_v39  ;;  %vm2682_vm4 = vcmp.eq.f32.partialorder %v2681_v35, 8.507059e+37 }
 0xe54   : > { %v2643_v44 = vpop.f32.mrf.mxu1 }
 0xe55   : > { %v2733_v45 = vadd.f32 %v2643_v44, %v4977_v1  ;;  %v2653_v7 = vadd.f32 %v2643_v44, %v5860_v12 }
 0xe57   : > { %2742 = vrot.lane.b32.xlu2 %v2733_v45, %s4760_s17  ;;  %v4358_v21 = vmul.f32 -1.442695, %v2653_v7 }
 0xe59   : > { %4644 = vpow2.f32 %v4358_v21 }
 0xe5a   : > { %4646 = vrcp.f32 %v2668_v50 }
 0xe5c   : > { %v2646_v9 = vpop.f32.mrf.mxu1 }
 0xe5d   : > { %v2734_v26 = vadd.f32 %v2646_v9, %v4977_v1  ;;  %v2654_v40 = vadd.f32 %v2646_v9, %v5864_v59 }
 0xe5f   : > { %2744 = vrot.lane.b32.xlu0 %v2734_v26, %s4760_s17  ;;  %v4645_v33 = vpop.eup %4644  ;;  %v4359_v3 = vmul.f32 -1.442695, %v2654_v40 }
 0xe60   : > { %v2669_v43 = vadd.f32 1.0, %v4645_v33  ;;  %v4647_v42 = vpop.eup %4646 }
 0xe61   : > { %v2673_v54 = vmul.f32 %v4647_v42, %v2668_v50  ;;  %vm2678_vm0 = vweird.f32 %v4647_v42 }
 0xe62   : > { %4648 = vrcp.f32 %v2669_v43  ;;  %vm2679_vm3 = vmor %vm2677_vm2, %vm2678_vm0  ;;  %v2698_v48 = vand.u32 2147483648, %v2669_v43  ;;  %vm2692_vm6 = vweird.f32 %v2669_v43  ;;  %v2696_v52 = vand.u32 2147483647, %v2669_v43 }
 0xe63   : > { %v2674_v11 = vsub.f32 1.0, %v2673_v54  ;;  %4650 = vpow2.f32 %v4359_v3 }
 0xe64   : > { %v2699_v18 = vor.u32 1.1754944e-38, %v2698_v48  ;;  %vm2697_vm9 = vcmp.eq.f32.partialorder %v2696_v52, 8.507059e+37 }
 0xe65   : > { %v2675_v55 = vmul.f32 %v4647_v42, %v2674_v11 }
 0xe67   : > { %v2676_v2 = vadd.f32 %v4647_v42, %v2675_v55 }
 0xe68   : > { %v4649_v0 = vpop.eup %4648 }
 0xe69   : > { %v2688_v24 = vmul.f32 %v4649_v0, %v2669_v43  ;;  %v2680_v61 = vsel %vm2679_vm3, %v4647_v42, %v2676_v2  ;;  %vm2693_vm5 = vweird.f32 %v4649_v0  ;;  %v4651_v14 = vpop.eup %4650 }
 0xe6a   : > { %v5867_v56 = vsel %vm2682_vm4, %v2684_v16, %v2680_v61  ;;  %vm2694_vm7 = vmor %vm2692_vm6, %vm2693_vm5  ;;  %v2670_v34 = vadd.f32 1.0, %v4651_v14 }
 0xe6b   : > { %v2689_v25 = vsub.f32 1.0, %v2688_v24  ;;  %v2780_v61 = vsub.f32 1.0, %v5867_v56 }
 0xe6c   : > { %4652 = vrcp.f32 %v2670_v34  ;;  %v2713_v29 = vand.u32 2147483648, %v2670_v34  ;;  %vm2707_vm11 = vweird.f32 %v2670_v34  ;;  %v2711_v31 = vand.u32 2147483647, %v2670_v34 }
 0xe6d   : > { %v2690_v53 = vmul.f32 %v4649_v0, %v2689_v25 }
 0xe6e   : > { %v2714_v57 = vor.u32 1.1754944e-38, %v2713_v29  ;;  %vm2712_vm14 = vcmp.eq.f32.partialorder %v2711_v31, 8.507059e+37  ;;  %v5917_v29 = vld [vmem:[#allocation2 + $0xe0] sm:$0xff] }
 0xe6f   : > { %v2691_v27 = vadd.f32 %v4649_v0, %v2690_v53  ;;  %v2804_v53 = vmul.f32 %v5867_v56, %v5825_v30 }
 0xe71   : > { %v2695_v28 = vsel %vm2694_vm7, %v4649_v0, %v2691_v27 }
 0xe72   : > { %v5871_v36 = vsel %vm2697_vm9, %v2699_v18, %v2695_v28  ;;  %v4653_v41 = vpop.eup %4652 }
 0xe73   : > { %v2703_v8 = vmul.f32 %v4653_v41, %v2670_v34  ;;  %vm2708_vm10 = vweird.f32 %v4653_v41  ;;  %v2805_v27 = vmul.f32 %v5871_v36, %v5832_v17 }
 0xe74   : > { %vm2709_vm13 = vmor %vm2707_vm11, %vm2708_vm10 }
 0xe75   : > { %v2704_v20 = vsub.f32 1.0, %v2703_v8 }
 0xe77   : > { %v2705_v10 = vmul.f32 %v4653_v41, %v2704_v20 }
 0xe79   : > { %v2706_v58 = vadd.f32 %v4653_v41, %v2705_v10 }
 0xe7b   : > { %v2710_v32 = vsel %vm2709_vm13, %v4653_v41, %v2706_v58 }
 0xe7c   : > { %v2649_v51 = vpop.f32.mrf.mxu1  ;;  %v2715_v45 = vsel %vm2712_vm14, %v2714_v57, %v2710_v32 }
 0xe7d   : > { %v2735_v22 = vadd.f32 %v2649_v51, %v4977_v1  ;;  %v2655_v49 = vadd.f32 %v2649_v51, %v2602_v62  ;;  %v2782_v14 = vsub.f32 1.0, %v2715_v45 }
 0xe7f   : > { %2746 = vrot.lane.b32.xlu1 %v2735_v22, %s4760_s17  ;;  %v4360_v13 = vmul.f32 -1.442695, %v2655_v49 }
 0xe81   : > { %4654 = vpow2.f32 %v4360_v13 }
 0xe87   : > { %v4655_v63 = vpop.eup %4654 }
 0xe88   : > { %v2671_v23 = vadd.f32 1.0, %v4655_v63 }
 0xe8a   : > { %4656 = vrcp.f32 %v2671_v23  ;;  %v2728_v7 = vand.u32 2147483648, %v2671_v23  ;;  %vm2722_vm0 = vweird.f32 %v2671_v23  ;;  %v2726_v21 = vand.u32 2147483647, %v2671_v23 }
 0xe8c   : > { %v2729_v50 = vor.u32 1.1754944e-38, %v2728_v7  ;;  %vm2727_vm3 = vcmp.eq.f32.partialorder %v2726_v21, 8.507059e+37 }
 0xe90   : > { %v4657_v26 = vpop.eup %4656 }
 0xe91   : > { %v2718_v6 = vmul.f32 %v4657_v26, %v2671_v23  ;;  %vm2723_vm15 = vweird.f32 %v4657_v26 }
 0xe92   : > { %vm2724_vm2 = vmor %vm2722_vm0, %vm2723_vm15 }
 0xe93   : > { %v2719_v15 = vsub.f32 1.0, %v2718_v6 }
 0xe95   : > { %v2720_v51 = vmul.f32 %v4657_v26, %v2719_v15 }
 0xe97   : > { %v2721_v22 = vadd.f32 %v4657_v26, %v2720_v51 }
 0xe99   : > { %v2725_v38 = vsel %vm2724_vm2, %v4657_v26, %v2721_v22  ;;  %v5922_v26 = vld [vmem:[#allocation2 + $0xe8] sm:$0xff] }
 0xe9a   : > { %v2730_v43 = vsel %vm2727_vm3, %v2729_v50, %v2725_v38 }
 0xe9b   : > { %v2783_v34 = vsub.f32 1.0, %v2730_v43  ;;  %v2807_v17 = vmul.f32 %v2730_v43, %v5842_v5 }
 0xea9   : > { %v2741_v46 = vpop.permute.xlu1 %2740 }
 0xeaa   : > { %v2752_v47 = vmul.f32 %v2741_v46, %v5867_v56  ;;  %v2806_v56 = vmul.f32 %v2715_v45, %v5837_v37 }
 0xeac   : > { %2760 = vrot.lane.b32.xlu2 %v2752_v47, %s4758_s6 }
 0xeb1   : > { %v2743_v4 = vpop.permute.xlu2 %2742 }
 0xeb2   : > { %v2753_v60 = vmul.f32 %v2743_v4, %v5871_v36 }
 0xeb4   : > { %2762 = vrot.lane.b32.xlu0 %v2753_v60, %s4758_s6 }
 0xed1   : > { %v2745_v44 = vpop.permute.xlu0 %2744 }
 0xed2   : > { %v2754_v9 = vmul.f32 %v2745_v44, %v2715_v45 }
 0xed4   : > { %2764 = vrot.lane.b32.xlu1 %v2754_v9, %s4758_s6 }
 0xef1   : > { %v2747_v33 = vpop.permute.xlu1 %2746 }
 0xef2   : > { %v2755_v42 = vmul.f32 %v2747_v33, %v2730_v43 }
 0xef4   : > { %2766 = vrot.lane.b32.xlu2 %v2755_v42, %s4758_s6 }
 0xf06   : > { %v2761_v54 = vpop.permute.xlu2 %2760 }
 0xf07   : > { %v2772_v11 = vadd.f32 %v2761_v54, %v5856_v19 }
 0xf09   : > { %4658 = vtanh.f32 %v2772_v11 }
 0xf0f   : > { %v4659_v0 = vpop.eup %4658 }
 0xf10   : > { %2788 = vrot.lane.b32.xlu0 %v4659_v0, %s4761_s20 }
 0xf26   : > { %v2763_v55 = vpop.permute.xlu0 %2762 }
 0xf27   : > { %v2773_v24 = vadd.f32 %v2763_v55, %v5860_v12 }
 0xf29   : > { %4660 = vtanh.f32 %v2773_v24  ;;  %v5930_v24 = vld [vmem:[#allocation2 + $0xf0] sm:$0xff] }
 0xf2f   : > { %v4661_v40 = vpop.eup %4660 }
 0xf30   : > { %2790 = vrot.lane.b32.xlu1 %v4661_v40, %s4761_s20 }
 0xf46   : > { %v2765_v2 = vpop.permute.xlu1 %2764 }
 0xf47   : > { %v2774_v25 = vadd.f32 %v2765_v2, %v5864_v59  ;;  %v2781_v59 = vsub.f32 1.0, %v5871_v36 }
 0xf49   : > { %4662 = vtanh.f32 %v2774_v25 }
 0xf4e   : > { %v2767_v39 = vpop.permute.xlu2 %2766 }
 0xf4f   : > { %v4663_v3 = vpop.eup %4662  ;;  %v2775_v35 = vadd.f32 %v2767_v39, %v2602_v62 }
 0xf50   : > { %2792 = vrot.lane.b32.xlu2 %v4663_v3, %s4761_s20  ;;  %v5933_v3 = vld [vmem:[#allocation2 + $0xf8] sm:$0xff] }
 0xf51   : > { %4664 = vtanh.f32 %v2775_v35 }
 0xf57   : > { %v4665_v19 = vpop.eup %4664 }
 0xf58   : > { %2794 = vrot.lane.b32.xlu0 %v4665_v19, %s4761_s20 }
 0xf82   : > { %v2789_v12 = vpop.permute.xlu0 %2788 }
 0xf83   : > { %v2800_v16 = vmul.f32 %v2789_v12, %v2780_v61 }
 0xf85   : > { %v5887_v46 = vadd.f32 %v2804_v53, %v2800_v16 }
 0xf87   : > { %2820 = vrot.lane.b32.xlu1 %v5887_v46, %s4761_s20 }
 0xfa2   : > { %v2791_v47 = vpop.permute.xlu1 %2790 }
 0xfa3   : > { %v2801_v48 = vmul.f32 %v2791_v47, %v2781_v59 }
 0xfa5   : > { %v5894_v52 = vadd.f32 %v2805_v27, %v2801_v48 }
 0xfa7   : > { %2822 = vrot.lane.b32.xlu2 %v5894_v52, %s4761_s20 }
 0xfaa   : > { %v2793_v30 = vpop.permute.xlu2 %2792 }
 0xfab   : > { %v2802_v28 = vmul.f32 %v2793_v30, %v2782_v14 }
 0xfad   : > { %v5899_v18 = vadd.f32 %v2806_v56, %v2802_v28 }
 0xfaf   : > { %2824 = vrot.lane.b32.xlu0 %v5899_v18, %s4761_s20 }
 0xfca   : > { %v2795_v4 = vpop.permute.xlu0 %2794 }
 0xfcb   : > { %v2803_v36 = vmul.f32 %v2795_v4, %v2783_v34 }
 0xfcd   : > { %v5904_v60 = vadd.f32 %v2807_v17, %v2803_v36 }
 0xfcf   : > { %2826 = vrot.lane.b32.xlu1 %v5904_v60, %s4761_s20 }
 0xff9   : > { %v2821_v41 = vpop.permute.xlu1 %2820 }
 0xffa   : > { %4361 = vmatmul.msk.f32.vlgmr.msrb.gmra.mxu2 %vm1336_vm12, %v2821_v41 }
0x1001   : > { %v2823_v37 = vpop.permute.xlu2 %2822 }
0x1002   : > { %4362 = vmatmul.msk.f32.gmra.mxu2 %vm1336_vm12, %v2823_v37 }
0x1021   : > { %v2825_v8 = vpop.permute.xlu0 %2824 }
0x1022   : > { %4363 = vmatmul.msk.f32.gmra.mxu2 %vm1336_vm12, %v2825_v8 }
0x1041   : > { %v2827_v62 = vpop.permute.xlu1 %2826 }
0x1042   : > { %4364 = vmatmul.msk.f32.gmra.mxu2 %vm1336_vm12, %v2827_v62 }
0x107d   : > { %v2853_v49 = vpop.f32.mrf.mxu2 }
0x107e   : > { %v2945_v5 = vadd.f32 %v2853_v49, %v4977_v1  ;;  %v2865_v31 = vadd.f32 %v2853_v49, %v5917_v29 }
0x1080   : > { %2953 = vrot.lane.b32.xlu2 %v2945_v5, %s4760_s17  ;;  %v4365_v63 = vmul.f32 -1.442695, %v2865_v31 }
0x1082   : > { %4666 = vpow2.f32 %v4365_v63 }
0x1085   : > { %v2856_v20 = vpop.f32.mrf.mxu2 }
0x1086   : > { %v2946_v13 = vadd.f32 %v2856_v20, %v4977_v1  ;;  %v2866_v6 = vadd.f32 %v2856_v20, %v5922_v26 }
0x1088   : > { %2955 = vrot.lane.b32.xlu0 %v2946_v13, %s4760_s17  ;;  %v4667_v32 = vpop.eup %4666  ;;  %v4366_v51 = vmul.f32 -1.442695, %v2866_v6 }
0x1089   : > { %v2881_v57 = vadd.f32 1.0, %v4667_v32 }
0x108b   : > { %4668 = vrcp.f32 %v2881_v57  ;;  %v2896_v21 = vand.u32 2147483648, %v2881_v57  ;;  %vm2890_vm5 = vweird.f32 %v2881_v57  ;;  %v2894_v38 = vand.u32 2147483647, %v2881_v57 }
0x108c   : > { %4670 = vpow2.f32 %v4366_v51 }
0x108d   : > { %vm2895_vm7 = vcmp.eq.f32.partialorder %v2894_v38, 8.507059e+37 }
0x1091   : > { %v4669_v23 = vpop.eup %4668 }
0x1092   : > { %v2886_v9 = vmul.f32 %v4669_v23, %v2881_v57  ;;  %vm2891_vm4 = vweird.f32 %v4669_v23  ;;  %v4671_v50 = vpop.eup %4670 }
0x1093   : > { %vm2892_vm6 = vmor %vm2890_vm5, %vm2891_vm4  ;;  %v2882_v43 = vadd.f32 1.0, %v4671_v50 }
0x1094   : > { %v2887_v15 = vsub.f32 1.0, %v2886_v9 }
0x1095   : > { %4672 = vrcp.f32 %v2882_v43  ;;  %v2911_v61 = vand.u32 2147483648, %v2882_v43  ;;  %vm2905_vm10 = vweird.f32 %v2882_v43  ;;  %v2909_v53 = vand.u32 2147483647, %v2882_v43 }
0x1096   : > { %v2888_v22 = vmul.f32 %v4669_v23, %v2887_v15 }
0x1097   : > { %v2912_v47 = vor.u32 1.1754944e-38, %v2911_v61  ;;  %vm2910_vm13 = vcmp.eq.f32.partialorder %v2909_v53, 8.507059e+37 }
0x1098   : > { %v2889_v7 = vadd.f32 %v4669_v23, %v2888_v22 }
0x109a   : > { %v2893_v33 = vsel %vm2892_vm6, %v4669_v23, %v2889_v7 }
0x109b   : > { %v4673_v0 = vpop.eup %4672 }
0x109c   : > { %v2901_v55 = vmul.f32 %v4673_v0, %v2882_v43  ;;  %vm2906_vm9 = vweird.f32 %v4673_v0 }
0x109d   : > { %vm2907_vm11 = vmor %vm2905_vm10, %vm2906_vm9 }
0x109e   : > { %v2902_v2 = vsub.f32 1.0, %v2901_v55 }
0x10a0   : > { %v2903_v39 = vmul.f32 %v4673_v0, %v2902_v2 }
0x10a2   : > { %v2904_v19 = vadd.f32 %v4673_v0, %v2903_v39 }
0x10a4   : > { %v2908_v59 = vsel %vm2907_vm11, %v4673_v0, %v2904_v19 }
0x10a5   : > { %v2859_v10 = vpop.f32.mrf.mxu2  ;;  %v5936_v14 = vsel %vm2910_vm13, %v2912_v47, %v2908_v59  ;;  %vm3174_vm13 = vcmask 261120  }
0x10a6   : > { %v2947_v58 = vadd.f32 %v2859_v10, %v4977_v1  ;;  %v2867_v40 = vadd.f32 %v2859_v10, %v5930_v24  ;;  %v2994_v2 = vsub.f32 1.0, %v5936_v14  ;;  %v3018_v39 = vmul.f32 %v5936_v14, %v5894_v52  ;;  %v3029_v52 = vld [vmem:[%s6400_s1 + $0x38] sm:$0xff] }
0x10a8   : > { %2957 = vrot.lane.b32.xlu1 %v2947_v58, %s4760_s17  ;;  %v4367_v25 = vmul.f32 -1.442695, %v2867_v40 }
0x10aa   : > { %4674 = vpow2.f32 %v4367_v25 }
0x10b0   : > { %v4675_v16 = vpop.eup %4674 }
0x10b1   : > { %v2883_v27 = vadd.f32 1.0, %v4675_v16 }
0x10b3   : > { %v2926_v49 = vand.u32 2147483648, %v2883_v27  ;;  %vm2920_vm15 = vweird.f32 %v2883_v27  ;;  %v2924_v5 = vand.u32 2147483647, %v2883_v27 }
0x10b5   : > { %v2927_v10 = vor.u32 1.1754944e-38, %v2926_v49  ;;  %vm2925_vm2 = vcmp.eq.f32.partialorder %v2924_v5, 8.507059e+37 }
0x10c5   : > { %v2862_v44 = vpop.f32.mrf.mxu2 }
0x10c6   : > { %v2948_v45 = vadd.f32 %v2862_v44, %v4977_v1  ;;  %v2897_v1 = vor.u32 1.1754944e-38, %v2896_v21  ;;  %v2868_v35 = vadd.f32 %v2862_v44, %v5933_v3 }
0x10c8   : > { %2959 = vrot.lane.b32.xlu2 %v2948_v45, %s4760_s17  ;;  %v5926_v42 = vsel %vm2895_vm7, %v2897_v1, %v2893_v33  ;;  %v4368_v12 = vmul.f32 -1.442695, %v2868_v35  ;;  %s4762_s17 = smov 16  }
0x10c9   : > { %v3017_v55 = vmul.f32 %v5926_v42, %v5887_v46 }
0x10ca   : > { %4676 = vpow2.f32 %v4368_v12 }
0x10cb   : > { %4678 = vrcp.f32 %v2883_v27 }
0x10d0   : > { %v4677_v56 = vpop.eup %4676 }
0x10d1   : > { %v2884_v28 = vadd.f32 1.0, %v4677_v56  ;;  %v4679_v34 = vpop.eup %4678  ;;  %v4458_v56 = vld [vmem:[%s6400_s1 + $0x50] ss:$0 sm:$0xff] }
0x10d2   : > { %v2916_v4 = vmul.f32 %v4679_v34, %v2883_v27  ;;  %vm2921_vm14 = vweird.f32 %v4679_v34 }
0x10d3   : > { %4680 = vrcp.f32 %v2884_v28  ;;  %vm2922_vm0 = vmor %vm2920_vm15, %vm2921_vm14  ;;  %v2941_v57 = vand.u32 2147483648, %v2884_v28  ;;  %vm2935_vm4 = vweird.f32 %v2884_v28  ;;  %v2939_v23 = vand.u32 2147483647, %v2884_v28 }
0x10d4   : > { %v2917_v17 = vsub.f32 1.0, %v2916_v4 }
0x10d5   : > { %v2942_v45 = vor.u32 1.1754944e-38, %v2941_v57  ;;  %vm2940_vm6 = vcmp.eq.f32.partialorder %v2939_v23, 8.507059e+37 }
0x10d6   : > { %v2918_v41 = vmul.f32 %v4679_v34, %v2917_v17  ;;  %v4459_v17 = vld [vmem:[%s6400_s1 + $0x48] ss:$0 sm:$0xff] }
0x10d8   : > { %v2919_v8 = vadd.f32 %v4679_v34, %v2918_v41 }
0x10d9   : > { %v4681_v36 = vpop.eup %4680 }
0x10da   : > { %v2954_v54 = vpop.permute.xlu2 %2953  ;;  %v2931_v37 = vmul.f32 %v4681_v36, %v2884_v28  ;;  %v2923_v20 = vsel %vm2922_vm0, %v4679_v34, %v2919_v8  ;;  %vm2936_vm3 = vweird.f32 %v4681_v36 }
0x10db   : > { %v2965_v11 = vmul.f32 %v2954_v54, %v5926_v42  ;;  %v2928_v31 = vsel %vm2925_vm2, %v2927_v10, %v2923_v20  ;;  %vm2937_vm5 = vmor %vm2935_vm4, %vm2936_vm3 }
0x10dc   : > { %v2932_v62 = vsub.f32 1.0, %v2931_v37  ;;  %v2995_v19 = vsub.f32 1.0, %v2928_v31  ;;  %v3019_v12 = vmul.f32 %v2928_v31, %v5899_v18 }
0x10dd   : > { %2973 = vrot.lane.b32.xlu0 %v2965_v11, %s4758_s6 }
0x10de   : > { %v2933_v13 = vmul.f32 %v4681_v36, %v2932_v62 }
0x10e0   : > { %v2934_v32 = vadd.f32 %v4681_v36, %v2933_v13 }
0x10e2   : > { %v2938_v44 = vsel %vm2937_vm5, %v4681_v36, %v2934_v32 }
0x10e3   : > { %v2943_v9 = vsel %vm2940_vm6, %v2942_v45, %v2938_v44 }
0x10e4   : > { %v2996_v16 = vsub.f32 1.0, %v2943_v9  ;;  %v3020_v47 = vmul.f32 %v2943_v9, %v5904_v60 }
0x10fa   : > { %v2956_v48 = vpop.permute.xlu0 %2955 }
0x10fb   : > { %v2966_v30 = vmul.f32 %v2956_v48, %v5936_v14 }
0x10fd   : > { %2975 = vrot.lane.b32.xlu1 %v2966_v30, %s4758_s6 }
0x111a   : > { %v2958_v58 = vpop.permute.xlu1 %2957 }
0x111b   : > { %v2967_v63 = vmul.f32 %v2958_v58, %v2928_v31 }
0x111d   : > { %2977 = vrot.lane.b32.xlu2 %v2967_v63, %s4758_s6 }
0x1122   : > { %v2960_v6 = vpop.permute.xlu2 %2959 }
0x1123   : > { %v2968_v15 = vmul.f32 %v2960_v6, %v2943_v9 }
0x1125   : > { %2979 = vrot.lane.b32.xlu0 %v2968_v15, %s4758_s6 }
0x114f   : > { %v2974_v51 = vpop.permute.xlu0 %2973 }
0x1150   : > { %v2985_v22 = vadd.f32 %v2974_v51, %v5917_v29 }
0x1152   : > { %4682 = vtanh.f32 %v2985_v22 }
0x1158   : > { %v4683_v7 = vpop.eup %4682 }
0x1159   : > { %3001 = vrot.lane.b32.xlu1 %v4683_v7, %s4761_s20 }
0x116f   : > { %v2976_v21 = vpop.permute.xlu1 %2975 }
0x1170   : > { %v2986_v38 = vadd.f32 %v2976_v21, %v5922_v26  ;;  %v2993_v26 = vsub.f32 1.0, %v5926_v42  ;;  %v3030_v42 = vld [vmem:[%s6400_s1 + $0x40] sm:$0xff] }
0x1171   : > { %3068 = vmatpush.msrb.mxu3 %v3030_v42 }
0x1172   : > { %4684 = vtanh.f32 %v2986_v38  ;;  %v3026_v38 = vld [vmem:[%s6400_s1 + $0x68] sm:$0xff] }
0x1173   : > { %3069 = vmatpush.msrb.mxu3 %v3029_v52  ;;  %vm3167_vm7 = vcmp.gt.f32.partialorder %v3026_v38, 0.0 }
0x1177   : > { %v2978_v50 = vpop.permute.xlu2 %2977 }
0x1178   : > { %v4685_v33 = vpop.eup %4684  ;;  %v2987_v1 = vadd.f32 %v2978_v50, %v5930_v24  ;;  %v3025_v50 = vld [vmem:[%s6400_s1 + $0x60] sm:$0xff] }
0x1179   : > { %3003 = vrot.lane.b32.xlu2 %v4685_v33, %s4761_s20  ;;  %vm3166_vm9 = vcmp.gt.f32.partialorder %v3025_v50, 0.0 }
0x117a   : > { %4686 = vtanh.f32 %v2987_v1 }
0x1180   : > { %v4687_v43 = vpop.eup %4686 }
0x1181   : > { %3005 = vrot.lane.b32.xlu0 %v4687_v43, %s4761_s20 }
0x1197   : > { %v2980_v54 = vpop.permute.xlu0 %2979 }
0x1198   : > { %v2988_v29 = vadd.f32 %v2980_v54, %v5933_v3 }
0x119a   : > { %4688 = vtanh.f32 %v2988_v29 }
0x11a0   : > { %v4689_v11 = vpop.eup %4688 }
0x11a1   : > { %3007 = vrot.lane.b32.xlu1 %v4689_v11, %s4761_s20 }
0x11cb   : > { %v3002_v0 = vpop.permute.xlu1 %3001 }
0x11cc   : > { %v3013_v24 = vmul.f32 %v3002_v0, %v2993_v26 }
0x11ce   : > { %v3021_v40 = vadd.f32 %v3017_v55, %v3013_v24 }
0x11d0   : > { %3038 = vrot.lane.b32.xlu2 %v3021_v40, %s4761_s20  ;;  %v3028_v40 = vld [vmem:[%s6400_s1 + $0x78] sm:$0xff] }
0x11d1   : > { %vm3169_vm0 = vcmp.gt.f32.partialorder %v3028_v40, 0.0 }
0x11d3   : > { %v3004_v25 = vpop.permute.xlu2 %3003 }
0x11d4   : > { %v3014_v3 = vmul.f32 %v3004_v25, %v2994_v2  ;;  %v3027_v25 = vld [vmem:[%s6400_s1 + $0x70] sm:$0xff] }
0x11d5   : > { %vm3168_vm2 = vcmp.gt.f32.partialorder %v3027_v25, 0.0 }
0x11d6   : > { %v3022_v35 = vadd.f32 %v3018_v39, %v3014_v3 }
0x11d8   : > { %3040 = vrot.lane.b32.xlu0 %v3022_v35, %s4761_s20 }
0x11f3   : > { %v3006_v61 = vpop.permute.xlu0 %3005 }
0x11f4   : > { %v3015_v53 = vmul.f32 %v3006_v61, %v2995_v19 }
0x11f6   : > { %v3023_v46 = vadd.f32 %v3019_v12, %v3015_v53 }
0x11f8   : > { %3042 = vrot.lane.b32.xlu1 %v3023_v46, %s4761_s20 }
0x1213   : > { %v3008_v59 = vpop.permute.xlu1 %3007 }
0x1214   : > { %v3016_v27 = vmul.f32 %v3008_v59, %v2996_v16  ;;  %v3315_v59 = vlaneseq }
0x1216   : > { %v3024_v18 = vadd.f32 %v3020_v47, %v3016_v27  ;;  %v6014_v47 = vshrl.u32 %v3315_v59, 7 }
0x1218   : > { %3044 = vrot.lane.b32.xlu2 %v3024_v18, %s4761_s20  ;;  %v6017_v27 = vadd.s32 8, %v6014_v47 }
0x1219   : > { %4435 = vset.pattern.permute.xlu2 %v6014_v47 }
0x121a   : > { %4436 = vset.pattern.permute.xlu1 %v6017_v27 }
0x122a   : > { %v5968_v48 = vpop.permute.xlu2 %3038 }
0x122b   : > { %4369 = vmatmul.msk.f32.vlgmr.msrb.gmra.mxu3 %vm1336_vm12, %v5968_v48 }
0x124a   : > { %v5972_v14 = vpop.permute.xlu0 %3040 }
0x124b   : > { %4370 = vmatmul.msk.f32.gmra.mxu3 %vm1336_vm12, %v5972_v14 }
0x126a   : > { %v5976_v30 = vpop.permute.xlu1 %3042 }
0x126b   : > { %4371 = vmatmul.msk.f32.gmra.mxu3 %vm1336_vm12, %v5976_v30 }
0x1272   : > { %v5980_v60 = vpop.permute.xlu2 %3044 }
0x1273   : > { %4372 = vmatmul.msk.f32.gmra.mxu3 %vm1336_vm12, %v5980_v60 }
0x12ae   : > { %v3071_v28 = vpop.f32.mrf.mxu3 }
0x12af   : > { %v3101_v34 = vmul.f32 %v4458_v56, %v3071_v28  ;;  %v3084_v36 = vmul.f32 %v4459_v17, %v3071_v28 }
0x12b1   : > { %v3105_v4 = vsel %vm1336_vm12, %v3101_v34, 0.0  ;;  %v3088_v41 = vsel %vm1336_vm12, %v3084_v36, 0.0 }
0x12b2   : > { %3106 = vadd.xlane.f32.xlu0 %v3105_v4 }
0x12ba   : > { %3089 = vadd.xlane.f32.xlu0 %v3088_v41 }
0x12ce   : > { %v3074_v37 = vpop.f32.mrf.mxu3 }
0x12cf   : > { %v3102_v8 = vmul.f32 %v4458_v56, %v3074_v37  ;;  %v3085_v49 = vmul.f32 %v4459_v17, %v3074_v37 }
0x12d1   : > { %v3108_v62 = vsel %vm1336_vm12, %v3102_v8, 0.0  ;;  %v3091_v5 = vsel %vm1336_vm12, %v3085_v49, 0.0 }
0x12d2   : > { %3109 = vadd.xlane.f32.xlu1 %v3108_v62 }
0x12da   : > { %3092 = vadd.xlane.f32.xlu1 %v3091_v5 }
0x12ee   : > { %v3077_v20 = vpop.f32.mrf.mxu3 }
0x12ef   : > { %v3103_v13 = vmul.f32 %v4458_v56, %v3077_v20  ;;  %v3086_v23 = vmul.f32 %v4459_v17, %v3077_v20 }
0x12f1   : > { %v3111_v10 = vsel %vm1336_vm12, %v3103_v13, 0.0  ;;  %v3094_v44 = vsel %vm1336_vm12, %v3086_v23, 0.0 }
0x12f2   : > { %3112 = vadd.xlane.f32.xlu2 %v3111_v10 }
0x12f6   : > { %v3080_v58 = vpop.f32.mrf.mxu3 }
0x12f7   : > { %3296 = vmatpush.msrb.mxu1 %v3080_v58  ;;  %v3104_v31 = vmul.f32 %v4458_v56, %v3080_v58  ;;  %v3087_v63 = vmul.f32 %v4459_v17, %v3080_v58 }
0x12f9   : > { %3297 = vmatpush.msrb.mxu1 %v3077_v20  ;;  %v3114_v32 = vsel %vm1336_vm12, %v3104_v31, 0.0  ;;  %v3097_v57 = vsel %vm1336_vm12, %v3087_v63, 0.0 }
0x12fa   : > { %3115 = vadd.xlane.f32.xlu2 %v3114_v32  ;;  %3098 = vadd.xlane.f32.xlu1 %v3097_v57  ;;  %v6041_v57 = vld [vmem:[%s6400_s1 + $0x80] sm:$0x3f] }
0x12fb   : > { %3298 = vmatpush.msrb.mxu1 %v3074_v37  ;;  %v3339_v23 = vperm.slane %v6041_v57, 1 }
0x12fd   : > { %3299 = vmatpush.msrb.mxu1 %v3071_v28 }
0x1302   : > { %3095 = vadd.xlane.f32.xlu2 %v3094_v44  ;;  %v3314_v44 = vperm.slane %v6041_v57, 0 }
0x1325   : > { %v3107_v45 = vpop.xlane.xlu0 %3106 }
0x1326   : > { %3117 = vxpose.xlu0.b32.start [1/4] (short) (narrow) %v3107_v45, 8  ;;  %v6047_v45 = vperm.slane %v6041_v57, 2 }
0x132d   : > { %v3090_v51 = vpop.xlane.xlu0 %3089 }
0x1345   : > { %v3110_v9 = vpop.xlane.xlu1 %3109 }
0x1346   : > { %3118 = vxpose.xlu0.b32.cont [2/4] (short) (narrow) %v3110_v9, 8  ;;  %v6052_v9 = vadd.s32 16, %v6014_v47 }
0x134d   : > { %v3093_v22 = vpop.xlane.xlu1 %3092 }
0x1365   : > { %v3113_v6 = vpop.xlane.xlu2 %3112 }
0x1366   : > { %3119 = vxpose.xlu0.b32.cont [3/4] (short) (narrow) %v3113_v6, 8  ;;  %v6059_v6 = vperm.slane %v6041_v57, 3 }
0x136d   : > { %v3116_v15 = vpop.xlane.xlu2 %3115  ;;  %v3099_v33 = vpop.xlane.xlu1 %3098 }
0x136e   : > { %3120 = vxpose.xlu0.b32.end [4/4] (short) (narrow) %v3116_v15, 8  ;;  %v6068_v15 = vperm.slane %v6041_v57, 4 }
0x1375   : > { %v3096_v1 = vpop.xlane.xlu2 %3095 }
0x13d5   : > { %4437 = vset.pattern.permute.xlu0 %v6017_v27 }
0x13dd   : > { %3350 = vperm.xlu0 %4437, %v3339_v23  }
0x13fa   : > { %v3133_v7 = vpop.trf.xlu0 }
0x13fb   : > { %v3149_v21 = vperm.slane %v3133_v7, 0 }
0x13fd   : > { %v3151_v43 = vadd.f32 %v3149_v21, %v3093_v22  ;;  %v3150_v54 = vadd.f32 %v3149_v21, %v3090_v51  ;;  %v3153_v29 = vadd.f32 %v3149_v21, %v3099_v33  ;;  %v3152_v11 = vadd.f32 %v3149_v21, %v3096_v1 }
0x13fe   : > { %v6073_v51 = vadd.s32 24, %v6014_v47 }
0x13ff   : > { %vm3155_vm10 = vcmp.gt.f32.partialorder %v3151_v43, 0.0  ;;  %v3159_v26 = vmul.f32 0.2, %v3151_v43  ;;  %vm3154_vm11 = vcmp.gt.f32.partialorder %v3150_v54, 0.0  ;;  %v3158_v0 = vmul.f32 0.2, %v3150_v54 }
0x1400   : > { %v3161_v2 = vmul.f32 0.2, %v3153_v29  ;;  %v3160_v39 = vmul.f32 0.2, %v3152_v11  ;;  %vm3157_vm14 = vcmp.gt.f32.partialorder %v3153_v29, 0.0  ;;  %vm3156_vm15 = vcmp.gt.f32.partialorder %v3152_v11, 0.0 }
0x1401   : > { %v3163_v55 = vsel %vm3155_vm10, %v3151_v43, %v3159_v26  ;;  %v3162_v24 = vsel %vm3154_vm11, %v3150_v54, %v3158_v0 }
0x1402   : > { %v3171_v3 = vsel %vm3167_vm7, %v3163_v55, -1e+30  ;;  %v3170_v35 = vsel %vm3166_vm9, %v3162_v24, -1e+30  ;;  %v3165_v12 = vsel %vm3157_vm14, %v3153_v29, %v3161_v2  ;;  %v3164_v53 = vsel %vm3156_vm15, %v3152_v11, %v3160_v39 }
0x1403   : > { %v3178_v19 = vsel %vm3174_vm13, %v3171_v3, -inf  ;;  %v3175_v61 = vsel %vm3174_vm13, %v3170_v35, -inf  ;;  %v3173_v46 = vsel %vm3169_vm0, %v3165_v12, -1e+30  ;;  %v3172_v42 = vsel %vm3168_vm2, %v3164_v53, -1e+30 }
0x1404   : > { %3179 = vmax.xlane.f32.xlu1 %v3178_v19  ;;  %3176 = vmax.xlane.f32.xlu2 %v3175_v61  ;;  %v3184_v52 = vsel %vm3174_vm13, %v3173_v46, -inf  ;;  %v3181_v16 = vsel %vm3174_vm13, %v3172_v42, -inf }
0x140c   : > { %3185 = vmax.xlane.f32.xlu1 %v3184_v52  ;;  %3182 = vmax.xlane.f32.xlu2 %v3181_v16 }
0x1477   : > { %v3180_v18 = vpop.xlane.xlu1 %3179  ;;  %v3177_v56 = vpop.xlane.xlu2 %3176 }
0x1478   : > { %v3188_v28 = vsub.f32 %v3171_v3, %v3180_v18  ;;  %v3187_v34 = vsub.f32 %v3170_v35, %v3177_v56 }
0x147a   : > { %v3193_v4 = vmul.f32 1.442695, %v3188_v28  ;;  %v3191_v17 = vmul.f32 1.442695, %v3187_v34 }
0x147c   : > { %4690 = vpow2.f32 %v3193_v4  ;;  %v3439_v4 = vperm.slane %v6041_v57, 5 }
0x147d   : > { %4692 = vpow2.f32 %v3191_v17 }
0x147f   : > { %v3186_v36 = vpop.xlane.xlu1 %3185  ;;  %v3183_v41 = vpop.xlane.xlu2 %3182 }
0x1480   : > { %v3190_v37 = vsub.f32 %v3173_v46, %v3186_v36  ;;  %v3189_v8 = vsub.f32 %v3172_v42, %v3183_v41 }
0x1482   : > { %v6022_v62 = vpop.eup %4690  ;;  %v3197_v49 = vmul.f32 1.442695, %v3190_v37  ;;  %v3195_v5 = vmul.f32 1.442695, %v3189_v8 }
0x1483   : > { %v6024_v20 = vpop.eup %4692  ;;  %v3202_v13 = vsel %vm3174_vm13, %v6022_v62, 0.0 }
0x1484   : > { %4694 = vpow2.f32 %v3197_v49  ;;  %3203 = vadd.xlane.f32.xlu1 %v3202_v13  ;;  %v3199_v10 = vsel %vm3174_vm13, %v6024_v20, 0.0 }
0x1485   : > { %4696 = vpow2.f32 %v3195_v5  ;;  %3200 = vadd.xlane.f32.xlu2 %v3199_v10 }
0x148a   : > { %v6030_v58 = vpop.eup %4694 }
0x148b   : > { %v6032_v31 = vpop.eup %4696  ;;  %v3208_v63 = vsel %vm3174_vm13, %v6030_v58, 0.0 }
0x148c   : > { %3209 = vadd.xlane.f32.xlu1 %v3208_v63  ;;  %v3205_v32 = vsel %vm3174_vm13, %v6032_v31, 0.0 }
0x148d   : > { %3206 = vadd.xlane.f32.xlu2 %v3205_v32 }
0x14a5   : > { %3325 = vperm.xlu1 %4436, %v3314_v44   ;;  %3319 = vperm.xlu2 %4435, %v3314_v44  }
0x14ad   : > { %4438 = vset.pattern.permute.xlu1 %v6014_v47  ;;  %3344 = vperm.xlu2 %4435, %v3339_v23  }
0x14b5   : > { %3369 = vperm.xlu1 %4438, %v6047_v45   ;;  %4439 = vset.pattern.permute.xlu2 %v6017_v27 }
0x14bd   : > { %4440 = vset.pattern.permute.xlu1 %v6052_v9  ;;  %3375 = vperm.xlu2 %4439, %v6047_v45  }
0x14c5   : > { %3331 = vperm.xlu1 %4440, %v3314_v44   ;;  %4441 = vset.pattern.permute.xlu2 %v6052_v9 }
0x14cd   : > { %4442 = vset.pattern.permute.xlu1 %v6014_v47  ;;  %3356 = vperm.xlu2 %4441, %v3339_v23  }
0x14d5   : > { %3394 = vperm.xlu1 %4442, %v6059_v6   ;;  %4443 = vset.pattern.permute.xlu2 %v6017_v27 }
0x14dd   : > { %4444 = vset.pattern.permute.xlu1 %v6052_v9  ;;  %3400 = vperm.xlu2 %4443, %v6059_v6  }
0x14e5   : > { %3381 = vperm.xlu1 %4444, %v6047_v45   ;;  %4445 = vset.pattern.permute.xlu2 %v6014_v47 }
0x14ed   : > { %4446 = vset.pattern.permute.xlu1 %v6017_v27  ;;  %3419 = vperm.xlu2 %4445, %v6068_v15  }
0x14f5   : > { %3425 = vperm.xlu1 %4446, %v6068_v15   ;;  %4447 = vset.pattern.permute.xlu2 %v6073_v51 }
0x14f7   : > { %v3204_v22 = vpop.xlane.xlu1 %3203 }
0x14f8   : > { %4698 = vrcp.f32 %v3204_v22  ;;  %v3201_v7 = vpop.xlane.xlu2 %3200  ;;  %v3237_v19 = vand.u32 2147483648, %v3204_v22  ;;  %vm3231_vm9 = vweird.f32 %v3204_v22  ;;  %v3235_v46 = vand.u32 2147483647, %v3204_v22 }
0x14f9   : > { %4700 = vrcp.f32 %v3201_v7  ;;  %v3220_v11 = vand.u32 2147483647, %v3201_v7  ;;  %v3222_v26 = vand.u32 2147483648, %v3201_v7  ;;  %vm3216_vm4 = vweird.f32 %v3201_v7 }
0x14fa   : > { %v3238_v59 = vor.u32 1.1754944e-38, %v3237_v19  ;;  %vm3236_vm11 = vcmp.eq.f32.partialorder %v3235_v46, 8.507059e+37 }
0x14fb   : > { %vm3221_vm6 = vcmp.eq.f32.partialorder %v3220_v11, 8.507059e+37  ;;  %v3223_v2 = vor.u32 1.1754944e-38, %v3222_v26 }
0x14fd   : > { %4448 = vset.pattern.permute.xlu1 %v6073_v51  ;;  %3337 = vperm.xlu2 %4447, %v3314_v44  }
0x14fe   : > { %v4699_v21 = vpop.eup %4698 }
0x14ff   : > { %v4701_v38 = vpop.eup %4700  ;;  %v3227_v50 = vmul.f32 %v4699_v21, %v3204_v22  ;;  %v6078_v1 = vpop.xlane.xlu1 %3209  ;;  %vm3232_vm7 = vweird.f32 %v4699_v21 }
0x1500   : > { %v3212_v33 = vmul.f32 %v4701_v38, %v3201_v7  ;;  %v3207_v43 = vpop.xlane.xlu2 %3206  ;;  %vm3217_vm3 = vweird.f32 %v4701_v38  ;;  %vm3233_vm10 = vmor %vm3231_vm9, %vm3232_vm7  ;;  %v3267_v5 = vand.u32 2147483648, %v6078_v1 }
0x1501   : > { %v3228_v54 = vsub.f32 1.0, %v3227_v50  ;;  %4702 = vrcp.f32 %v3207_v43  ;;  %vm3218_vm5 = vmor %vm3216_vm4, %vm3217_vm3  ;;  %v3252_v34 = vand.u32 2147483648, %v3207_v43  ;;  %vm3246_vm15 = vweird.f32 %v3207_v43 }
0x1502   : > { %v3213_v29 = vsub.f32 1.0, %v3212_v33  ;;  %4704 = vrcp.f32 %v6078_v1  ;;  %v3250_v36 = vand.u32 2147483647, %v3207_v43  ;;  %vm3261_vm4 = vweird.f32 %v6078_v1 }
0x1503   : > { %v3229_v0 = vmul.f32 %v4699_v21, %v3228_v54  ;;  %v3268_v10 = vor.u32 1.1754944e-38, %v3267_v5 }
0x1504   : > { %v3214_v55 = vmul.f32 %v4701_v38, %v3213_v29  ;;  %vm3251_vm2 = vcmp.eq.f32.partialorder %v3250_v36, 8.507059e+37 }
0x1505   : > { %3362 = vperm.xlu1 %4448, %v3339_v23   ;;  %4449 = vset.pattern.permute.xlu2 %v6052_v9  ;;  %v3230_v3 = vadd.f32 %v4699_v21, %v3229_v0 }
0x1506   : > { %v3215_v24 = vadd.f32 %v4701_v38, %v3214_v55 }
0x1507   : > { %v4703_v40 = vpop.eup %4702  ;;  %v3234_v16 = vsel %vm3233_vm10, %v4699_v21, %v3230_v3 }
0x1508   : > { %v3219_v25 = vsel %vm3218_vm5, %v4701_v38, %v3215_v24  ;;  %v3242_v39 = vmul.f32 %v4703_v40, %v3207_v43  ;;  %v4705_v35 = vpop.eup %4704  ;;  %v3239_v18 = vsel %vm3236_vm11, %v3238_v59, %v3234_v16  ;;  %vm3247_vm14 = vweird.f32 %v4703_v40  ;;  %v6120_v43 = vld [vmem:[%s6400_s1 + $0x58] ss:$0 sm:$0xff]  ;;  %v3640_v24 = vld [vmem:[%s6400_s1 + $0xb0] sm:$0xff] }
0x1509   : > { %v3224_v61 = vsel %vm3221_vm6, %v3223_v2, %v3219_v25  ;;  %v3257_v42 = vmul.f32 %v4705_v35, %v6078_v1  ;;  %v3240_v17 = vmul.f32 %v6022_v62, %v3239_v18  ;;  %vm3248_vm0 = vmor %vm3246_vm15, %vm3247_vm14  ;;  %vm3262_vm3 = vweird.f32 %v4705_v35  ;;  %v3351_v2 = vpop.permute.xlu0 %3350  ;;  %3676 = vmatpush.msra.mxu2 %v3640_v24 }
0x150a   : > { %v3243_v12 = vsub.f32 1.0, %v3242_v39  ;;  %v3225_v53 = vmul.f32 %v6024_v20, %v3224_v61  ;;  %v3265_v20 = vand.u32 2147483647, %v6078_v1  ;;  %vm3263_vm5 = vmor %vm3261_vm4, %vm3262_vm3 }
0x150b   : > { %v3258_v56 = vsub.f32 1.0, %v3257_v42  ;;  %v3639_v42 = vld [vmem:[%s6400_s1 + $0xa8] sm:$0xff] }
0x150c   : > { %v3244_v52 = vmul.f32 %v4703_v40, %v3243_v12  ;;  %4373 = vmatmul.msk.f32.vlgmr.msrb.gmra.mxu1 %vm3174_vm13, %v3225_v53  ;;  %vm3266_vm6 = vcmp.eq.f32.partialorder %v3265_v20, 8.507059e+37  ;;  %3677 = vmatpush.msra.mxu2 %v3639_v42 }
0x150d   : > { %4450 = vset.pattern.permute.xlu1 %v6014_v47  ;;  %3406 = vperm.xlu2 %4449, %v6059_v6   ;;  %v3259_v41 = vmul.f32 %v4705_v35, %v3258_v56  ;;  %v3253_v47 = vor.u32 1.1754944e-38, %v3252_v34 }
0x150e   : > { %v3245_v28 = vadd.f32 %v4703_v40, %v3244_v52 }
0x150f   : > { %v3260_v49 = vadd.f32 %v4705_v35, %v3259_v41 }
0x1510   : > { %v3249_v37 = vsel %vm3248_vm0, %v4703_v40, %v3245_v28  ;;  %vm3469_vm0 = vcmp.gt.f32.partialorder %v3351_v2, 0.0 }
0x1511   : > { %v3254_v8 = vsel %vm3251_vm2, %v3253_v47, %v3249_v37  ;;  %v3264_v13 = vsel %vm3263_vm5, %v4705_v35, %v3260_v49 }
0x1512   : > { %v3255_v62 = vmul.f32 %v6032_v31, %v3254_v8  ;;  %v3320_v31 = vpop.permute.xlu2 %3319 }
0x1513   : > { %vm3464_vm7 = vcmp.gt.f32.partialorder %v3320_v31, 0.0 }
0x1514   : > { %4374 = vmatmul.msk.f32.gmra.mxu1 %vm3174_vm13, %v3240_v17 }
0x1515   : > { %3444 = vperm.xlu1 %4450, %v3439_v4   ;;  %4451 = vset.pattern.permute.xlu2 %v6017_v27  ;;  %v3269_v27 = vsel %vm3266_vm6, %v3268_v10, %v3264_v13 }
0x1516   : > { %v3270_v63 = vmul.f32 %v6030_v58, %v3269_v27 }
0x1517   : > { %v3326_v58 = vpop.permute.xlu1 %3325 }
0x1518   : > { %vm3465_vm10 = vcmp.gt.f32.partialorder %v3326_v58, 0.0 }
0x151a   : > { %v3345_v32 = vpop.permute.xlu2 %3344 }
0x151b   : > { %vm3468_vm14 = vcmp.gt.f32.partialorder %v3345_v32, 0.0 }
0x151c   : > { %4375 = vmatmul.msk.f32.gmra.mxu1 %vm3174_vm13, %v3255_v62 }
0x151d   : > { %4452 = vset.pattern.permute.xlu1 %v6073_v51  ;;  %3450 = vperm.xlu2 %4451, %v3439_v4  }
0x1522   : > { %v3376_v57 = vpop.permute.xlu2 %3375 }
0x1523   : > { %vm3473_vm11 = vcmp.gt.f32.partialorder %v3376_v57, 0.0 }
0x1524   : > { %4376 = vmatmul.msk.f32.gmra.mxu1 %vm3174_vm13, %v3270_v63 }
0x1525   : > { %3387 = vperm.xlu1 %4452, %v6047_v45   ;;  %4453 = vset.pattern.permute.xlu2 %v6052_v9 }
0x1527   : > { %v3370_v44 = vpop.permute.xlu1 %3369 }
0x1528   : > { %vm3472_vm9 = vcmp.gt.f32.partialorder %v3370_v44, 0.0 }
0x152a   : > { %v6105_v23 = vpop.permute.xlu2 %3356 }
0x152b   : > { %vm3470_vm15 = vcmp.gt.f32.partialorder %v6105_v23, 0.0 }
0x152d   : > { %3412 = vperm.xlu1 %4452, %v6059_v6   ;;  %3431 = vperm.xlu2 %4453, %v6068_v15  }
0x1535   : > { %3437 = vperm.xlu1 %4452, %v6068_v15   ;;  %3456 = vperm.xlu2 %4453, %v3439_v4  }
0x1537   : > { %v3401_v45 = vpop.permute.xlu2 %3400  ;;  %v6107_v22 = vpop.permute.xlu1 %3331 }
0x1538   : > { %vm3466_vm2 = vcmp.gt.f32.partialorder %v6107_v22, 0.0  ;;  %vm3477_vm3 = vcmp.gt.f32.partialorder %v3401_v45, 0.0 }
0x153d   : > { %4454 = vset.pattern.permute.xlu2 %v6073_v51 }
0x1545   : > { %3462 = vperm.xlu2 %4454, %v3439_v4  }
0x1547   : > { %v3420_v9 = vpop.permute.xlu2 %3419  ;;  %v3395_v6 = vpop.permute.xlu1 %3394 }
0x1548   : > { %vm3476_vm4 = vcmp.gt.f32.partialorder %v3395_v6, 0.0  ;;  %vm3480_vm5 = vcmp.gt.f32.partialorder %v3420_v9, 0.0 }
0x1557   : > { %v6109_v7 = vpop.permute.xlu2 %3337  ;;  %v6111_v21 = vpop.permute.xlu1 %3381 }
0x1558   : > { %vm3474_vm6 = vcmp.gt.f32.partialorder %v6111_v21, 0.0  ;;  %vm3467_vm1 = vcmp.gt.f32.partialorder %v6109_v7, 0.0 }
0x1567   : > { %v6113_v15 = vpop.permute.xlu2 %3406  ;;  %v3426_v38 = vpop.permute.xlu1 %3425 }
0x1577   : > { %v3451_v50 = vpop.permute.xlu2 %3450  ;;  %v6115_v33 = vpop.permute.xlu1 %3362 }
0x1578   : > { %vm3471_vm8 = vcmp.gt.f32.partialorder %v6115_v33, 0.0 }
0x1587   : > { %v6122_v54 = vpop.permute.xlu2 %3431  ;;  %v3445_v11 = vpop.permute.xlu1 %3444 }
0x1589   : > { %v3301_v1 = vpop.f32.mrf.mxu1 }
0x158a   : > { %v6125_v29 = vadd.f32 %v6120_v43, %v3301_v1 }
0x158c   : > { %v3536_v0 = vsel %vm3464_vm7, %v6125_v29, -1e+30  ;;  %v3544_v40 = vsel %vm3472_vm9, %v6125_v29, -1e+30  ;;  %vm3481_vm7 = vcmp.gt.f32.partialorder %v3426_v38, 0.0  ;;  %vm3478_vm9 = vcmp.gt.f32.partialorder %v6113_v15, 0.0 }
0x158d   : > { %v3560_v3 = vsel %vm1336_vm12, %v3536_v0, -inf  ;;  %v6144_v61 = vsel %vm1336_vm12, %v3544_v40, -inf  ;;  %v3548_v16 = vsel %vm3476_vm4, %v6125_v29, -1e+30  ;;  %v3540_v56 = vsel %vm3468_vm14, %v6125_v29, -1e+30 }
0x158e   : > { %v3552_v36 = vsel %vm3480_vm5, %v6125_v29, -1e+30  ;;  %vm3482_vm14 = vcmp.gt.f32.partialorder %v6122_v54, 0.0  ;;  %v3573_v49 = vsel %vm1336_vm12, %v3540_v56, -inf  ;;  %v3599_v27 = vsel %vm1336_vm12, %v3548_v16, -inf }
0x158f   : > { %v3457_v53 = vpop.permute.xlu2 %3456  ;;  %v3612_v13 = vsel %vm1336_vm12, %v3552_v36, -inf  ;;  %vm3652_vm4 = vcmask 1042434   ;;  %vm3654_vm5 = vcmask 1043459  }
0x1591   : > { %v3304_v26 = vpop.f32.mrf.mxu1 }
0x1592   : > { %v6129_v55 = vadd.f32 %v6120_v43, %v3304_v26 }
0x1594   : > { %v3537_v25 = vsel %vm3465_vm10, %v6129_v55, -1e+30  ;;  %v3545_v39 = vsel %vm3473_vm11, %v6129_v55, -1e+30  ;;  %vm3485_vm10 = vcmp.gt.f32.partialorder %v3451_v50, 0.0  ;;  %vm3484_vm11 = vcmp.gt.f32.partialorder %v3445_v11, 0.0 }
0x1595   : > { %v3561_v35 = vsel %vm1336_vm12, %v3537_v25, -inf  ;;  %v6140_v19 = vsel %vm1336_vm12, %v3545_v39, -inf  ;;  %v3541_v59 = vsel %vm3469_vm0, %v6129_v55, -1e+30  ;;  %v3556_v34 = vsel %vm3484_vm11, %v6125_v29, -1e+30 }
0x1596   : > { %v3562_v12 = vmax.f32 %v3560_v3, %v3561_v35  ;;  %v3588_v52 = vmax.f32 %v6144_v61, %v6140_v19  ;;  %v3557_v4 = vsel %vm3485_vm10, %v6129_v55, -1e+30  ;;  %v3549_v17 = vsel %vm3477_vm3, %v6129_v55, -1e+30 }
0x1597   : > { %v6147_v46 = vpop.permute.xlu1 %3387  ;;  %v3553_v41 = vsel %vm3481_vm7, %v6129_v55, -1e+30  ;;  %v3574_v37 = vsel %vm1336_vm12, %v3541_v59, -inf  ;;  %vm3486_vm0 = vcmp.gt.f32.partialorder %v3457_v53, 0.0  ;;  %v3625_v5 = vsel %vm1336_vm12, %v3556_v34, -inf }
0x1598   : > { %v3626_v62 = vsel %vm1336_vm12, %v3557_v4, -inf  ;;  %v3613_v10 = vsel %vm1336_vm12, %v3553_v41, -inf  ;;  %v3575_v63 = vmax.f32 %v3573_v49, %v3574_v37  ;;  %v3600_v23 = vsel %vm1336_vm12, %v3549_v17, -inf }
0x1599   : > { %v3307_v18 = vpop.f32.mrf.mxu1  ;;  %v3627_v45 = vmax.f32 %v3625_v5, %v3626_v62  ;;  %v3614_v50 = vmax.f32 %v3612_v13, %v3613_v10  ;;  %v3601_v26 = vmax.f32 %v3599_v27, %v3600_v23  ;;  %vm3658_vm7 = vcmask 1045509  }
0x159a   : > { %v6162_v28 = vadd.f32 %v6120_v43, %v3307_v18  ;;  %vm3684_vm10 = vcmask 128000  }
0x159c   : > { %v3538_v47 = vsel %vm3466_vm2, %v6162_v28, -1e+30  ;;  %v3542_v8 = vsel %vm3470_vm15, %v6162_v28, -1e+30  ;;  %v3558_v20 = vsel %vm3486_vm0, %v6162_v28, -1e+30 }
0x159d   : > { %v3563_v31 = vsel %vm1336_vm12, %v3538_v47, -inf  ;;  %v3576_v32 = vsel %vm1336_vm12, %v3542_v8, -inf  ;;  %v3546_v44 = vsel %vm3474_vm6, %v6162_v28, -1e+30  ;;  %v3554_v22 = vsel %vm3482_vm14, %v6162_v28, -1e+30 }
0x159e   : > { %v3550_v9 = vsel %vm3478_vm9, %v6162_v28, -1e+30  ;;  %vm3475_vm15 = vcmp.gt.f32.partialorder %v6147_v46, 0.0  ;;  %v3628_v38 = vsel %vm1336_vm12, %v3558_v20, -inf  ;;  %v3564_v1 = vmax.f32 %v3562_v12, %v3563_v31 }
0x159f   : > { %v3413_v57 = vpop.permute.xlu1 %3412  ;;  %v3463_v58 = vpop.permute.xlu2 %3462  ;;  %v3577_v11 = vmax.f32 %v3575_v63, %v3576_v32  ;;  %v3615_v54 = vsel %vm1336_vm12, %v3554_v22, -inf  ;;  %v3589_v0 = vsel %vm1336_vm12, %v3546_v44, -inf  ;;  %v3602_v15 = vsel %vm1336_vm12, %v3550_v9, -inf }
0x15a0   : > { %vm3487_vm2 = vcmp.gt.f32.partialorder %v3463_v58, 0.0  ;;  %vm3479_vm3 = vcmp.gt.f32.partialorder %v3413_v57, 0.0  ;;  %v3629_v2 = vmax.f32 %v3627_v45, %v3628_v38  ;;  %v3590_v16 = vmax.f32 %v3588_v52, %v3589_v0 }
0x15a1   : > { %v3310_v6 = vpop.f32.mrf.mxu1  ;;  %v3603_v18 = vmax.f32 %v3601_v26, %v3602_v15  ;;  %v3616_v36 = vmax.f32 %v3614_v50, %v3615_v54  ;;  %vm3656_vm6 = vcmask 1044484   ;;  %vm3762_vm9 = vcmask 1045504  }
0x15a2   : > { %v6204_v21 = vadd.f32 %v6120_v43, %v3310_v6  ;;  %vm3732_vm0 = vcmask 46080  }
0x15a4   : > { %v3539_v24 = vsel %vm3467_vm1, %v6204_v21, -1e+30  ;;  %v3543_v40 = vsel %vm3471_vm8, %v6204_v21, -1e+30  ;;  %v3559_v43 = vsel %vm3487_vm2, %v6204_v21, -1e+30 }
0x15a5   : > { %v3565_v25 = vsel %vm1336_vm12, %v3539_v24, -inf  ;;  %v3578_v39 = vsel %vm1336_vm12, %v3543_v40, -inf  ;;  %v3630_v3 = vsel %vm1336_vm12, %v3559_v43, -inf  ;;  %v3547_v35 = vsel %vm3475_vm15, %v6204_v21, -1e+30 }
0x15a6   : > { %v3631_v12 = vmax.f32 %v3629_v2, %v3630_v3  ;;  %v3551_v7 = vsel %vm3479_vm3, %v6204_v21, -1e+30  ;;  %v3566_v53 = vmax.f32 %v3564_v1, %v3565_v25  ;;  %v3579_v42 = vmax.f32 %v3577_v11, %v3578_v39 }
0x15a7   : > { %v3438_v33 = vpop.permute.xlu1 %3437  ;;  %v3591_v59 = vsel %vm1336_vm12, %v3547_v35, -inf  ;;  %v3604_v56 = vsel %vm1336_vm12, %v3551_v7, -inf  ;;  %vm3650_vm8 = vcmask 1041409   ;;  %v4461_v7 = vld [vmem:[%s6400_s1 + $0xb8] ss:$0 sm:$0xff] }
0x15a8   : > { %v3632_v34 = vrot.slane %v3631_v12, 4  ;;  %vm3483_vm1 = vcmp.gt.f32.partialorder %v3438_v33, 0.0  ;;  %v3567_v4 = vrot.slane %v3566_v53, 4  ;;  %v3580_v46 = vrot.slane %v3579_v42, 4 }
0x15a9   : > { %v3555_v17 = vsel %vm3483_vm1, %v6204_v21, -1e+30  ;;  %v3592_v41 = vmax.f32 %v3590_v16, %v3591_v59  ;;  %v3605_v37 = vmax.f32 %v3603_v18, %v3604_v56 }
0x15aa   : > { %v3633_v47 = vmax.f32 %v3631_v12, %v3632_v34  ;;  %v3617_v8 = vsel %vm1336_vm12, %v3555_v17, -inf  ;;  %v3568_v49 = vmax.f32 %v3566_v53, %v3567_v4  ;;  %v3581_v19 = vmax.f32 %v3579_v42, %v3580_v46  ;;  %v4462_v53 = vld [vmem:[%s6400_s1 + $0xc0] ss:$0 sm:$0xff]  ;;  %v3638_v17 = vld [vmem:[%s6400_s1 + $0xd0] sm:$0x3f] }
0x15ab   : > { %v3618_v61 = vmax.f32 %v3616_v36, %v3617_v8  ;;  %v3593_v52 = vrot.slane %v3592_v41, 4  ;;  %v3606_v5 = vrot.slane %v3605_v37, 4  ;;  %vm3730_vm14 = vcmp.gt.f32.partialorder %v3638_v17, 0.0 }
0x15ac   : > { %v3634_v62 = vrot.slane %v3633_v47, 2  ;;  %v3569_v20 = vrot.slane %v3568_v49, 2  ;;  %v3582_v13 = vrot.slane %v3581_v19, 2 }
0x15ad   : > { %v3619_v10 = vrot.slane %v3618_v61, 4  ;;  %v3594_v27 = vmax.f32 %v3592_v41, %v3593_v52  ;;  %v3607_v63 = vmax.f32 %v3605_v37, %v3606_v5 }
0x15ae   : > { %v3570_v31 = vmax.f32 %v3568_v49, %v3569_v20  ;;  %v3583_v32 = vmax.f32 %v3581_v19, %v3582_v13  ;;  %v3635_v44 = vmax.f32 %v3633_v47, %v3634_v62 }
0x15af   : > { %v3620_v57 = vmax.f32 %v3618_v61, %v3619_v10  ;;  %v3595_v58 = vrot.slane %v3594_v27, 2  ;;  %v3608_v23 = vrot.slane %v3607_v63, 2 }
0x15b0   : > { %v3571_v45 = vrot.slane %v3570_v31, 1  ;;  %v3584_v22 = vrot.slane %v3583_v32, 1  ;;  %v3636_v0 = vrot.slane %v3635_v44, 1 }
0x15b1   : > { %v3621_v9 = vrot.slane %v3620_v57, 2  ;;  %v3596_v6 = vmax.f32 %v3594_v27, %v3595_v58  ;;  %v3609_v38 = vmax.f32 %v3607_v63, %v3608_v23 }
0x15b2   : > { %v3572_v50 = vmax.f32 %v3570_v31, %v3571_v45  ;;  %v3585_v1 = vmax.f32 %v3583_v32, %v3584_v22  ;;  %v3637_v39 = vmax.f32 %v3635_v44, %v3636_v0  ;;  %v3786_v22 = vld [vmem:[%s6400_s1 + $0x88] sm:$0xff] }
0x15b3   : > { %v3622_v11 = vmax.f32 %v3620_v57, %v3621_v9  ;;  %v3597_v26 = vrot.slane %v3596_v6, 1  ;;  %v3610_v54 = vrot.slane %v3609_v38, 1  ;;  %v3787_v9 = vld [vmem:[%s6400_s1 + $0x90] sm:$0xff] }
0x15b4   : > { %v3651_v15 = vsel %vm3650_vm8, %v3585_v1, %v3572_v50  ;;  %vm3758_vm8 = vcmask 48128   ;;  %v3883_v50 = vld [vmem:[%s6400_s1 + $0x100] sm:$0xff]  ;;  %v3882_v1 = vld [vmem:[%s6400_s1 + $0xf8] sm:$0xff] }
0x15b5   : > { %v3623_v24 = vrot.slane %v3622_v11, 1  ;;  %v3598_v40 = vmax.f32 %v3596_v6, %v3597_v26  ;;  %v3611_v2 = vmax.f32 %v3609_v38, %v3610_v54  ;;  %v3788_v6 = vld [vmem:[%s6400_s1 + $0x98] sm:$0xff]  ;;  %v3789_v38 = vld [vmem:[%s6400_s1 + $0xa0] sm:$0xff]  ;;  %3908 = vmatpush.msra.mxu3 %v3883_v50 }
0x15b7   : > { %v3624_v43 = vmax.f32 %v3622_v11, %v3623_v24  ;;  %v3653_v25 = vsel %vm3652_vm4, %v3598_v40, %v3651_v15  ;;  %v3881_v11 = vld [vmem:[%s6400_s1 + $0xf0] sm:$0xff]  ;;  %3909 = vmatpush.msra.mxu3 %v3882_v1  ;;  %v3880_v24 = vld [vmem:[%s6400_s1 + $0xe8] sm:$0xff]  ;;  %v3879_v40 = vld [vmem:[%s6400_s1 + $0xe0] sm:$0xff]  ;;  %vm6404_vm4 = vcmask 392192  }
0x15b8   : > { %v3655_v3 = vsel %vm3654_vm5, %v3611_v2, %v3653_v25  ;;  %vm6405_vm5 = vmmov %vm6404_vm4 }
0x15b9   : > { %v3657_v35 = vsel %vm3656_vm6, %v3624_v43, %v3655_v3  ;;  %3910 = vmatpush.msra.mxu3 %v3881_v11  ;;  %vm6406_vm6 = vmmov %vm6404_vm4 }
0x15ba   : > { %v3659_v12 = vsel %vm3658_vm7, %v3637_v39, %v3657_v35  ;;  %vm6407_vm7 = vmmov %vm6404_vm4 }
0x15bb   : > { %4377 = vmatmul.msk.f32.vlgmr.msra.gmra.mxu2 %vm1336_vm12, %v3659_v12  ;;  %3911 = vmatpush.msra.mxu3 %v3880_v24 }
0x15bd   : > { %3912 = vmatpush.msra.mxu3 %v3879_v40 }
0x163e   : > { %v3679_v42 = vpop.f32.mrf.mxu2 }
0x163f   : > { %v3683_v33 = vmul.f32 %v4461_v7, %v3679_v42  ;;  %v3689_v16 = vmul.f32 %v4462_v53, %v3679_v42  ;;  %4378 = vmatpush.msk.msra.mxu1 %vm3762_vm9, %v3679_v42 }
0x1641   : > { %v3690_v59 = vsel %vm3684_vm10, %v3689_v16, 0.0  ;;  %v3685_v18 = vsel %vm3684_vm10, %v3683_v33, 0.0 }
0x1642   : > { %3691 = vadd.xlane.f32.xlu1 %v3690_v59  ;;  %3686 = vadd.xlane.f32.xlu2 %v3685_v18  ;;  %v3932_v59 = vld [vmem:[%s6400_s1 + $0x118] sm:$0xff]  ;;  %v4464_v18 = vld [vmem:[%s6400_s1 + $0x108] ss:$0 sm:$0xff] }
0x1643   : > { %3961 = vmatpush.msrb.mxu1 %v3932_v59 }
0x16b5   : > { %v3692_v56 = vpop.xlane.xlu1 %3691  ;;  %v3687_v46 = vpop.xlane.xlu2 %3686 }
0x16b6   : > { %3693 = vxpose.xlu0.b32.start.end [1/1] (short) (narrow) %v3692_v56, 8 }
0x171d   : > { %4455 = vset.pattern.permute.xlu0 %v6073_v51 }
0x175a   : > { %v3709_v34 = vpop.trf.xlu0 }
0x175b   : > { %v3725_v4 = vperm.slane %v3709_v34, 0 }
0x175d   : > { %v3726_v36 = vadd.f32 %v3725_v4, %v3687_v46 }
0x175f   : > { %v3728_v41 = vmul.f32 0.2, %v3726_v36  ;;  %vm3727_vm11 = vcmp.gt.f32.partialorder %v3726_v36, 0.0 }
0x1761   : > { %v3729_v37 = vsel %vm3727_vm11, %v3726_v36, %v3728_v41 }
0x1762   : > { %v3731_v47 = vsel %vm3730_vm14, %v3729_v37, -1e+30 }
0x1763   : > { %v3733_v8 = vsel %vm3732_vm0, %v3731_v47, -inf }
0x1764   : > { %3734 = vmax.xlane.f32.xlu1 %v3733_v8 }
0x17d7   : > { %v3735_v49 = vpop.xlane.xlu1 %3734 }
0x17d8   : > { %v3736_v19 = vsub.f32 %v3731_v47, %v3735_v49 }
0x17da   : > { %v3737_v61 = vmul.f32 1.442695, %v3736_v19  ;;  %v4465_v19 = vld [vmem:[%s6400_s1 + $0x120] ss:$0 sm:$0xff] }
0x17dc   : > { %4706 = vpow2.f32 %v3737_v61 }
0x17e2   : > { %v4707_v51 = vpop.eup %4706 }
0x17e3   : > { %v3739_v52 = vsel %vm3732_vm0, %v4707_v51, 0.0 }
0x17e4   : > { %3740 = vadd.xlane.f32.xlu2 %v3739_v52 }
0x17fc   : > { %3858 = vrot.lane.b32.xlu2 %v6125_v29, %s4758_s6  ;;  %v4463_v29 = vld [vmem:[%s6400_s1 + $0xc8] ss:$0 sm:$0xff] }
0x1857   : > { %v3741_v5 = vpop.xlane.xlu2 %3740 }
0x1858   : > { %4708 = vrcp.f32 %v3741_v5  ;;  %v3753_v10 = vand.u32 2147483648, %v3741_v5  ;;  %v3751_v63 = vand.u32 2147483647, %v3741_v5  ;;  %vm3747_vm2 = vweird.f32 %v3741_v5 }
0x185a   : > { %v3754_v32 = vor.u32 1.1754944e-38, %v3753_v10  ;;  %vm3752_vm1 = vcmp.eq.f32.partialorder %v3751_v63, 8.507059e+37 }
0x185e   : > { %v4709_v62 = vpop.eup %4708 }
0x185f   : > { %v3743_v20 = vmul.f32 %v4709_v62, %v3741_v5  ;;  %vm3748_vm15 = vweird.f32 %v4709_v62  ;;  %v3859_v2 = vpop.permute.xlu2 %3858 }
0x1860   : > { %vm3749_vm3 = vmor %vm3747_vm2, %vm3748_vm15 }
0x1861   : > { %v3744_v13 = vsub.f32 1.0, %v3743_v20 }
0x1863   : > { %v3745_v27 = vmul.f32 %v4709_v62, %v3744_v13 }
0x1865   : > { %v3746_v31 = vadd.f32 %v4709_v62, %v3745_v27 }
0x1867   : > { %v3750_v57 = vsel %vm3749_vm3, %v4709_v62, %v3746_v31 }
0x1868   : > { %v3755_v58 = vsel %vm3752_vm1, %v3754_v32, %v3750_v57 }
0x1869   : > { %v3756_v23 = vmul.f32 %v4707_v51, %v3755_v58 }
0x186b   : > { %4379 = vmatmul.msk.f32.vlgmr.msra.gmra.mxu1 %vm3758_vm8, %v3756_v23 }
0x18e8   : > { %v3783_v44 = vpop.f32.mrf.mxu1 }
0x18e9   : > { %v3784_v45 = vadd.f32 %v4463_v29, %v3783_v44 }
0x18eb   : > { %4380 = vmatpush.msk.msrb.mxu2 %vm3762_vm9, %v3784_v45 }
0x18ec   : > { %4381 = vmatmul.msk.f32.vlgmr.msrb.gmra.mxu2 %vm3758_vm8, %v3786_v22 }
0x18f4   : > { %4382 = vmatmul.msk.f32.gmra.mxu2 %vm3758_vm8, %v3787_v9 }
0x18fc   : > { %4383 = vmatmul.msk.f32.gmra.mxu2 %vm3758_vm8, %v3788_v6 }
0x1904   : > { %4384 = vmatmul.msk.f32.gmra.mxu2 %vm3758_vm8, %v3789_v38 }
0x196f   : > { %v3822_v26 = vpop.f32.mrf.mxu2 }
0x1970   : > { %3842 = vrot.lane.b32.xlu1 %v3822_v26, %s4762_s17 }
0x1977   : > { %v3825_v54 = vpop.f32.mrf.mxu2 }
0x1978   : > { %3860 = vrot.lane.b32.xlu1 %v6129_v55, %s4758_s6  ;;  %3844 = vrot.lane.b32.xlu0 %v3825_v54, %s4762_s17  ;;  %v3878_v55 = vld [vmem:[%s6400_s1 + $0xd8] sm:$0xff] }
0x1979   : > { %3913 = vmatpush.msra.mxu3 %v3878_v55 }
0x197f   : > { %v3828_v0 = vpop.f32.mrf.mxu2 }
0x1980   : > { %3862 = vrot.lane.b32.xlu1 %v6162_v28, %s4758_s6  ;;  %3846 = vrot.lane.b32.xlu2 %v3828_v0, %s4762_s17 }
0x1987   : > { %v3831_v15 = vpop.f32.mrf.mxu2 }
0x1988   : > { %3864 = vrot.lane.b32.xlu1 %v6204_v21, %s4758_s6  ;;  %3848 = vrot.lane.b32.xlu2 %v3831_v15, %s4762_s17  ;;  %s307_s17 = scalar_lea.vmem %s6401_s2, %s4397_s15 }
0x19da   : > { %v3847_v12 = vpop.permute.xlu2 %3846 }
0x19db   : > { %v3872_v7 = vsel %vm1336_vm12, %v5976_v30, %v3847_v12  ;;  %v3931_v30 = vld [vmem:[%s6400_s1 + $0x110] sm:$0xff] }
0x19dc   : > { %3962 = vmatpush.msrb.mxu1 %v3931_v30 }
0x19e2   : > { %v3843_v28 = vpop.permute.xlu1 %3842  ;;  %v3849_v42 = vpop.permute.xlu2 %3848 }
0x19e3   : > { %v3870_v21 = vsel %vm1336_vm12, %v5968_v48, %v3843_v28  ;;  %v3873_v33 = vsel %vm1336_vm12, %v5980_v60, %v3849_v42 }
0x19e4   : > { %v3874_v43 = vsel %vm3174_vm13, %v3870_v21, %v3859_v2 }
0x19e5   : > { %4385 = vmatmul.msk.f32.vlgmr.msra.gmra.mxu3 %vm6404_vm4, %v3874_v43 }
0x19ea   : > { %v3861_v25 = vpop.permute.xlu1 %3860  ;;  %v3845_v39 = vpop.permute.xlu0 %3844 }
0x19eb   : > { %v3871_v3 = vsel %vm1336_vm12, %v5972_v14, %v3845_v39 }
0x19ec   : > { %v3875_v35 = vsel %vm3174_vm13, %v3871_v3, %v3861_v25 }
0x19ed   : > { %4386 = vmatmul.msk.f32.gmra.mxu3 %vm6405_vm5, %v3875_v35 }
0x19f2   : > { %v3863_v53 = vpop.permute.xlu1 %3862 }
0x19f3   : > { %v3876_v48 = vsel %vm3174_vm13, %v3872_v7, %v3863_v53 }
0x19f5   : > { %4387 = vmatmul.msk.f32.gmra.mxu3 %vm6406_vm6, %v3876_v48 }
0x19fa   : > { %v3865_v16 = vpop.permute.xlu1 %3864 }
0x19fb   : > { %v3877_v14 = vsel %vm3174_vm13, %v3873_v33, %v3865_v16  ;;  %vm6408_vm13 = vcmask 31744  }
0x19fc   : > { %vm6409_vm9 = vmmov %vm6408_vm13 }
0x19fd   : > { %4388 = vmatmul.msk.f32.gmra.mxu3 %vm6407_vm7, %v3877_v14  ;;  %vm6410_vm10 = vmmov %vm6409_vm9 }
0x19fe   : > { %vm6412_vm11 = vmmov %vm6409_vm9 }
0x19ff   : > { %vm6413_vm14 = vmmov %vm6409_vm9 }
0x1a00   : > { %vm6414_vm0 = vmmov %vm6409_vm9 }
0x1a01   : > { %vm6415_vm15 = vmmov %vm6414_vm0 }
0x1a68   : > { %v3915_v60 = vpop.f32.mrf.mxu3 }
0x1a69   : > { %v3916_v56 = vadd.f32 %v4464_v18, %v3915_v60 }
0x1a6b   : > { %v3927_v34 = vmax.f32 %v3916_v56, 0.0 }
0x1a6d   : > { %4389 = vmatmul.msk.f32.vlgmr.msrb.gmra.mxu1 %vm1336_vm12, %v3927_v34 }
0x1a70   : > { %v3918_v4 = vpop.f32.mrf.mxu3 }
0x1a71   : > { %v3919_v46 = vadd.f32 %v4464_v18, %v3918_v4 }
0x1a73   : > { %v3928_v17 = vmax.f32 %v3919_v46, 0.0 }
0x1a75   : > { %4390 = vmatmul.msk.f32.gmra.mxu1 %vm1336_vm12, %v3928_v17 }
0x1a78   : > { %v3921_v36 = vpop.f32.mrf.mxu3 }
0x1a79   : > { %v3922_v41 = vadd.f32 %v4464_v18, %v3921_v36 }
0x1a7b   : > { %v3929_v37 = vmax.f32 %v3922_v41, 0.0 }
0x1a7d   : > { %4391 = vmatmul.msk.f32.gmra.mxu1 %vm1336_vm12, %v3929_v37 }
0x1a80   : > { %v3924_v47 = vpop.f32.mrf.mxu3 }
0x1a81   : > { %v3925_v8 = vadd.f32 %v4464_v18, %v3924_v47 }
0x1a83   : > { %v3930_v49 = vmax.f32 %v3925_v8, 0.0 }
0x1a85   : > { %4392 = vmatmul.msk.f32.gmra.mxu1 %vm1336_vm12, %v3930_v49  ;;  %vm6411_vm12 = vmmov %vm6409_vm9 }
0x1aea   : > { %v3964_v61 = vpop.f32.mrf.mxu1 }
0x1aeb   : > { %v3965_v51 = vadd.f32 %v4465_v19, %v3964_v61 }
0x1aed   : > { %v3976_v52 = vsel %vm6408_vm13, %v3965_v51, -inf }
0x1aee   : > { %3977 = vmax.xlane.f32.xlu2 %v3976_v52 }
0x1af2   : > { %v3967_v5 = vpop.f32.mrf.mxu1 }
0x1af3   : > { %v3968_v62 = vadd.f32 %v4465_v19, %v3967_v5 }
0x1af5   : > { %v3979_v20 = vsel %vm6409_vm9, %v3968_v62, -inf }
0x1af6   : > { %3980 = vmax.xlane.f32.xlu1 %v3979_v20 }
0x1afa   : > { %v3970_v13 = vpop.f32.mrf.mxu1 }
0x1afb   : > { %v3971_v10 = vadd.f32 %v4465_v19, %v3970_v13 }
0x1afd   : > { %v3982_v27 = vsel %vm6410_vm10, %v3971_v10, -inf }
0x1afe   : > { %3983 = vmax.xlane.f32.xlu2 %v3982_v27 }
0x1b02   : > { %v3973_v63 = vpop.f32.mrf.mxu1 }
0x1b03   : > { %v3974_v31 = vadd.f32 %v4465_v19, %v3973_v63 }
0x1b05   : > { %v3985_v32 = vsel %vm6411_vm12, %v3974_v31, -inf }
0x1b06   : > { %3986 = vmax.xlane.f32.xlu1 %v3985_v32 }
0x1b61   : > { %v3978_v57 = vpop.xlane.xlu2 %3977 }
0x1b62   : > { %v3988_v58 = vsub.f32 %v3965_v51, %v3978_v57 }
0x1b64   : > { %v3992_v23 = vmul.f32 1.442695, %v3988_v58 }
0x1b66   : > { %4710 = vpow2.f32 %v3992_v23 }
0x1b69   : > { %v3981_v29 = vpop.xlane.xlu1 %3980 }
0x1b6a   : > { %v3989_v44 = vsub.f32 %v3968_v62, %v3981_v29 }
0x1b6c   : > { %v4711_v45 = vpop.eup %4710  ;;  %v3994_v22 = vmul.f32 1.442695, %v3989_v44 }
0x1b6d   : > { %v4000_v9 = vsel %vm6412_vm11, %v4711_v45, 0.0 }
0x1b6e   : > { %4712 = vpow2.f32 %v3994_v22  ;;  %4001 = vadd.xlane.f32.xlu2 %v4000_v9 }
0x1b71   : > { %v3984_v6 = vpop.xlane.xlu2 %3983 }
0x1b72   : > { %v3990_v38 = vsub.f32 %v3971_v10, %v3984_v6 }
0x1b74   : > { %v4713_v50 = vpop.eup %4712  ;;  %v3996_v1 = vmul.f32 1.442695, %v3990_v38 }
0x1b75   : > { %v4003_v11 = vsel %vm6413_vm14, %v4713_v50, 0.0 }
0x1b76   : > { %4714 = vpow2.f32 %v3996_v1  ;;  %4004 = vadd.xlane.f32.xlu1 %v4003_v11 }
0x1b79   : > { %v3987_v26 = vpop.xlane.xlu1 %3986 }
0x1b7a   : > { %v3991_v54 = vsub.f32 %v3974_v31, %v3987_v26 }
0x1b7c   : > { %v6322_v0 = vpop.eup %4714  ;;  %v3998_v15 = vmul.f32 1.442695, %v3991_v54 }
0x1b7d   : > { %v4006_v24 = vsel %vm6414_vm0, %v6322_v0, 0.0 }
0x1b7e   : > { %4716 = vpow2.f32 %v3998_v15  ;;  %4007 = vadd.xlane.f32.xlu2 %v4006_v24 }
0x1b84   : > { %v6326_v40 = vpop.eup %4716 }
0x1b85   : > { %v4009_v55 = vsel %vm6415_vm15, %v6326_v40, 0.0 }
0x1b86   : > { %4010 = vadd.xlane.f32.xlu1 %v4009_v55 }
0x1be1   : > { %v4002_v28 = vpop.xlane.xlu2 %4001 }
0x1be2   : > { %4718 = vrcp.f32 %v4002_v28  ;;  %v4023_v39 = vand.u32 2147483648, %v4002_v28  ;;  %v4021_v35 = vand.u32 2147483647, %v4002_v28  ;;  %vm4017_vm3 = vweird.f32 %v4002_v28 }
0x1be4   : > { %v4024_v53 = vor.u32 1.1754944e-38, %v4023_v39  ;;  %vm4022_vm8 = vcmp.eq.f32.partialorder %v4021_v35, 8.507059e+37 }
0x1be8   : > { %v4719_v2 = vpop.eup %4718 }
0x1be9   : > { %v4013_v21 = vmul.f32 %v4719_v2, %v4002_v28  ;;  %v4005_v43 = vpop.xlane.xlu1 %4004  ;;  %vm4018_vm2 = vweird.f32 %v4719_v2 }
0x1bea   : > { %4720 = vrcp.f32 %v4005_v43  ;;  %vm4019_vm1 = vmor %vm4017_vm3, %vm4018_vm2  ;;  %v4038_v30 = vand.u32 2147483648, %v4005_v43  ;;  %v4036_v60 = vand.u32 2147483647, %v4005_v43  ;;  %vm4032_vm5 = vweird.f32 %v4005_v43 }
0x1beb   : > { %v4014_v25 = vsub.f32 1.0, %v4013_v21  ;;  %vm4172_vm2 = vcmask 7168   ;;  %vm4177_vm3 = vcmask 15360  }
0x1bec   : > { %v4039_v4 = vor.u32 1.1754944e-38, %v4038_v30  ;;  %vm4037_vm7 = vcmp.eq.f32.partialorder %v4036_v60, 8.507059e+37 }
0x1bed   : > { %v4015_v3 = vmul.f32 %v4719_v2, %v4014_v25 }
0x1bef   : > { %v4016_v12 = vadd.f32 %v4719_v2, %v4015_v3 }
0x1bf0   : > { %v4721_v7 = vpop.eup %4720 }
0x1bf1   : > { %v4020_v48 = vsel %vm4019_vm1, %v4719_v2, %v4016_v12  ;;  %v4028_v42 = vmul.f32 %v4721_v7, %v4005_v43  ;;  %v4008_v33 = vpop.xlane.xlu2 %4007  ;;  %vm4033_vm4 = vweird.f32 %v4721_v7  ;;  %vm4182_vm1 = vcmask 23552  }
0x1bf2   : > { %v4025_v16 = vsel %vm4022_vm8, %v4024_v53, %v4020_v48  ;;  %4722 = vrcp.f32 %v4008_v33  ;;  %vm4034_vm6 = vmor %vm4032_vm5, %vm4033_vm4  ;;  %v4053_v8 = vand.u32 2147483648, %v4008_v33  ;;  %v4051_v19 = vand.u32 2147483647, %v4008_v33 }
0x1bf3   : > { %v4029_v14 = vsub.f32 1.0, %v4028_v42  ;;  %v6330_v59 = vmul.f32 %v4711_v45, %v4025_v16  ;;  %vm4047_vm9 = vweird.f32 %v4008_v33  ;;  %vm6416_vm8 = vcmask 31744  }
0x1bf4   : > { %v4054_v52 = vor.u32 1.1754944e-38, %v4053_v8  ;;  %vm4052_vm12 = vcmp.eq.f32.partialorder %v4051_v19, 8.507059e+37  ;;  %vm6417_vm4 = vmmov %vm6416_vm8 }
0x1bf5   : > { %v4030_v18 = vmul.f32 %v4721_v7, %v4029_v14  ;;  %4108 = vrot.lane.b32.xlu0 %v6330_v59, %s4763_s3  ;;  %4076 = vrot.lane.b32.xlu2 %v6330_v59, %s4764_s4  ;;  %vm6418_vm5 = vmmov %vm6417_vm4 }
0x1bf7   : > { %v4031_v56 = vadd.f32 %v4721_v7, %v4030_v18 }
0x1bf8   : > { %v4723_v34 = vpop.eup %4722 }
0x1bf9   : > { %v4035_v46 = vsel %vm4034_vm6, %v4721_v7, %v4031_v56  ;;  %v4043_v17 = vmul.f32 %v4723_v34, %v4008_v33  ;;  %v4011_v36 = vpop.xlane.xlu1 %4010  ;;  %vm4048_vm13 = vweird.f32 %v4723_v34  ;;  %vm6419_vm6 = vmmov %vm6417_vm4 }
0x1bfa   : > { %v4040_v41 = vsel %vm4037_vm7, %v4039_v4, %v4035_v46  ;;  %4724 = vrcp.f32 %v4011_v36  ;;  %vm4049_vm10 = vmor %vm4047_vm9, %vm4048_vm13  ;;  %v4068_v27 = vand.u32 2147483648, %v4011_v36  ;;  %v4066_v31 = vand.u32 2147483647, %v4011_v36 }
0x1bfb   : > { %v4044_v37 = vsub.f32 1.0, %v4043_v17  ;;  %v6336_v47 = vmul.f32 %v4713_v50, %v4040_v41  ;;  %vm4062_vm14 = vweird.f32 %v4011_v36 }
0x1bfc   : > { %v4069_v57 = vor.u32 1.1754944e-38, %v4068_v27  ;;  %vm4067_vm15 = vcmp.eq.f32.partialorder %v4066_v31, 8.507059e+37 }
0x1bfd   : > { %v4045_v49 = vmul.f32 %v4723_v34, %v4044_v37  ;;  %4078 = vrot.lane.b32.xlu1 %v6336_v47, %s4764_s4  ;;  %4094 = vrot.lane.b32.xlu0 %v6336_v47, %s4765_s5 }
0x1bfe   : > { %4092 = vrot.lane.b32.xlu2 %v6330_v59, %s4765_s5 }
0x1bff   : > { %v4046_v61 = vadd.f32 %v4723_v34, %v4045_v49 }
0x1c00   : > { %v4725_v51 = vpop.eup %4724 }
0x1c01   : > { %v4050_v5 = vsel %vm4049_vm10, %v4723_v34, %v4046_v61  ;;  %v4058_v62 = vmul.f32 %v4725_v51, %v4011_v36  ;;  %vm4063_vm11 = vweird.f32 %v4725_v51 }
0x1c02   : > { %v4055_v20 = vsel %vm4052_vm12, %v4054_v52, %v4050_v5  ;;  %vm4064_vm0 = vmor %vm4062_vm14, %vm4063_vm11 }
0x1c03   : > { %v4059_v13 = vsub.f32 1.0, %v4058_v62  ;;  %v6343_v10 = vmul.f32 %v6322_v0, %v4055_v20 }
0x1c05   : > { %v4060_v63 = vmul.f32 %v4725_v51, %v4059_v13  ;;  %4096 = vrot.lane.b32.xlu1 %v6343_v10, %s4765_s5  ;;  %4080 = vrot.lane.b32.xlu0 %v6343_v10, %s4764_s4 }
0x1c07   : > { %v4061_v32 = vadd.f32 %v4725_v51, %v4060_v63 }
0x1c09   : > { %v4065_v58 = vsel %vm4064_vm0, %v4725_v51, %v4061_v32 }
0x1c0a   : > { %v4070_v23 = vsel %vm4067_vm15, %v4069_v57, %v4065_v58 }
0x1c0b   : > { %v6349_v29 = vmul.f32 %v6326_v40, %v4070_v23 }
0x1c0d   : > { %4098 = vrot.lane.b32.xlu2 %v6349_v29, %s4765_s5  ;;  %4110 = vrot.lane.b32.xlu1 %v6336_v47, %s4763_s3 }
0x1c0e   : > { %4082 = vrot.lane.b32.xlu0 %v6349_v29, %s4764_s4 }
0x1c15   : > { %4112 = vrot.lane.b32.xlu2 %v6343_v10, %s4763_s3 }
0x1c16   : > { %4114 = vrot.lane.b32.xlu0 %v6349_v29, %s4763_s3 }
0x1c4f   : > { %v4077_v44 = vpop.permute.xlu2 %4076 }
0x1c50   : > { %v4088_v45 = vadd.f32 %v4077_v44, %v6330_v59 }
0x1c52   : > { %4128 = vrot.lane.b32.xlu1 %v4088_v45, %s4766_s8 }
0x1c58   : > { %v4093_v22 = vpop.permute.xlu2 %4092 }
0x1c59   : > { %v4104_v9 = vadd.f32 %v4093_v22, %v4088_v45 }
0x1c5b   : > { %4144 = vrot.lane.b32.xlu2 %v4104_v9, %s4767_s9 }
0x1c67   : > { %v4109_v6 = vpop.permute.xlu0 %4108  ;;  %v4099_v40 = vpop.permute.xlu2 %4098 }
0x1c68   : > { %v4120_v38 = vadd.f32 %v4109_v6, %v4104_v9 }
0x1c6a   : > { %4160 = vrot.lane.b32.xlu0 %v4120_v38, %s4768_s14 }
0x1c6f   : > { %v4079_v50 = vpop.permute.xlu1 %4078  ;;  %v4095_v1 = vpop.permute.xlu0 %4094 }
0x1c70   : > { %v4089_v11 = vadd.f32 %v4079_v50, %v6336_v47  ;;  %v4113_v39 = vpop.permute.xlu2 %4112 }
0x1c72   : > { %v4105_v26 = vadd.f32 %v4095_v1, %v4089_v11  ;;  %4130 = vrot.lane.b32.xlu2 %v4089_v11, %s4766_s8 }
0x1c74   : > { %4146 = vrot.lane.b32.xlu0 %v4105_v26, %s4767_s9 }
0x1c77   : > { %v4081_v54 = vpop.permute.xlu0 %4080  ;;  %v4097_v15 = vpop.permute.xlu1 %4096 }
0x1c78   : > { %v4090_v0 = vadd.f32 %v4081_v54, %v6343_v10 }
0x1c7a   : > { %v4106_v24 = vadd.f32 %v4097_v15, %v4090_v0 }
0x1c7c   : > { %4148 = vrot.lane.b32.xlu1 %v4106_v24, %s4767_s9  ;;  %4132 = vrot.lane.b32.xlu0 %v4090_v0, %s4766_s8  ;;  %v4122_v35 = vadd.f32 %v4113_v39, %v4106_v24 }
0x1c7f   : > { %v4111_v21 = vpop.permute.xlu1 %4110 }
0x1c80   : > { %v4083_v55 = vpop.permute.xlu0 %4082  ;;  %v4121_v3 = vadd.f32 %v4111_v21, %v4105_v26 }
0x1c81   : > { %v4091_v28 = vadd.f32 %v4083_v55, %v6349_v29 }
0x1c83   : > { %v4107_v2 = vadd.f32 %v4099_v40, %v4091_v28 }
0x1c84   : > { %4134 = vrot.lane.b32.xlu1 %v4091_v28, %s4766_s8 }
0x1c85   : > { %4150 = vrot.lane.b32.xlu2 %v4107_v2, %s4767_s9 }
0x1c88   : > { %v4115_v43 = vpop.permute.xlu0 %4114 }
0x1c89   : > { %v4123_v25 = vadd.f32 %v4115_v43, %v4107_v2 }
0x1c8b   : > { %4166 = vrot.lane.b32.xlu0 %v4123_v25, %s4768_s14 }
0x1c8c   : > { %4162 = vrot.lane.b32.xlu1 %v4121_v3, %s4768_s14 }
0x1c8d   : > { %4164 = vrot.lane.b32.xlu2 %v4122_v35, %s4768_s14 }
0x1cb5   : > { %v4145_v12 = vpop.permute.xlu2 %4144 }
0x1cc4   : > { %v4129_v7 = vpop.permute.xlu1 %4128 }
0x1cc5   : > { %v4173_v53 = vsel %vm4172_vm2, %v6330_v59, %v4129_v7 }
0x1cc6   : > { %v4178_v42 = vsel %vm4177_vm3, %v4173_v53, %v4145_v12 }
0x1ccc   : > { %v4131_v16 = vpop.permute.xlu2 %4130 }
0x1ccd   : > { %v4174_v49 = vsel %vm4172_vm2, %v6336_v47, %v4131_v16 }
0x1cdc   : > { %v4161_v48 = vpop.permute.xlu0 %4160 }
0x1cdd   : > { %v4183_v33 = vsel %vm4182_vm1, %v4178_v42, %v4161_v48 }
0x1cde   : > { %v4187_v14 = vmax.f32 %v4183_v33, 5e-08 }
0x1cdf   : > { %v4151_v18 = vpop.permute.xlu2 %4150 }
0x1ce0   : > { %v4191_v30 = vmin.f32 %v4187_v14, 0.99999994 }
0x1ce2   : > { %4195 = vst.msk [vmem:[%s307_s17] sm:$0xff] %vm6416_vm8, %v4191_v30 }
0x1ce6   : > { %v4147_v60 = vpop.permute.xlu0 %4146 }
0x1ce7   : > { %v4165_v4 = vpop.permute.xlu2 %4164  ;;  %v4179_v51 = vsel %vm4177_vm3, %v4174_v49, %v4147_v60 }
0x1cee   : > { %v4149_v59 = vpop.permute.xlu1 %4148  ;;  %v4133_v56 = vpop.permute.xlu0 %4132 }
0x1cef   : > { %v4175_v34 = vsel %vm4172_vm2, %v6343_v10, %v4133_v56 }
0x1cf0   : > { %v4180_v46 = vsel %vm4177_vm3, %v4175_v34, %v4149_v59 }
0x1cf1   : > { %v4185_v17 = vsel %vm4182_vm1, %v4180_v46, %v4165_v4 }
0x1cf2   : > { %v4189_v36 = vmax.f32 %v4185_v17, 5e-08 }
0x1cf4   : > { %v4193_v41 = vmin.f32 %v4189_v36, 0.99999994 }
0x1cf6   : > { %4197 = vst.msk [vmem:[%s307_s17 + $0x10] sm:$0xff] %vm6417_vm4, %v4193_v41  ;;  %v4135_v37 = vpop.permute.xlu1 %4134 }
0x1cf7   : > { %v4176_v8 = vsel %vm4172_vm2, %v6349_v29, %v4135_v37 }
0x1cf8   : > { %v4181_v61 = vsel %vm4177_vm3, %v4176_v8, %v4151_v18 }
0x1cfd   : > { %v4167_v19 = vpop.permute.xlu0 %4166 }
0x1cfe   : > { %v4186_v52 = vsel %vm4182_vm1, %v4181_v61, %v4167_v19  ;;  %v4163_v5 = vpop.permute.xlu1 %4162 }
0x1cff   : > { %v4190_v62 = vmax.f32 %v4186_v52, 5e-08  ;;  %v4184_v20 = vsel %vm4182_vm1, %v4179_v51, %v4163_v5 }
0x1d00   : > { %v4188_v13 = vmax.f32 %v4184_v20, 5e-08 }
0x1d01   : > { %v4194_v27 = vmin.f32 %v4190_v62, 0.99999994 }
0x1d02   : > { %v4192_v10 = vmin.f32 %v4188_v13, 0.99999994 }
0x1d03   : > { %4198 = vst.msk [vmem:[%s307_s17 + $0x18] sm:$0xff] %vm6419_vm6, %v4194_v27 }
0x1d04   : > { %4196 = vst.msk [vmem:[%s307_s17 + $0x8] sm:$0xff] %vm6418_vm5, %v4192_v10 }
0x1d05 PF: > { %p9_p9 = scmp.ge.s32.totalorder %s4801_s13, 4   ;;  %s6420_s9 = smov %s4752_s10 }
0x1d06   : > { %s6421_s10 = smov %s4810_s16  ;;  %s6422_s11 = smov %s4801_s13 }
0x1d07   :  { %11 = sbr.rel (!%p9_p9) target bundleno = 2 (0x2), region = 101 }

</bundles_post_ra>
